<compile_context>
chip_gen: v5e
topology: v5e:2x2
jax: 0.10.0
libtpu: 0.0.40
codegen_flags: <defaults>
</compile_context>

<pallas_src>
import functools

import jax
import jax.numpy as jnp
from jax.experimental import pallas as pl
from jax.experimental.pallas import tpu as pltpu

_TARGET_BLOCK_ELEMS = 512 * 1024   # ~2 MiB per operand in f32
_TINY_TOTAL = 8 * 512              # below this, fused XLA beats a kernel launch


def _cdiv(a, b):
    return -(-a // b)


def _round_up(x, m):
    return _cdiv(x, m) * m


def _jsd_kernel(p_ref, q_ref, o_ref, *, eps):
    # Upcast to f32 for the clamp/log math; cast back only on store.
    p = jnp.maximum(p_ref[...].astype(jnp.float32), eps)
    q = jnp.maximum(q_ref[...].astype(jnp.float32), eps)
    m = 0.5 * (p + q)
    # 0.5*(m*(log m - log p) + m*(log m - log q)) == 0.5 * m * log(m*m / (p*q))
    # -> one log + one divide per element.
    o_ref[...] = (0.5 * m * jnp.log((m * m) / (p * q))).astype(o_ref.dtype)


def _pick_tiles(N, D):
    """Pick a legal (tile_n, tile_d) block for the (N, D) elementwise grid."""
    # Lane (minor) tile: full last dim when modest (always legal), otherwise a
    # lane-dense multiple-of-128 chunk.
    if D <= 2048:
        tile_d = D
    elif N >= 256:
        tile_d = 1024
    else:
        # Few rows, huge last dim: widen the lane tile so blocks stay ~TARGET elems.
        tile_d = min(_round_up(D, 128),
                     max(1024, (_TARGET_BLOCK_ELEMS // max(N, 1)) // 128 * 128))
    # Row (second-minor) tile: multiple of 8 or the full dim.
    tn = _TARGET_BLOCK_ELEMS // tile_d
    if tn >= N:
        tile_n = N
    else:
        tile_n = max(8, (tn // 8) * 8)
    return tile_n, tile_d


def jsd(p, q, eps=1e-12):
    """Elementwise Jensen-Shannon divergence (reduction='none').

    p, q: arrays of identical shape (..., D).  Returns (N, D) with
    N = prod(leading dims), matching the PyTorch module's .view(-1, D).
    """
    assert p.shape == q.shape, "p and q must have the same shape"
    D = p.shape[-1] if p.ndim else 1
    total = int(p.size)
    N = total // max(D, 1)
    out_dtype = p.dtype
    eps = float(eps)

    # Collapsing only the leading dims keeps the minor-dim layout: no HBM relayout copy.
    p2 = p.reshape(N, D)
    q2 = q.reshape(N, D)

    # Tiny inputs: launch + grid overhead dominates -> let XLA fuse it instead.
    if total <= _TINY_TOTAL:
        pf = jnp.maximum(p2.astype(jnp.float32), eps)
        qf = jnp.maximum(q2.astype(jnp.float32), eps)
        m = 0.5 * (pf + qf)
        return (0.5 * m * jnp.log((m * m) / (pf * qf))).astype(out_dtype)

    tile_n, tile_d = _pick_tiles(N, D)
    grid_n, grid_d = _cdiv(N, tile_n), _cdiv(D, tile_d)

    # v7x has 2 TensorCores: make sure a 'parallel' grid has >= 2 (ideally even) steps.
    if grid_n * grid_d == 1 and N >= 16:
        tile_n = _round_up(_cdiv(N, 2), 8)
        grid_n = _cdiv(N, tile_n)
    elif (grid_n * grid_d) % 2 == 1 and grid_n > 1:
        cand = max(8, _round_up(_cdiv(N, grid_n + 1), 8))
        if cand < tile_n and _cdiv(N, cand) % 2 == 0:
            tile_n, grid_n = cand, _cdiv(N, cand)

    kernel = functools.partial(_jsd_kernel, eps=eps)
    itemsize = jnp.dtype(out_dtype).itemsize

    return pl.pallas_call(
        kernel,
        out_shape=jax.ShapeDtypeStruct((N, D), out_dtype),
        grid_spec=pltpu.PrefetchScalarGridSpec(
            num_scalar_prefetch=0,
            grid=(grid_n, grid_d),
            in_specs=[
                pl.BlockSpec((tile_n, tile_d), lambda i, j: (i, j)),
                pl.BlockSpec((tile_n, tile_d), lambda i, j: (i, j)),
            ],
            out_specs=pl.BlockSpec((tile_n, tile_d), lambda i, j: (i, j)),
        ),
        compiler_params=pltpu.CompilerParams(
            dimension_semantics=("parallel", "parallel"),
        ),
        cost_estimate=pl.CostEstimate(
            flops=8 * total,
            transcendentals=2 * total,          # log + divide
            bytes_accessed=3 * total * itemsize,
        ),
    )(p2, q2)


def _jsd_ref(p, q, eps=1e-12):
    D = p.shape[-1]
    pf = jnp.maximum(p, eps).reshape(-1, D).astype(jnp.float32)
    qf = jnp.maximum(q, eps).reshape(-1, D).astype(jnp.float32)
    m = 0.5 * (pf + qf)
    log_m = jnp.log(m)
    return 0.5 * (m * (log_m - jnp.log(pf)) + m * (log_m - jnp.log(qf)))


def _make_inputs(key, shape, dtype=jnp.float32):
    kp, kq = jax.random.split(key)
    p = jax.nn.softmax(jax.random.normal(kp, shape, dtype=dtype), axis=-1)
    q = jax.nn.softmax(jax.random.normal(kq, shape, dtype=dtype), axis=-1)
    return p, q


if __name__ == "__main__":
    key = jax.random.PRNGKey(0)
    cases = [
        (2, 4, 16, 16),    # tiny: pure-jnp fast path (total <= 4096)
        (4, 8, 64, 64),    # Pallas kernel: row grid split across both TCs
        (4, 333, 200),     # Pallas kernel: partial last row-block, D not mult of 128
    ]
    for shape in cases:
        key, sub = jax.random.split(key)
        p, q = _make_inputs(sub, shape)
        out = jax.block_until_ready(jsd(p, q))
        ref = _jsd_ref(p, q)
        assert out.shape == ref.shape, (out.shape, ref.shape)
        assert bool(jnp.allclose(out, ref, atol=3e-6, rtol=1e-5)), f"mismatch for {shape}"

    print("KERNEL_OK")
</pallas_src>

<mosaic_0001>
module attributes {stable_mosaic.version = 11 : i64} {
  func.func @_jsd_kernel(%arg0: i32, %arg1: i32, %arg2: memref<1024x64xf32, #tpu.memory_space<vmem>>, %arg3: memref<1024x64xf32, #tpu.memory_space<vmem>>, %arg4: memref<1024x64xf32, #tpu.memory_space<vmem>>) attributes {dimension_semantics = [#tpu.dimension_semantics<parallel>, #tpu.dimension_semantics<parallel>], iteration_bounds = array<i64: 2, 1>, scalar_prefetch = 0 : i64, scratch_operands = 0 : i64, tpu.core_type = #tpu.core_type<tc>, window_params = [{transform_indices = @transform_0, window_bounds = array<i64: 1024, 64>}, {transform_indices = @transform_1, window_bounds = array<i64: 1024, 64>}, {transform_indices = @transform_2, window_bounds = array<i64: 1024, 64>}]} {
    %c0 = arith.constant 0 : index
    %c0_0 = arith.constant 0 : index
    %0 = vector.load %arg2[%c0, %c0_0] : memref<1024x64xf32, #tpu.memory_space<vmem>>, vector<1024x64xf32>
    %cst = arith.constant 9.99999996E-13 : f32
    %1 = vector.broadcast %cst : f32 to vector<1024x64xf32>
    %2 = arith.maximumf %0, %1 : vector<1024x64xf32>
    %c0_1 = arith.constant 0 : index
    %c0_2 = arith.constant 0 : index
    %3 = vector.load %arg3[%c0_1, %c0_2] : memref<1024x64xf32, #tpu.memory_space<vmem>>, vector<1024x64xf32>
    %cst_3 = arith.constant 9.99999996E-13 : f32
    %4 = vector.broadcast %cst_3 : f32 to vector<1024x64xf32>
    %5 = arith.maximumf %3, %4 : vector<1024x64xf32>
    %6 = arith.addf %2, %5 : vector<1024x64xf32>
    %cst_4 = arith.constant 5.000000e-01 : f32
    %7 = vector.broadcast %cst_4 : f32 to vector<1024x64xf32>
    %8 = arith.mulf %7, %6 : vector<1024x64xf32>
    %cst_5 = arith.constant 5.000000e-01 : f32
    %9 = vector.broadcast %cst_5 : f32 to vector<1024x64xf32>
    %10 = arith.mulf %9, %8 : vector<1024x64xf32>
    %11 = arith.mulf %8, %8 : vector<1024x64xf32>
    %12 = arith.mulf %2, %5 : vector<1024x64xf32>
    %13 = arith.divf %11, %12 : vector<1024x64xf32>
    %14 = math.log %13 : vector<1024x64xf32>
    %15 = arith.mulf %10, %14 : vector<1024x64xf32>
    %c0_6 = arith.constant 0 : index
    %c0_7 = arith.constant 0 : index
    %16 = vector.load %arg4[%c0_6, %c0_7] : memref<1024x64xf32, #tpu.memory_space<vmem>>, vector<1024x64xf32>
    tpu.vector_store %arg4[%c0_6, %c0_7], %15 {strides = array<i32>} : memref<1024x64xf32, #tpu.memory_space<vmem>>, vector<1024x64xf32>,
    return
  }
  func.func @transform_0(%arg0: i32, %arg1: i32) -> (i32, i32) {
    %c0_i32 = arith.constant 0 : i32
    return %arg0, %arg1 : i32, i32
  }
  func.func @transform_1(%arg0: i32, %arg1: i32) -> (i32, i32) {
    %c0_i32 = arith.constant 0 : i32
    return %arg0, %arg1 : i32, i32
  }
  func.func @transform_2(%arg0: i32, %arg1: i32) -> (i32, i32) {
    %c0_i32 = arith.constant 0 : i32
    return %arg0, %arg1 : i32, i32
  }
}

</mosaic_0001>

<bundles_post_ra>
// kernel: tpu_custom_call.1
= control target key start
LH: loop header
LB: loop body
LE: loop exit
PB: predicated region body
PF: predicated region fallthrough
CT: control target
= control target key end

     0   :  { %s4477_s9 = smov 0   ;;  %s4479_s10 = smov 0   ;;  %s8227_s0 = inlined_call_operand.vmem [shape: f32[2048,64], index: 0, kind: input, shape index: {}]   ;;  %s8228_s1 = inlined_call_operand.vmem [shape: f32[2048,64], index: 1, kind: input, shape index: {}]   ;;  %s8229_s2 = inlined_call_operand.vmem [shape: f32[2048,64], index: 2, kind: output, shape index: {}]  }
   0x1   :  { %s4481_s11 = smov 0  }
   0x2 LB: > { %s24_s12 = sadd.s32 1, %s4456_s10  ;;  %p3893_p0 = scmp.ge.s32.totalorder %s4460_s11, 1  ;;  %s4460_s11 = sphi %s4481_s11, %s12_s11   ;;  %s4456_s10 = sphi %s4479_s10, %s8721_s10   ;;  %s4452_s9 = sphi %s4477_s9, %s8720_s9  }
   0x3   : > { %p26_p1 = scmp.ge.s32.totalorder %s24_s12, 2  ;;  %p148_p2 = scmp.lt.s32.totalorder %s4460_s11, 3 }
   0x5   : > { %s8723_s12 = smov (%p26_p1, %s24_s12), 0  ;;  %p149_p3 = pnand %p3893_p0, %p148_p2 }
   0x6   : > { %s3894_s13 = sshll.u32 (!%p149_p3), %s4452_s9, 7 }
   0x7   : > { %152 = sbr.rel (%p149_p3) target bundleno = 802 (0x322), region = 28  ;;  %p185_p4 = scmp.lt.s32.totalorder (!%p149_p3), %s3894_s13, 255 }
   0xc   : > { %s8725_s13 = smov (!%p185_p4, %s3894_s13), 255  ;;  %vm3667_vm14 = vcmask 523264  }
   0xd   : > { %s4495_s14 = sshll.u32 %s8725_s13, 3 }
   0xe   : > { %s4501_s17 = scalar_lea.vmem %s8227_s0, %s4495_s14  ;;  %s4507_s20 = scalar_lea.vmem %s8228_s1, %s4495_s14 }
   0xf   : > { %v211_v0 = vld [vmem:[%s4501_s17] sm:$0xff]  ;;  %v212_v2 = vld [vmem:[%s4501_s17 + $0x8] sm:$0xff]  ;;  %v213_v8 = vld [vmem:[%s4501_s17 + $0x10] sm:$0xff]  ;;  %s4640_s23 = scalar_lea.vmem %s8229_s2, %s4495_s14 }
  0x10   : > { %v467_v1 = vld [vmem:[%s4507_s20] sm:$0xff]  ;;  %v339_v3 = vmax.f32 %v211_v0, 1e-12  ;;  %v468_v5 = vld [vmem:[%s4507_s20 + $0x8] sm:$0xff]  ;;  %v340_v6 = vmax.f32 %v212_v2, 1e-12 }
  0x11   : > { %v595_v4 = vmax.f32 %v467_v1, 1e-12  ;;  %v596_v7 = vmax.f32 %v468_v5, 1e-12  ;;  %v469_v9 = vld [vmem:[%s4507_s20 + $0x10] sm:$0xff]  ;;  %v214_v13 = vld [vmem:[%s4501_s17 + $0x18] sm:$0xff] }
  0x12   : > { %v470_v14 = vld [vmem:[%s4507_s20 + $0x18] sm:$0xff]  ;;  %v341_v16 = vmax.f32 %v213_v8, 1e-12  ;;  %v597_v17 = vmax.f32 %v469_v9, 1e-12  ;;  %v215_v26 = vld [vmem:[%s4501_s17 + $0x20] sm:$0xff] }
  0x13   : > { %v723_v10 = vadd.f32 %v595_v4, %v339_v3  ;;  %v1235_v11 = vmul.f32 %v595_v4, %v339_v3  ;;  %v1236_v12 = vmul.f32 %v596_v7, %v340_v6  ;;  %v724_v15 = vadd.f32 %v596_v7, %v340_v6  ;;  %v471_v31 = vld [vmem:[%s4507_s20 + $0x20] sm:$0xff]  ;;  %v216_v0 = vld [vmem:[%s4501_s17 + $0x28] sm:$0xff] }
  0x14   : > { %v342_v21 = vmax.f32 %v214_v13, 1e-12  ;;  %v598_v22 = vmax.f32 %v470_v14, 1e-12  ;;  %v725_v24 = vadd.f32 %v597_v17, %v341_v16  ;;  %v4519_v25 = vmul.f32 %v597_v17, %v341_v16  ;;  %v472_v1 = vld [vmem:[%s4507_s20 + $0x28] sm:$0xff] }
  0x15   : > { %3926 = vrcp.f32 %v1235_v11  ;;  %v851_v18 = vmul.f32 0.5, %v723_v10  ;;  %v1372_v19 = vand.u32 2147483647, %v1235_v11  ;;  %v1374_v20 = vand.u32 2147483648, %v1235_v11 }
  0x16   : > { %3928 = vrcp.f32 %v1236_v12  ;;  %vm1368_vm0 = vweird.f32 %v1235_v11  ;;  %v4517_v23 = vmul.f32 0.5, %v724_v15  ;;  %vm1383_vm1 = vweird.f32 %v1236_v12 }
  0x17   : > { %v4522_v27 = vmul.f32 0.5, %v851_v18  ;;  %v1107_v28 = vmul.f32 %v851_v18, %v851_v18  ;;  %vm4524_vm2 = vcmp.eq.f32.partialorder %v1372_v19, 8.507059e+37  ;;  %v726_v30 = vadd.f32 %v598_v22, %v342_v21 }
  0x18   : > { %v1375_v33 = vor.u32 1.1754944e-38, %v1374_v20  ;;  %v1387_v34 = vand.u32 2147483647, %v1236_v12  ;;  %3930 = vrcp.f32 %v4519_v25  ;;  %v4530_v35 = vmul.f32 %v598_v22, %v342_v21 }
  0x19   : > { %v1389_v38 = vand.u32 2147483648, %v1236_v12  ;;  %v4532_v39 = vmul.f32 0.5, %v725_v24  ;;  %v343_v40 = vmax.f32 %v215_v26, 1e-12  ;;  %v1402_v42 = vand.u32 2147483647, %v4519_v25 }
  0x1a   : > { %v1404_v43 = vand.u32 2147483648, %v4519_v25  ;;  %v599_v44 = vmax.f32 %v471_v31, 1e-12  ;;  %v1108_v46 = vmul.f32 %v4517_v23, %v4517_v23  ;;  %v4538_v47 = vmul.f32 0.5, %v726_v30  ;;  %v217_v24 = vld [vmem:[%s4501_s17 + $0x30] sm:$0xff] }
  0x1b   : > { %v3927_v32 = vpop.eup %3926  ;;  %vm4540_vm5 = vcmp.eq.f32.partialorder %v1387_v34, 8.507059e+37  ;;  %3932 = vrcp.f32 %v4530_v35  ;;  %v1390_v51 = vor.u32 1.1754944e-38, %v1389_v38  ;;  %v1109_v52 = vmul.f32 %v4532_v39, %v4532_v39 }
  0x1c   : > { %v3929_v36 = vpop.eup %3928  ;;  %v1364_v37 = vmul.f32 %v3927_v32, %v1235_v11  ;;  %vm1369_vm3 = vweird.f32 %v3927_v32  ;;  %vm1398_vm6 = vweird.f32 %v4519_v25  ;;  %vm4553_vm8 = vcmp.eq.f32.partialorder %v1402_v42, 8.507059e+37 }
  0x1d   : > { %v1379_v41 = vmul.f32 %v3929_v36, %v1236_v12  ;;  %vm1384_vm4 = vweird.f32 %v3929_v36  ;;  %vm4549_vm7 = vmor %vm1368_vm0, %vm1369_vm3  ;;  %v1405_v57 = vor.u32 1.1754944e-38, %v1404_v43  ;;  %v4557_v58 = vmul.f32 %v599_v44, %v343_v40 }
  0x1e   : > { %v1365_v45 = vsub.f32 1.0, %v1364_v37  ;;  %v3931_v53 = vpop.eup %3930  ;;  %vm4560_vm9 = vmor %vm1383_vm1, %vm1384_vm4  ;;  %v4567_v62 = vmul.f32 %v4538_v47, %v4538_v47  ;;  %v1417_v63 = vand.u32 2147483647, %v4530_v35  ;;  %v1419_v3 = vand.u32 2147483648, %v4530_v35 }
  0x1f   : > { %v1380_v48 = vsub.f32 1.0, %v1379_v41  ;;  %v1394_v61 = vmul.f32 %v3931_v53, %v4519_v25  ;;  %v727_v4 = vadd.f32 %v599_v44, %v343_v40  ;;  %3934 = vrcp.f32 %v4557_v58 }
  0x20   : > { %v1366_v50 = vmul.f32 %v3927_v32, %v1365_v45  ;;  %vm1399_vm10 = vweird.f32 %v3931_v53  ;;  %vm1413_vm11 = vweird.f32 %v4530_v35  ;;  %v344_v10 = vmax.f32 %v216_v0, 1e-12 }
  0x21   : > { %v1381_v55 = vmul.f32 %v3929_v36, %v1380_v48  ;;  %v1395_v6 = vsub.f32 1.0, %v1394_v61  ;;  %v3933_v7 = vpop.eup %3932  ;;  %v600_v11 = vmax.f32 %v472_v1, 1e-12  ;;  %vm4586_vm12 = vmor %vm1398_vm6, %vm1399_vm10  ;;  %vm4590_vm13 = vcmp.eq.f32.partialorder %v1417_v63, 8.507059e+37 }
  0x22   : > { %v1367_v59 = vadd.f32 %v3927_v32, %v1366_v50  ;;  %v1409_v15 = vmul.f32 %v3933_v7, %v4530_v35  ;;  %v1420_v19 = vor.u32 1.1754944e-38, %v1419_v3  ;;  %v4594_v20 = vmul.f32 0.5, %v727_v4 }
  0x23   : > { %v1382_v2 = vadd.f32 %v3929_v36, %v1381_v55  ;;  %v1396_v14 = vmul.f32 %v3931_v53, %v1395_v6  ;;  %vm1414_vm15 = vweird.f32 %v3933_v7  ;;  %vm1428_vm0 = vweird.f32 %v4557_v58 }
  0x24   : > { %v1371_v5 = vsel %vm4549_vm7, %v3927_v32, %v1367_v59  ;;  %v1410_v22 = vsub.f32 1.0, %v1409_v15  ;;  %v1432_v25 = vand.u32 2147483647, %v4557_v58  ;;  %v1434_v32 = vand.u32 2147483648, %v4557_v58  ;;  %vm4610_vm1 = vmor %vm1413_vm11, %vm1414_vm15 }
  0x25   : > { %v1376_v8 = vsel %vm4524_vm2, %v1375_v33, %v1371_v5  ;;  %v1386_v9 = vsel %vm4560_vm9, %v3929_v36, %v1382_v2  ;;  %v1397_v21 = vadd.f32 %v3931_v53, %v1396_v14  ;;  %v3935_v26 = vpop.eup %3934  ;;  %v473_v33 = vld [vmem:[%s4507_s20 + $0x30] sm:$0xff]  ;;  %v728_v37 = vadd.f32 %v600_v11, %v344_v10 }
  0x26   : > { %v1377_v12 = vmul.f32 %v1376_v8, %v1107_v28  ;;  %v1391_v13 = vsel %vm4540_vm5, %v1390_v51, %v1386_v9  ;;  %v4599_v28 = vmul.f32 %v600_v11, %v344_v10  ;;  %v1411_v30 = vmul.f32 %v3933_v7, %v1410_v22  ;;  %v218_v51 = vld [vmem:[%s4501_s17 + $0x38] sm:$0xff]  ;;  %v219_v11 = vld [vmem:[%s4501_s17 + $0x40] sm:$0xff] }
  0x27   : > { %v1392_v16 = vmul.f32 %v1391_v13, %v1108_v46  ;;  %v1401_v29 = vsel %vm4586_vm12, %v3931_v53, %v1397_v21  ;;  %v1424_v31 = vmul.f32 %v3935_v26, %v4557_v58  ;;  %v345_v38 = vmax.f32 %v217_v24, 1e-12  ;;  %v475_v21 = vld [vmem:[%s4507_s20 + $0x40] sm:$0xff] }
  0x28   : > { %3936 = vlog2.f32 %v1377_v12  ;;  %v1406_v34 = vsel %vm4553_vm8, %v1405_v57, %v1401_v29  ;;  %v1412_v41 = vadd.f32 %v3933_v7, %v1411_v30  ;;  %vm1429_vm2 = vweird.f32 %v3935_v26 }
  0x29   : > { %3938 = vlog2.f32 %v1392_v16  ;;  %v1407_v40 = vmul.f32 %v1406_v34, %v1109_v52  ;;  %v1425_v42 = vsub.f32 1.0, %v1424_v31  ;;  %v980_v43 = vmul.f32 0.5, %v4517_v23  ;;  %v474_v52 = vld [vmem:[%s4507_s20 + $0x38] sm:$0xff]  ;;  %vm4632_vm4 = vmor %vm1428_vm0, %vm1429_vm2 }
  0x2a   : > { %3940 = vrcp.f32 %v4599_v28  ;;  %v981_v44 = vmul.f32 0.5, %v4532_v39  ;;  %v1111_v35 = vmul.f32 %v4594_v20, %v4594_v20  ;;  %v601_v45 = vmax.f32 %v473_v33, 1e-12 }
  0x2b   : > { %3942 = vlog2.f32 %v1407_v40  ;;  %v1416_v48 = vsel %vm4610_vm1, %v3933_v7, %v1412_v41  ;;  %v1426_v49 = vmul.f32 %v3935_v26, %v1425_v42  ;;  %vm4621_vm3 = vcmp.eq.f32.partialorder %v1432_v25, 8.507059e+37  ;;  %v476_v40 = vld [vmem:[%s4507_s20 + $0x48] sm:$0xff] }
  0x2c   : > { %v1421_v39 = vsel %vm4590_vm13, %v1420_v19, %v1416_v48  ;;  %v1435_v55 = vor.u32 1.1754944e-38, %v1434_v32  ;;  %v856_v56 = vmul.f32 0.5, %v728_v37  ;;  %v4643_v61 = vmul.f32 %v601_v45, %v345_v38 }
  0x2d   : > { %v1422_v59 = vmul.f32 %v1421_v39, %v4567_v62  ;;  %v1427_v60 = vadd.f32 %v3935_v26, %v1426_v49  ;;  %v729_v0 = vadd.f32 %v601_v45, %v345_v38  ;;  %v346_v1 = vmax.f32 %v218_v51, 1e-12  ;;  %v220_v38 = vld [vmem:[%s4501_s17 + $0x48] sm:$0xff] }
  0x2e   : > { %v3937_v46 = vpop.eup %3936  ;;  %v602_v2 = vmax.f32 %v474_v52, 1e-12  ;;  %vm1443_vm5 = vweird.f32 %v4599_v28  ;;  %v1449_v6 = vand.u32 2147483648, %v4599_v28  ;;  %v982_v16 = vmul.f32 0.5, %v4538_v47 }
  0x2f   : > { %v3939_v23 = vpop.eup %3938  ;;  %v3284_v53 = vmul.f32 0.6931472, %v3937_v46  ;;  %3944 = vlog2.f32 %v1422_v59  ;;  %v1431_v4 = vsel %vm4632_vm4, %v3935_v26, %v1427_v60  ;;  %v857_v13 = vmul.f32 0.5, %v729_v0 }
  0x30   : > { %v3286_v57 = vmul.f32 0.6931472, %v3939_v23  ;;  %v3941_v58 = vpop.eup %3940  ;;  %v1436_v62 = vsel %vm4621_vm3, %v1435_v55, %v1431_v4  ;;  %3946 = vrcp.f32 %v4643_v61  ;;  %v4660_v14 = vmul.f32 %v602_v2, %v346_v1 }
  0x31   : > { %v3539_v63 = vmul.f32 %v3284_v53, %v4522_v27  ;;  %v1439_v5 = vmul.f32 %v3941_v58, %v4599_v28  ;;  %v1447_v27 = vand.u32 2147483647, %v4599_v28  ;;  %v3943_v7 = vpop.eup %3942  ;;  %v1437_v8 = vmul.f32 %v1436_v62, %v1111_v35 }
  0x32   : > { %v3540_v3 = vmul.f32 %v3286_v57, %v980_v43  ;;  %vm1444_vm6 = vweird.f32 %v3941_v58  ;;  %v3288_v10 = vmul.f32 0.6931472, %v3943_v7  ;;  %v1112_v17 = vmul.f32 %v856_v56, %v856_v56 }
  0x33   : > { %3668 = vst.msk [vmem:[%s4640_s23] sm:$0xff] %vm3667_vm14, %v3539_v63  ;;  %v1440_v9 = vsub.f32 1.0, %v1439_v5  ;;  %3948 = vlog2.f32 %v1437_v8  ;;  %vm4665_vm7 = vmor %vm1443_vm5, %vm1444_vm6  ;;  %v1450_v19 = vor.u32 1.1754944e-38, %v1449_v6  ;;  %vm1448_vm8 = vcmp.eq.f32.partialorder %v1447_v27, 8.507059e+37 }
  0x34   : > { %3669 = vst.msk [vmem:[%s4640_s23 + $0x8] sm:$0xff] %vm3667_vm14, %v3540_v3  ;;  %v3541_v15 = vmul.f32 %v3288_v10, %v981_v44  ;;  %3950 = vrcp.f32 %v4660_v14  ;;  %v347_v26 = vmax.f32 %v219_v11, 1e-12  ;;  %v983_v25 = vmul.f32 0.5, %v4594_v20 }
  0x35   : > { %v1441_v12 = vmul.f32 %v3941_v58, %v1440_v9  ;;  %v3945_v22 = vpop.eup %3944  ;;  %v730_v28 = vadd.f32 %v602_v2, %v346_v1  ;;  %v4674_v30 = vmul.f32 0.5, %v856_v56  ;;  %v1113_v32 = vmul.f32 %v857_v13, %v857_v13  ;;  %v477_v2 = vld [vmem:[%s4507_s20 + $0x50] sm:$0xff] }
  0x36   : > { %3670 = vst.msk [vmem:[%s4640_s23 + $0x10] sm:$0xff] %vm3667_vm14, %v3541_v15  ;;  %v3290_v47 = vmul.f32 0.6931472, %v3945_v22  ;;  %v3947_v29 = vpop.eup %3946  ;;  %v603_v33 = vmax.f32 %v475_v21, 1e-12  ;;  %vm1458_vm9 = vweird.f32 %v4643_v61  ;;  %v1464_v43 = vand.u32 2147483648, %v4643_v61 }
  0x37   : > { %v1442_v24 = vadd.f32 %v3941_v58, %v1441_v12  ;;  %v1454_v37 = vmul.f32 %v3947_v29, %v4643_v61  ;;  %v1462_v42 = vand.u32 2147483647, %v4643_v61  ;;  %vm1459_vm10 = vweird.f32 %v3947_v29  ;;  %v221_v61 = vld [vmem:[%s4501_s17 + $0x50] sm:$0xff] }
  0x38   : > { %v3542_v34 = vmul.f32 %v3290_v47, %v982_v16  ;;  %v4684_v44 = vmul.f32 %v603_v33, %v347_v26  ;;  %v858_v46 = vmul.f32 0.5, %v730_v28  ;;  %v1477_v49 = vand.u32 2147483647, %v4660_v14  ;;  %vm4693_vm11 = vmor %vm1458_vm9, %vm1459_vm10 }
  0x39   : > { %v1446_v31 = vsel %vm4665_vm7, %v3941_v58, %v1442_v24  ;;  %v3949_v41 = vpop.eup %3948  ;;  %v1455_v45 = vsub.f32 1.0, %v1454_v37  ;;  %v348_v50 = vmax.f32 %v220_v38, 1e-12  ;;  %v604_v51 = vmax.f32 %v476_v40, 1e-12 }
  0x3a   : > { %v1451_v36 = vsel %vm1448_vm8, %v1450_v19, %v1446_v31  ;;  %3671 = vst.msk [vmem:[%s4640_s23 + $0x18] sm:$0xff] %vm3667_vm14, %v3542_v34  ;;  %v3292_v35 = vmul.f32 0.6931472, %v3949_v41  ;;  %v3951_v48 = vpop.eup %3950  ;;  %v1479_v39 = vand.u32 2147483648, %v4660_v14  ;;  %vm4697_vm12 = vcmp.eq.f32.partialorder %v1462_v42, 8.507059e+37  ;;  %v478_v19 = vld [vmem:[%s4507_s20 + $0x58] sm:$0xff] }
  0x3b   : > { %v1452_v20 = vmul.f32 %v1451_v36, %v1112_v17  ;;  %v1456_v23 = vmul.f32 %v3947_v29, %v1455_v45  ;;  %v1469_v53 = vmul.f32 %v3951_v48, %v4660_v14  ;;  %v1465_v56 = vor.u32 1.1754944e-38, %v1464_v43 }
  0x3c   : > { %v3543_v52 = vmul.f32 %v3292_v35, %v983_v25  ;;  %v731_v57 = vadd.f32 %v603_v33, %v347_v26  ;;  %vm1473_vm13 = vweird.f32 %v4660_v14  ;;  %vm1474_vm15 = vweird.f32 %v3951_v48  ;;  %v4727_v14 = vld [vmem:[%s4501_s17 + $0x58] sm:$0xff] }
  0x3d   : > { %3952 = vlog2.f32 %v1452_v20  ;;  %v1457_v59 = vadd.f32 %v3947_v29, %v1456_v23  ;;  %v1470_v60 = vsub.f32 1.0, %v1469_v53  ;;  %v4706_v58 = vmul.f32 0.5, %v857_v13  ;;  %vm4721_vm1 = vmor %vm1473_vm13, %vm1474_vm15  ;;  %v479_v23 = vld [vmem:[%s4507_s20 + $0x60] sm:$0xff] }
  0x3e   : > { %3954 = vrcp.f32 %v4684_v44  ;;  %3672 = vst.msk [vmem:[%s4640_s23 + $0x20] sm:$0xff] %vm3667_vm14, %v3543_v52  ;;  %v4708_v63 = vmul.f32 0.5, %v858_v46  ;;  %v1114_v0 = vmul.f32 %v858_v46, %v858_v46  ;;  %v4710_v1 = vmul.f32 %v604_v51, %v348_v50  ;;  %v223_v52 = vld [vmem:[%s4501_s17 + $0x60] sm:$0xff] }
  0x3f   : > { %v1461_v3 = vsel %vm4693_vm11, %v3947_v29, %v1457_v59  ;;  %v1471_v4 = vmul.f32 %v3951_v48, %v1470_v60  ;;  %vm4715_vm0 = vcmp.eq.f32.partialorder %v1477_v49, 8.507059e+37  ;;  %v1480_v62 = vor.u32 1.1754944e-38, %v1479_v39 }
  0x40   : > { %v1466_v6 = vsel %vm4697_vm12, %v1465_v56, %v1461_v3  ;;  %v859_v8 = vmul.f32 0.5, %v731_v57  ;;  %3956 = vrcp.f32 %v4710_v1  ;;  %v349_v9 = vmax.f32 %v221_v61, 1e-12 }
  0x41   : > { %v1467_v11 = vmul.f32 %v1466_v6, %v1113_v32  ;;  %v1472_v12 = vadd.f32 %v3951_v48, %v1471_v4  ;;  %v605_v13 = vmax.f32 %v477_v2, 1e-12  ;;  %vm1488_vm2 = vweird.f32 %v4684_v44 }
  0x42   : > { %v4729_v16 = vmul.f32 0.5, %v859_v8  ;;  %v1492_v17 = vand.u32 2147483647, %v4684_v44  ;;  %v732_v18 = vadd.f32 %v604_v51, %v348_v50  ;;  %v1494_v47 = vand.u32 2147483648, %v4684_v44 }
  0x43   : > { %v3953_v27 = vpop.eup %3952  ;;  %3958 = vlog2.f32 %v1467_v11  ;;  %v1476_v22 = vsel %vm4721_vm1, %v3951_v48, %v1472_v12  ;;  %v350_v25 = vmax.f32 %v4727_v14, 1e-12  ;;  %v4744_v31 = vmul.f32 %v605_v13, %v349_v9 }
  0x44   : > { %v3294_v10 = vmul.f32 0.6931472, %v3953_v27  ;;  %v3955_v15 = vpop.eup %3954  ;;  %v1481_v26 = vsel %vm4715_vm0, %v1480_v62, %v1476_v22  ;;  %v1115_v33 = vmul.f32 %v859_v8, %v859_v8  ;;  %vm4746_vm4 = vcmp.eq.f32.partialorder %v1492_v17, 8.507059e+37  ;;  %v224_v8 = vld [vmem:[%s4501_s17 + $0x68] sm:$0xff] }
  0x45   : > { %v1484_v24 = vmul.f32 %v3955_v15, %v4684_v44  ;;  %vm1489_vm3 = vweird.f32 %v3955_v15  ;;  %v1482_v28 = vmul.f32 %v1481_v26, %v1114_v0  ;;  %v860_v36 = vmul.f32 0.5, %v732_v18 }
  0x46   : > { %v3544_v21 = vmul.f32 %v3294_v10, %v4674_v30  ;;  %v606_v30 = vmax.f32 %v478_v19, 1e-12  ;;  %v3957_v32 = vpop.eup %3956  ;;  %v1507_v37 = vand.u32 2147483647, %v4710_v1  ;;  %v1509_v41 = vand.u32 2147483648, %v4710_v1  ;;  %vm4756_vm5 = vmor %vm1488_vm2, %vm1489_vm3 }
  0x47   : > { %v1485_v29 = vsub.f32 1.0, %v1484_v24  ;;  %3960 = vlog2.f32 %v1482_v28  ;;  %v1499_v40 = vmul.f32 %v3957_v32, %v4710_v1  ;;  %v1495_v42 = vor.u32 1.1754944e-38, %v1494_v47 }
  0x48   : > { %3673 = vst.msk [vmem:[%s4640_s23 + $0x28] sm:$0xff] %vm3667_vm14, %v3544_v21  ;;  %vm1503_vm6 = vweird.f32 %v4710_v1  ;;  %v733_v43 = vadd.f32 %v605_v13, %v349_v9  ;;  %3962 = vrcp.f32 %v4744_v31  ;;  %vm1504_vm7 = vweird.f32 %v3957_v32  ;;  %v480_v9 = vld [vmem:[%s4507_s20 + $0x68] sm:$0xff] }
  0x49   : > { %v1486_v38 = vmul.f32 %v3955_v15, %v1485_v29  ;;  %v3959_v35 = vpop.eup %3958  ;;  %v1500_v46 = vsub.f32 1.0, %v1499_v40  ;;  %v4762_v48 = vmul.f32 %v606_v30, %v350_v25  ;;  %v4764_v50 = vmul.f32 0.5, %v860_v36  ;;  %vm4780_vm9 = vmor %vm1503_vm6, %vm1504_vm7 }
  0x4a   : > { %v3296_v49 = vmul.f32 0.6931472, %v3959_v35  ;;  %v1116_v44 = vmul.f32 %v860_v36, %v860_v36  ;;  %vm4766_vm8 = vcmp.eq.f32.partialorder %v1507_v37, 8.507059e+37  ;;  %v1510_v54 = vor.u32 1.1754944e-38, %v1509_v41 }
  0x4b   : > { %v1487_v45 = vadd.f32 %v3955_v15, %v1486_v38  ;;  %v1501_v39 = vmul.f32 %v3957_v32, %v1500_v46  ;;  %3964 = vrcp.f32 %v4762_v48  ;;  %v861_v59 = vmul.f32 0.5, %v733_v43  ;;  %v225_v38 = vld [vmem:[%s4501_s17 + $0x70] sm:$0xff] }
  0x4c   : > { %v3545_v55 = vmul.f32 %v3296_v49, %v4706_v58  ;;  %v1524_v60 = vand.u32 2147483648, %v4744_v31  ;;  %v351_v3 = vmax.f32 %v223_v52, 1e-12  ;;  %v607_v4 = vmax.f32 %v479_v23, 1e-12  ;;  %v481_v43 = vld [vmem:[%s4507_s20 + $0x70] sm:$0xff] }
  0x4d   : > { %v1491_v53 = vsel %vm4756_vm5, %v3955_v15, %v1487_v45  ;;  %v3961_v61 = vpop.eup %3960  ;;  %v1502_v2 = vadd.f32 %v3957_v32, %v1501_v39  ;;  %v4787_v62 = vmul.f32 0.5, %v861_v59  ;;  %vm1518_vm10 = vweird.f32 %v4744_v31  ;;  %v226_v23 = vld [vmem:[%s4501_s17 + $0x78] sm:$0xff] }
  0x4e   : > { %v1496_v56 = vsel %vm4746_vm4, %v1495_v42, %v1491_v53  ;;  %v3963_v58 = vpop.eup %3962  ;;  %3674 = vst.msk [vmem:[%s4640_s23 + $0x30] sm:$0xff] %vm3667_vm14, %v3545_v55  ;;  %v3298_v5 = vmul.f32 0.6931472, %v3961_v61  ;;  %v734_v1 = vadd.f32 %v606_v30, %v350_v25  ;;  %v1522_v7 = vand.u32 2147483647, %v4744_v31 }
  0x4f   : > { %v1497_v0 = vmul.f32 %v1496_v56, %v1115_v33  ;;  %v1506_v27 = vsel %vm4780_vm9, %v3957_v32, %v1502_v2  ;;  %v1514_v6 = vmul.f32 %v3963_v58, %v4744_v31  ;;  %v1525_v12 = vor.u32 1.1754944e-38, %v1524_v60  ;;  %v482_v56 = vld [vmem:[%s4507_s20 + $0x78] sm:$0xff] }
  0x50   : > { %v3546_v10 = vmul.f32 %v3298_v5, %v4708_v63  ;;  %v1511_v11 = vsel %vm4766_vm8, %v1510_v54, %v1506_v27  ;;  %v735_v13 = vadd.f32 %v607_v4, %v351_v3  ;;  %vm1519_vm11 = vweird.f32 %v3963_v58 }
  0x51   : > { %3966 = vlog2.f32 %v1497_v0  ;;  %v3965_v14 = vpop.eup %3964  ;;  %v1512_v15 = vmul.f32 %v1511_v11, %v1116_v44  ;;  %v1515_v17 = vsub.f32 1.0, %v1514_v6  ;;  %v4799_v18 = vmul.f32 %v607_v4, %v351_v3  ;;  %vm4808_vm13 = vmor %vm1518_vm10, %vm1519_vm11 }
  0x52   : > { %3675 = vst.msk [vmem:[%s4640_s23 + $0x38] sm:$0xff] %vm3667_vm14, %v3546_v10  ;;  %v862_v19 = vmul.f32 0.5, %v734_v1  ;;  %v1529_v21 = vmul.f32 %v3965_v14, %v4762_v48  ;;  %v352_v22 = vmax.f32 %v224_v8, 1e-12  ;;  %v608_v24 = vmax.f32 %v480_v9, 1e-12 }
  0x53   : > { %3968 = vlog2.f32 %v1512_v15  ;;  %v1516_v63 = vmul.f32 %v3963_v58, %v1515_v17  ;;  %vm1533_vm12 = vweird.f32 %v4762_v48  ;;  %v1539_v26 = vand.u32 2147483648, %v4762_v48 }
  0x54   : > { %v1530_v25 = vsub.f32 1.0, %v1529_v21  ;;  %vm1534_vm15 = vweird.f32 %v3965_v14  ;;  %v1537_v28 = vand.u32 2147483647, %v4762_v48  ;;  %3970 = vrcp.f32 %v4799_v18 }
  0x55   : > { %v1117_v30 = vmul.f32 %v861_v59, %v861_v59  ;;  %v1517_v32 = vadd.f32 %v3963_v58, %v1516_v63  ;;  %vm1523_vm0 = vcmp.eq.f32.partialorder %v1522_v7, 8.507059e+37  ;;  %v4814_v33 = vmul.f32 %v608_v24, %v352_v22  ;;  %vm4823_vm1 = vmor %vm1533_vm12, %vm1534_vm15 }
  0x56   : > { %v4816_v36 = vmul.f32 0.5, %v862_v19  ;;  %v1118_v31 = vmul.f32 %v862_v19, %v862_v19  ;;  %v1531_v37 = vmul.f32 %v3965_v14, %v1530_v25  ;;  %v1540_v20 = vor.u32 1.1754944e-38, %v1539_v26 }
  0x57   : > { %v3967_v29 = vpop.eup %3966  ;;  %v1521_v40 = vsel %vm4808_vm13, %v3963_v58, %v1517_v32  ;;  %v863_v42 = vmul.f32 0.5, %v735_v13  ;;  %3972 = vrcp.f32 %v4814_v33  ;;  %vm1538_vm2 = vcmp.eq.f32.partialorder %v1537_v28, 8.507059e+37  ;;  %v227_v32 = vld [vmem:[%s4501_s17 + $0x80] sm:$0xff] }
  0x58   : > { %v3300_v34 = vmul.f32 0.6931472, %v3967_v29  ;;  %v1526_v45 = vsel %vm1523_vm0, %v1525_v12, %v1521_v40  ;;  %v1532_v46 = vadd.f32 %v3965_v14, %v1531_v37  ;;  %v1554_v48 = vand.u32 2147483648, %v4799_v18 }
  0x59   : > { %v3969_v49 = vpop.eup %3968  ;;  %v1527_v44 = vmul.f32 %v1526_v45, %v1117_v30  ;;  %v4830_v51 = vmul.f32 0.5, %v863_v42  ;;  %v353_v52 = vmax.f32 %v225_v38, 1e-12  ;;  %v609_v55 = vmax.f32 %v481_v43, 1e-12  ;;  %v483_v38 = vld [vmem:[%s4507_s20 + $0x80] sm:$0xff] }
  0x5a   : > { %v3547_v35 = vmul.f32 %v3300_v34, %v4729_v16  ;;  %v3971_v53 = vpop.eup %3970  ;;  %v3302_v39 = vmul.f32 0.6931472, %v3969_v49  ;;  %v1536_v54 = vsel %vm4823_vm1, %v3965_v14, %v1532_v46  ;;  %v736_v16 = vadd.f32 %v608_v24, %v352_v22  ;;  %v484_v43 = vld [vmem:[%s4507_s20 + $0x88] sm:$0xff] }
  0x5b   : > { %3974 = vlog2.f32 %v1527_v44  ;;  %v1541_v57 = vsel %vm1538_vm2, %v1540_v20, %v1536_v54  ;;  %v1544_v59 = vmul.f32 %v3971_v53, %v4799_v18  ;;  %vm1548_vm3 = vweird.f32 %v4799_v18 }
  0x5c   : > { %3676 = vst.msk [vmem:[%s4640_s23 + $0x40] sm:$0xff] %vm3667_vm14, %v3547_v35  ;;  %v3548_v60 = vmul.f32 %v3302_v39, %v4764_v50  ;;  %v1542_v61 = vmul.f32 %v1541_v57, %v1118_v31  ;;  %vm1549_vm4 = vweird.f32 %v3971_v53  ;;  %v1552_v0 = vand.u32 2147483647, %v4799_v18 }
  0x5d   : > { %v3973_v2 = vpop.eup %3972  ;;  %v1545_v3 = vsub.f32 1.0, %v1544_v59  ;;  %v4843_v4 = vmul.f32 %v609_v55, %v353_v52  ;;  %v354_v58 = vmax.f32 %v226_v23, 1e-12  ;;  %v610_v5 = vmax.f32 %v482_v56, 1e-12  ;;  %vm4854_vm5 = vmor %vm1548_vm3, %vm1549_vm4 }
  0x5e   : > { %3677 = vst.msk [vmem:[%s4640_s23 + $0x48] sm:$0xff] %vm3667_vm14, %v3548_v60  ;;  %3976 = vlog2.f32 %v1542_v61  ;;  %v1555_v1 = vor.u32 1.1754944e-38, %v1554_v48  ;;  %v864_v27 = vmul.f32 0.5, %v736_v16  ;;  %v1559_v6 = vmul.f32 %v3973_v2, %v4814_v33 }
  0x5f   : > { %v1546_v7 = vmul.f32 %v3971_v53, %v1545_v3  ;;  %v1567_v50 = vand.u32 2147483647, %v4814_v33  ;;  %v1569_v8 = vand.u32 2147483648, %v4814_v33  ;;  %3978 = vrcp.f32 %v4843_v4  ;;  %v229_v3 = vld [vmem:[%s4501_s17 + $0x90] sm:$0xff] }
  0x60   : > { %v1560_v10 = vsub.f32 1.0, %v1559_v6  ;;  %vm1563_vm6 = vweird.f32 %v4814_v33  ;;  %vm1564_vm7 = vweird.f32 %v3973_v2  ;;  %v737_v11 = vadd.f32 %v609_v55, %v353_v52 }
  0x61   : > { %v3975_v12 = vpop.eup %3974  ;;  %v1119_v13 = vmul.f32 %v863_v42, %v863_v42  ;;  %v1547_v14 = vadd.f32 %v3971_v53, %v1546_v7  ;;  %vm1553_vm8 = vcmp.eq.f32.partialorder %v1552_v0, 8.507059e+37  ;;  %v4859_v15 = vmul.f32 %v610_v5, %v354_v58  ;;  %vm4865_vm9 = vmor %vm1563_vm6, %vm1564_vm7  ;;  %v228_v42 = vld [vmem:[%s4501_s17 + $0x88] sm:$0xff] }
  0x62   : > { %v3304_v17 = vmul.f32 0.6931472, %v3975_v12  ;;  %v4861_v19 = vmul.f32 0.5, %v864_v27  ;;  %v1120_v18 = vmul.f32 %v864_v27, %v864_v27  ;;  %v1561_v21 = vmul.f32 %v3973_v2, %v1560_v10  ;;  %v485_v27 = vld [vmem:[%s4507_s20 + $0x90] sm:$0xff] }
  0x63   : > { %v1551_v22 = vsel %vm4854_vm5, %v3971_v53, %v1547_v14  ;;  %vm4869_vm10 = vcmp.eq.f32.partialorder %v1567_v50, 8.507059e+37  ;;  %v1570_v26 = vor.u32 1.1754944e-38, %v1569_v8  ;;  %3980 = vrcp.f32 %v4859_v15 }
  0x64   : > { %v3977_v47 = vpop.eup %3976  ;;  %v3549_v25 = vmul.f32 %v3304_v17, %v4787_v62  ;;  %v1556_v28 = vsel %vm1553_vm8, %v1555_v1, %v1551_v22  ;;  %v1562_v29 = vadd.f32 %v3973_v2, %v1561_v21  ;;  %v4875_v30 = vmul.f32 0.5, %v737_v11  ;;  %v230_v22 = vld [vmem:[%s4501_s17 + $0x98] sm:$0xff] }
  0x65   : > { %v3979_v33 = vpop.eup %3978  ;;  %v3306_v34 = vmul.f32 0.6931472, %v3977_v47  ;;  %v1557_v31 = vmul.f32 %v1556_v28, %v1119_v13  ;;  %vm1578_vm11 = vweird.f32 %v4843_v4  ;;  %v738_v37 = vadd.f32 %v610_v5, %v354_v58 }
  0x66   : > { %3678 = vst.msk [vmem:[%s4640_s23 + $0x50] sm:$0xff] %vm3667_vm14, %v3549_v25  ;;  %v1566_v62 = vsel %vm4865_vm9, %v3973_v2, %v1562_v29  ;;  %v1574_v40 = vmul.f32 %v3979_v33, %v4843_v4  ;;  %v1582_v41 = vand.u32 2147483647, %v4843_v4  ;;  %v1584_v20 = vand.u32 2147483648, %v4843_v4 }
  0x67   : > { %v3550_v35 = vmul.f32 %v3306_v34, %v4816_v36  ;;  %3982 = vlog2.f32 %v1557_v31  ;;  %v1571_v45 = vsel %vm4869_vm10, %v1570_v26, %v1566_v62  ;;  %v355_v46 = vmax.f32 %v227_v32, 1e-12 }
  0x68   : > { %v1572_v49 = vmul.f32 %v1571_v45, %v1120_v18  ;;  %v1575_v44 = vsub.f32 1.0, %v1574_v40  ;;  %vm1579_vm12 = vweird.f32 %v3979_v33  ;;  %v611_v48 = vmax.f32 %v483_v38, 1e-12  ;;  %v486_v38 = vld [vmem:[%s4507_s20 + $0x98] sm:$0xff] }
  0x69   : > { %v3981_v52 = vpop.eup %3980  ;;  %3679 = vst.msk [vmem:[%s4640_s23 + $0x58] sm:$0xff] %vm3667_vm14, %v3550_v35  ;;  %v1121_v23 = vmul.f32 %v4875_v30, %v4875_v30  ;;  %v866_v53 = vmul.f32 0.5, %v738_v37  ;;  %v356_v39 = vmax.f32 %v228_v42, 1e-12  ;;  %v612_v54 = vmax.f32 %v484_v43, 1e-12  ;;  %vm4900_vm13 = vmor %vm1578_vm11, %vm1579_vm12 }
  0x6a   : > { %3984 = vlog2.f32 %v1572_v49  ;;  %v1576_v36 = vmul.f32 %v3979_v33, %v1575_v44  ;;  %v1589_v16 = vmul.f32 %v3981_v52, %v4859_v15  ;;  %v1597_v55 = vand.u32 2147483647, %v4859_v15  ;;  %v231_v43 = vld [vmem:[%s4501_s17 + $0xa0] sm:$0xff] }
  0x6b   : > { %vm4904_vm15 = vcmp.eq.f32.partialorder %v1582_v41, 8.507059e+37  ;;  %v1585_v59 = vor.u32 1.1754944e-38, %v1584_v20  ;;  %v1599_v60 = vand.u32 2147483648, %v4859_v15  ;;  %v4909_v61 = vmul.f32 %v611_v48, %v355_v46  ;;  %v487_v35 = vld [vmem:[%s4507_s20 + $0xa0] sm:$0xff] }
  0x6c   : > { %v1577_v0 = vadd.f32 %v3979_v33, %v1576_v36  ;;  %v1590_v2 = vsub.f32 1.0, %v1589_v16  ;;  %vm1593_vm0 = vweird.f32 %v4859_v15  ;;  %vm1594_vm1 = vweird.f32 %v3981_v52 }
  0x6d   : > { %v3983_v4 = vpop.eup %3982  ;;  %v1122_v58 = vmul.f32 %v866_v53, %v866_v53  ;;  %v739_v5 = vadd.f32 %v611_v48, %v355_v46  ;;  %3986 = vrcp.f32 %v4909_v61  ;;  %v4914_v1 = vmul.f32 %v612_v54, %v356_v39  ;;  %vm4925_vm3 = vmor %vm1593_vm0, %vm1594_vm1 }
  0x6e   : > { %v3308_v6 = vmul.f32 0.6931472, %v3983_v4  ;;  %v1581_v7 = vsel %vm4900_vm13, %v3979_v33, %v1577_v0  ;;  %v1591_v50 = vmul.f32 %v3981_v52, %v1590_v2  ;;  %vm4919_vm2 = vcmp.eq.f32.partialorder %v1597_v55, 8.507059e+37 }
  0x6f   : > { %v1586_v9 = vsel %vm4904_vm15, %v1585_v59, %v1581_v7  ;;  %v1600_v11 = vor.u32 1.1754944e-38, %v1599_v60  ;;  %v740_v12 = vadd.f32 %v612_v54, %v356_v39  ;;  %v357_v13 = vmax.f32 %v229_v3, 1e-12 }
  0x70   : > { %v3985_v14 = vpop.eup %3984  ;;  %v3551_v15 = vmul.f32 %v3308_v6, %v4830_v51  ;;  %v1587_v17 = vmul.f32 %v1586_v9, %v1121_v23  ;;  %v1592_v18 = vadd.f32 %v3981_v52, %v1591_v50  ;;  %v613_v21 = vmax.f32 %v485_v27, 1e-12 }
  0x71   : > { %v3310_v24 = vmul.f32 0.6931472, %v3985_v14  ;;  %v867_v63 = vmul.f32 0.5, %v739_v5  ;;  %v1612_v26 = vand.u32 2147483647, %v4909_v61  ;;  %3988 = vrcp.f32 %v4914_v1 }
  0x72   : > { %3680 = vst.msk [vmem:[%s4640_s23 + $0x60] sm:$0xff] %vm3667_vm14, %v3551_v15  ;;  %v993_v47 = vmul.f32 0.5, %v4875_v30  ;;  %3990 = vlog2.f32 %v1587_v17  ;;  %v994_v25 = vmul.f32 0.5, %v866_v53  ;;  %v1596_v51 = vsel %vm4925_vm3, %v3981_v52, %v1592_v18 }
  0x73   : > { %v3987_v28 = vpop.eup %3986  ;;  %v3552_v29 = vmul.f32 %v3310_v24, %v4861_v19  ;;  %v1601_v32 = vsel %vm4919_vm2, %v1600_v11, %v1596_v51  ;;  %v1614_v33 = vand.u32 2147483648, %v4909_v61  ;;  %v358_v34 = vmax.f32 %v230_v22, 1e-12 }
  0x74   : > { %v1602_v31 = vmul.f32 %v1601_v32, %v1122_v58  ;;  %v4942_v37 = vmul.f32 0.5, %v867_v63  ;;  %v1604_v30 = vmul.f32 %v3987_v28, %v4909_v61  ;;  %vm1608_vm4 = vweird.f32 %v4909_v61  ;;  %v491_v32 = vld [vmem:[%s4507_s20 + $0xc0] sm:$0xff] }
  0x75   : > { %3681 = vst.msk [vmem:[%s4640_s23 + $0x68] sm:$0xff] %vm3667_vm14, %v3552_v29  ;;  %v1123_v62 = vmul.f32 %v867_v63, %v867_v63  ;;  %vm4949_vm5 = vcmp.eq.f32.partialorder %v1612_v26, 8.507059e+37  ;;  %v868_v40 = vmul.f32 0.5, %v740_v12  ;;  %v4953_v41 = vmul.f32 %v613_v21, %v357_v13 }
  0x76   : > { %3992 = vlog2.f32 %v1602_v31  ;;  %v1605_v20 = vsub.f32 1.0, %v1604_v30  ;;  %vm1609_vm6 = vweird.f32 %v3987_v28  ;;  %v1627_v42 = vand.u32 2147483647, %v4914_v1 }
  0x77   : > { %v3989_v45 = vpop.eup %3988  ;;  %v1615_v46 = vor.u32 1.1754944e-38, %v1614_v33  ;;  %v1629_v49 = vand.u32 2147483648, %v4914_v1  ;;  %3994 = vrcp.f32 %v4953_v41  ;;  %v614_v44 = vmax.f32 %v486_v38, 1e-12  ;;  %vm4965_vm8 = vmor %vm1608_vm4, %vm1609_vm6 }
  0x78   : > { %v3991_v48 = vpop.eup %3990  ;;  %v1606_v52 = vmul.f32 %v3987_v28, %v1605_v20  ;;  %v1619_v23 = vmul.f32 %v3989_v45, %v4914_v1  ;;  %vm1623_vm7 = vweird.f32 %v4914_v1  ;;  %v741_v53 = vadd.f32 %v613_v21, %v357_v13  ;;  %v232_v21 = vld [vmem:[%s4501_s17 + $0xa8] sm:$0xff] }
  0x79   : > { %v3312_v39 = vmul.f32 0.6931472, %v3991_v48  ;;  %v1124_v36 = vmul.f32 %v868_v40, %v868_v40  ;;  %v359_v16 = vmax.f32 %v231_v43, 1e-12  ;;  %v615_v55 = vmax.f32 %v487_v35, 1e-12 }
  0x7a   : > { %v1607_v56 = vadd.f32 %v3987_v28, %v1606_v52  ;;  %v1620_v57 = vsub.f32 1.0, %v1619_v23  ;;  %vm1624_vm9 = vweird.f32 %v3989_v45  ;;  %vm4969_vm10 = vcmp.eq.f32.partialorder %v1627_v42, 8.507059e+37 }
  0x7b   : > { %v3553_v60 = vmul.f32 %v3312_v39, %v993_v47  ;;  %v1630_v0 = vor.u32 1.1754944e-38, %v1629_v49  ;;  %v742_v2 = vadd.f32 %v614_v44, %v358_v34  ;;  %v4973_v3 = vmul.f32 %v614_v44, %v358_v34  ;;  %vm4987_vm12 = vmor %vm1623_vm7, %vm1624_vm9 }
  0x7c   : > { %v3993_v61 = vpop.eup %3992  ;;  %v1611_v4 = vsel %vm4965_vm8, %v3987_v28, %v1607_v56  ;;  %v1621_v58 = vmul.f32 %v3989_v45, %v1620_v57  ;;  %v4977_v5 = vmul.f32 0.5, %v741_v53  ;;  %vm1638_vm11 = vweird.f32 %v4953_v41  ;;  %v488_v28 = vld [vmem:[%s4507_s20 + $0xa8] sm:$0xff] }
  0x7d   : > { %v3995_v27 = vpop.eup %3994  ;;  %3682 = vst.msk [vmem:[%s4640_s23 + $0x70] sm:$0xff] %vm3667_vm14, %v3553_v60  ;;  %v3314_v6 = vmul.f32 0.6931472, %v3993_v61  ;;  %v1616_v7 = vsel %vm4949_vm5, %v1615_v46, %v1611_v4  ;;  %3996 = vrcp.f32 %v4973_v3  ;;  %v4992_v8 = vmul.f32 %v615_v55, %v359_v16  ;;  %v489_v46 = vld [vmem:[%s4507_s20 + $0xb0] sm:$0xff] }
  0x7e   : > { %v1617_v9 = vmul.f32 %v1616_v7, %v1123_v62  ;;  %v1622_v10 = vadd.f32 %v3989_v45, %v1621_v58  ;;  %v1634_v11 = vmul.f32 %v3995_v27, %v4953_v41  ;;  %v1642_v12 = vand.u32 2147483647, %v4953_v41  ;;  %v490_v7 = vld [vmem:[%s4507_s20 + $0xb8] sm:$0xff] }
  0x7f   : > { %v3554_v13 = vmul.f32 %v3314_v6, %v994_v25  ;;  %v1644_v14 = vand.u32 2147483648, %v4953_v41  ;;  %v870_v1 = vmul.f32 0.5, %v742_v2  ;;  %v743_v15 = vadd.f32 %v615_v55, %v359_v16  ;;  %v234_v6 = vld [vmem:[%s4501_s17 + $0xb8] sm:$0xff] }
  0x80   : > { %3998 = vlog2.f32 %v1617_v9  ;;  %v1626_v17 = vsel %vm4987_vm12, %v3989_v45, %v1622_v10  ;;  %v1635_v18 = vsub.f32 1.0, %v1634_v11  ;;  %vm1639_vm13 = vweird.f32 %v3995_v27  ;;  %v233_v45 = vld [vmem:[%s4501_s17 + $0xb0] sm:$0xff] }
  0x81   : > { %3683 = vst.msk [vmem:[%s4640_s23 + $0x78] sm:$0xff] %vm3667_vm14, %v3554_v13  ;;  %v1631_v22 = vsel %vm4969_vm10, %v1630_v0, %v1626_v17  ;;  %v1657_v24 = vand.u32 2147483647, %v4973_v3  ;;  %v1659_v63 = vand.u32 2147483648, %v4973_v3  ;;  %4000 = vrcp.f32 %v4992_v8  ;;  %vm5012_vm15 = vmor %vm1638_vm11, %vm1639_vm13 }
  0x82   : > { %v996_v26 = vmul.f32 0.5, %v868_v40  ;;  %v1632_v47 = vmul.f32 %v1631_v22, %v1124_v36  ;;  %v1125_v25 = vmul.f32 %v4977_v5, %v4977_v5  ;;  %v1636_v51 = vmul.f32 %v3995_v27, %v1635_v18 }
  0x83   : > { %v3997_v29 = vpop.eup %3996  ;;  %vm5016_vm0 = vcmp.eq.f32.partialorder %v1642_v12, 8.507059e+37  ;;  %v1645_v34 = vor.u32 1.1754944e-38, %v1644_v14  ;;  %vm1653_vm1 = vweird.f32 %v4973_v3  ;;  %v360_v31 = vmax.f32 %v232_v21, 1e-12 }
  0x84   : > { %4002 = vlog2.f32 %v1632_v47  ;;  %v1637_v30 = vadd.f32 %v3995_v27, %v1636_v51  ;;  %v1126_v38 = vmul.f32 %v870_v1, %v870_v1  ;;  %v1649_v62 = vmul.f32 %v3997_v29, %v4973_v3 }
  0x85   : > { %vm5022_vm2 = vcmp.eq.f32.partialorder %v1657_v24, 8.507059e+37  ;;  %v1660_v40 = vor.u32 1.1754944e-38, %v1659_v63  ;;  %v871_v41 = vmul.f32 0.5, %v743_v15  ;;  %v616_v20 = vmax.f32 %v488_v28, 1e-12 }
  0x86   : > { %v3999_v42 = vpop.eup %3998  ;;  %v1641_v43 = vsel %vm5012_vm15, %v3995_v27, %v1637_v30  ;;  %v1650_v35 = vsub.f32 1.0, %v1649_v62  ;;  %vm1654_vm3 = vweird.f32 %v3997_v29  ;;  %vm1668_vm4 = vweird.f32 %v4992_v8 }
  0x87   : > { %v4001_v49 = vpop.eup %4000  ;;  %v3316_v44 = vmul.f32 0.6931472, %v3999_v42  ;;  %v1646_v48 = vsel %vm5016_vm0, %v1645_v34, %v1641_v43  ;;  %v1672_v52 = vand.u32 2147483647, %v4992_v8  ;;  %v5034_v23 = vmul.f32 %v616_v20, %v360_v31  ;;  %vm5041_vm5 = vmor %vm1653_vm1, %vm1654_vm3 }
  0x88   : > { %v1647_v53 = vmul.f32 %v1646_v48, %v1125_v25  ;;  %v1651_v39 = vmul.f32 %v3997_v29, %v1650_v35  ;;  %v1664_v54 = vmul.f32 %v4001_v49, %v4992_v8  ;;  %v1674_v36 = vand.u32 2147483648, %v4992_v8 }
  0x89   : > { %v3555_v16 = vmul.f32 %v3316_v44, %v4942_v37  ;;  %4004 = vrcp.f32 %v5034_v23  ;;  %v361_v56 = vmax.f32 %v233_v45, 1e-12  ;;  %v617_v57 = vmax.f32 %v489_v46, 1e-12  ;;  %v236_v44 = vld [vmem:[%s4501_s17 + $0xc8] sm:$0xff] }
  0x8a   : > { %v4003_v59 = vpop.eup %4002  ;;  %4006 = vlog2.f32 %v1647_v53  ;;  %v1652_v60 = vadd.f32 %v3997_v29, %v1651_v39  ;;  %v1665_v0 = vsub.f32 1.0, %v1664_v54  ;;  %vm1669_vm6 = vweird.f32 %v4001_v49 }
  0x8b   : > { %3684 = vst.msk [vmem:[%s4640_s23 + $0x80] sm:$0xff] %vm3667_vm14, %v3555_v16  ;;  %v3318_v37 = vmul.f32 0.6931472, %v4003_v59  ;;  %v997_v2 = vmul.f32 0.5, %v4977_v5  ;;  %v5049_v3 = vmul.f32 0.5, %v870_v1  ;;  %v5053_v4 = vmul.f32 0.5, %v871_v41  ;;  %vm5061_vm7 = vmor %vm1668_vm4, %vm1669_vm6 }
  0x8c   : > { %v1656_v61 = vsel %vm5041_vm5, %v3997_v29, %v1652_v60  ;;  %v1666_v58 = vmul.f32 %v4001_v49, %v1665_v0  ;;  %v744_v27 = vadd.f32 %v616_v20, %v360_v31  ;;  %v1675_v10 = vor.u32 1.1754944e-38, %v1674_v36  ;;  %v235_v29 = vld [vmem:[%s4501_s17 + $0xc0] sm:$0xff]  ;;  %v492_v36 = vld [vmem:[%s4507_s20 + $0xc8] sm:$0xff] }
  0x8d   : > { %v3556_v50 = vmul.f32 %v3318_v37, %v996_v26  ;;  %v1661_v9 = vsel %vm5022_vm2, %v1660_v40, %v1656_v61  ;;  %v5065_v11 = vmul.f32 %v617_v57, %v361_v56  ;;  %v1127_v13 = vmul.f32 %v871_v41, %v871_v41  ;;  %v494_v41 = vld [vmem:[%s4507_s20 + $0xd8] sm:$0xff] }
  0x8e   : > { %v1662_v12 = vmul.f32 %v1661_v9, %v1126_v38  ;;  %v1667_v14 = vadd.f32 %v4001_v49, %v1666_v58  ;;  %vm1673_vm8 = vcmp.eq.f32.partialorder %v1672_v52, 8.507059e+37  ;;  %v745_v15 = vadd.f32 %v617_v57, %v361_v56 }
  0x8f   : > { %v4005_v1 = vpop.eup %4004  ;;  %3685 = vst.msk [vmem:[%s4640_s23 + $0x88] sm:$0xff] %vm3667_vm14, %v3556_v50  ;;  %4008 = vrcp.f32 %v5065_v11  ;;  %v362_v17 = vmax.f32 %v234_v6, 1e-12  ;;  %v618_v8 = vmax.f32 %v490_v7, 1e-12  ;;  %v5072_v22 = vmul.f32 0.5, %v744_v27 }
  0x90   : > { %v4007_v18 = vpop.eup %4006  ;;  %4010 = vlog2.f32 %v1662_v12  ;;  %v1671_v21 = vsel %vm5061_vm7, %v4001_v49, %v1667_v14  ;;  %v1679_v24 = vmul.f32 %v4005_v1, %v5034_v23  ;;  %vm1683_vm9 = vweird.f32 %v5034_v23  ;;  %v493_v14 = vld [vmem:[%s4507_s20 + $0xd0] sm:$0xff] }
  0x91   : > { %v3320_v63 = vmul.f32 0.6931472, %v4007_v18  ;;  %v1676_v26 = vsel %vm1673_vm8, %v1675_v10, %v1671_v21  ;;  %v1689_v47 = vand.u32 2147483648, %v5034_v23  ;;  %vm1684_vm10 = vweird.f32 %v4005_v1 }
  0x92   : > { %v1677_v25 = vmul.f32 %v1676_v26, %v1127_v13  ;;  %v1680_v51 = vsub.f32 1.0, %v1679_v24  ;;  %v1687_v28 = vand.u32 2147483647, %v5034_v23  ;;  %v5080_v34 = vmul.f32 0.5, %v745_v15  ;;  %vm5092_vm11 = vmor %vm1683_vm9, %vm1684_vm10  ;;  %v237_v13 = vld [vmem:[%s4501_s17 + $0xd0] sm:$0xff] }
  0x93   : > { %v3557_v33 = vmul.f32 %v3320_v63, %v997_v2  ;;  %v1702_v31 = vand.u32 2147483647, %v5065_v11  ;;  %v5083_v30 = vmul.f32 %v618_v8, %v362_v17  ;;  %v1128_v38 = vmul.f32 %v5072_v22, %v5072_v22 }
  0x94   : > { %4012 = vlog2.f32 %v1677_v25  ;;  %v1681_v62 = vmul.f32 %v4005_v1, %v1680_v51  ;;  %v1704_v19 = vand.u32 2147483648, %v5065_v11  ;;  %v1690_v20 = vor.u32 1.1754944e-38, %v1689_v47 }
  0x95   : > { %v4009_v40 = vpop.eup %4008  ;;  %3686 = vst.msk [vmem:[%s4640_s23 + $0x90] sm:$0xff] %vm3667_vm14, %v3557_v33  ;;  %4014 = vrcp.f32 %v5083_v30  ;;  %v363_v42 = vmax.f32 %v235_v29, 1e-12  ;;  %v619_v43 = vmax.f32 %v491_v32, 1e-12  ;;  %vm1688_vm12 = vcmp.eq.f32.partialorder %v1687_v28, 8.507059e+37 }
  0x96   : > { %v4011_v35 = vpop.eup %4010  ;;  %v1682_v45 = vadd.f32 %v4005_v1, %v1681_v62  ;;  %v1694_v46 = vmul.f32 %v4009_v40, %v5065_v11  ;;  %v746_v49 = vadd.f32 %v618_v8, %v362_v17  ;;  %v1129_v52 = vmul.f32 %v5080_v34, %v5080_v34 }
  0x97   : > { %v3322_v48 = vmul.f32 0.6931472, %v4011_v35  ;;  %vm1698_vm13 = vweird.f32 %v5065_v11  ;;  %vm5102_vm15 = vcmp.eq.f32.partialorder %v1702_v31, 8.507059e+37  ;;  %vm1699_vm0 = vweird.f32 %v4009_v40 }
  0x98   : > { %v1686_v53 = vsel %vm5092_vm11, %v4005_v1, %v1682_v45  ;;  %v1695_v39 = vsub.f32 1.0, %v1694_v46  ;;  %v1705_v54 = vor.u32 1.1754944e-38, %v1704_v19  ;;  %v5110_v56 = vmul.f32 %v619_v43, %v363_v42  ;;  %vm5120_vm1 = vmor %vm1698_vm13, %vm1699_vm0 }
  0x99   : > { %v3558_v16 = vmul.f32 %v3322_v48, %v5049_v3  ;;  %v1691_v55 = vsel %vm1688_vm12, %v1690_v20, %v1686_v53  ;;  %v364_v57 = vmax.f32 %v236_v44, 1e-12  ;;  %v5112_v37 = vmul.f32 0.5, %v746_v49 }
  0x9a   : > { %v4013_v59 = vpop.eup %4012  ;;  %v1692_v60 = vmul.f32 %v1691_v55, %v1128_v38  ;;  %v1696_v0 = vmul.f32 %v4009_v40, %v1695_v39  ;;  %v1717_v2 = vand.u32 2147483647, %v5083_v30  ;;  %v1719_v27 = vand.u32 2147483648, %v5083_v30  ;;  %v238_v38 = vld [vmem:[%s4501_s17 + $0xd8] sm:$0xff] }
  0x9b   : > { %v4015_v61 = vpop.eup %4014  ;;  %3687 = vst.msk [vmem:[%s4640_s23 + $0x98] sm:$0xff] %vm3667_vm14, %v3558_v16  ;;  %v3324_v58 = vmul.f32 0.6931472, %v4013_v59  ;;  %4016 = vrcp.f32 %v5110_v56  ;;  %v620_v6 = vmax.f32 %v492_v36, 1e-12  ;;  %v747_v9 = vadd.f32 %v619_v43, %v363_v42  ;;  %v239_v59 = vld [vmem:[%s4501_s17 + $0xe0] sm:$0xff] }
  0x9c   : > { %4018 = vlog2.f32 %v1692_v60  ;;  %v1697_v7 = vadd.f32 %v4009_v40, %v1696_v0  ;;  %v1709_v50 = vmul.f32 %v4015_v61, %v5083_v30  ;;  %v1000_v10 = vmul.f32 0.5, %v5072_v22 }
  0x9d   : > { %v3559_v5 = vmul.f32 %v3324_v58, %v5053_v4  ;;  %vm1713_vm2 = vweird.f32 %v5083_v30  ;;  %vm1714_vm3 = vweird.f32 %v4015_v61  ;;  %v1130_v15 = vmul.f32 %v5112_v37, %v5112_v37 }
  0x9e   : > { %v1701_v11 = vsel %vm5120_vm1, %v4009_v40, %v1697_v7  ;;  %v1710_v12 = vsub.f32 1.0, %v1709_v50  ;;  %vm5140_vm4 = vcmp.eq.f32.partialorder %v1717_v2, 8.507059e+37  ;;  %v5144_v17 = vmul.f32 %v620_v6, %v364_v57  ;;  %vm5148_vm5 = vmor %vm1713_vm2, %vm1714_vm3 }
  0x9f   : > { %3688 = vst.msk [vmem:[%s4640_s23 + $0xa0] sm:$0xff] %vm3667_vm14, %v3559_v5  ;;  %v1706_v1 = vsel %vm5102_vm15, %v1705_v54, %v1701_v11  ;;  %v1720_v21 = vor.u32 1.1754944e-38, %v1719_v27  ;;  %v5146_v22 = vmul.f32 0.5, %v747_v9  ;;  %v1732_v26 = vand.u32 2147483647, %v5110_v56 }
  0xa0   : > { %v1707_v8 = vmul.f32 %v1706_v1, %v1129_v52  ;;  %v1711_v18 = vmul.f32 %v4015_v61, %v1710_v12  ;;  %4020 = vrcp.f32 %v5144_v17  ;;  %v365_v47 = vmax.f32 %v237_v13, 1e-12 }
  0xa1   : > { %v4017_v24 = vpop.eup %4016  ;;  %v621_v25 = vmax.f32 %v493_v14, 1e-12  ;;  %v748_v32 = vadd.f32 %v620_v6, %v364_v57  ;;  %v1001_v31 = vmul.f32 0.5, %v5080_v34  ;;  %vm1728_vm6 = vweird.f32 %v5110_v56 }
  0xa2   : > { %v4019_v51 = vpop.eup %4018  ;;  %4022 = vlog2.f32 %v1707_v8  ;;  %v1712_v28 = vadd.f32 %v4015_v61, %v1711_v18  ;;  %v1724_v29 = vmul.f32 %v4017_v24, %v5110_v56  ;;  %v1734_v30 = vand.u32 2147483648, %v5110_v56 }
  0xa3   : > { %v3326_v33 = vmul.f32 0.6931472, %v4019_v51  ;;  %v1131_v19 = vmul.f32 %v5146_v22, %v5146_v22  ;;  %vm1729_vm7 = vweird.f32 %v4017_v24  ;;  %vm5166_vm8 = vcmp.eq.f32.partialorder %v1732_v26, 8.507059e+37 }
  0xa4   : > { %v1716_v62 = vsel %vm5148_vm5, %v4015_v61, %v1712_v28  ;;  %v1725_v40 = vsub.f32 1.0, %v1724_v29  ;;  %v5170_v43 = vmul.f32 %v621_v25, %v365_v47  ;;  %v5172_v46 = vmul.f32 0.5, %v748_v32  ;;  %vm5178_vm9 = vmor %vm1728_vm6, %vm1729_vm7  ;;  %v495_v61 = vld [vmem:[%s4507_s20 + $0xe0] sm:$0xff] }
  0xa5   : > { %v3560_v20 = vmul.f32 %v3326_v33, %v1000_v10  ;;  %v1721_v42 = vsel %vm5140_vm4, %v1720_v21, %v1716_v62  ;;  %v366_v49 = vmax.f32 %v238_v38, 1e-12  ;;  %v1735_v52 = vor.u32 1.1754944e-38, %v1734_v30  ;;  %v240_v21 = vld [vmem:[%s4501_s17 + $0xe8] sm:$0xff] }
  0xa6   : > { %v1722_v35 = vmul.f32 %v1721_v42, %v1130_v15  ;;  %v1726_v45 = vmul.f32 %v4017_v24, %v1725_v40  ;;  %v4021_v44 = vpop.eup %4020  ;;  %v1747_v23 = vand.u32 2147483647, %v5144_v17  ;;  %4024 = vrcp.f32 %v5170_v43 }
  0xa7   : > { %3689 = vst.msk [vmem:[%s4640_s23 + $0xa8] sm:$0xff] %vm3667_vm14, %v3560_v20  ;;  %v622_v53 = vmax.f32 %v494_v41, 1e-12  ;;  %v1739_v36 = vmul.f32 %v4021_v44, %v5144_v17  ;;  %v749_v16 = vadd.f32 %v621_v25, %v365_v47  ;;  %v1002_v56 = vmul.f32 0.5, %v5112_v37  ;;  %v496_v47 = vld [vmem:[%s4507_s20 + $0xe8] sm:$0xff] }
  0xa8   : > { %v4023_v39 = vpop.eup %4022  ;;  %4026 = vlog2.f32 %v1722_v35  ;;  %v1727_v54 = vadd.f32 %v4017_v24, %v1726_v45  ;;  %vm1743_vm10 = vweird.f32 %v5144_v17  ;;  %v1749_v57 = vand.u32 2147483648, %v5144_v17 }
  0xa9   : > { %v3328_v55 = vmul.f32 0.6931472, %v4023_v39  ;;  %v1132_v0 = vmul.f32 %v5172_v46, %v5172_v46  ;;  %v1740_v2 = vsub.f32 1.0, %v1739_v36  ;;  %vm1744_vm11 = vweird.f32 %v4021_v44 }
  0xaa   : > { %v1731_v60 = vsel %vm5178_vm9, %v4017_v24, %v1727_v54  ;;  %vm5196_vm12 = vcmp.eq.f32.partialorder %v1747_v23, 8.507059e+37  ;;  %v5200_v27 = vmul.f32 %v622_v53, %v366_v49  ;;  %v5202_v50 = vmul.f32 0.5, %v749_v16  ;;  %vm5208_vm13 = vmor %vm1743_vm10, %vm1744_vm11  ;;  %v497_v23 = vld [vmem:[%s4507_s20 + $0xf0] sm:$0xff] }
  0xab   : > { %v3561_v58 = vmul.f32 %v3328_v55, %v1001_v31  ;;  %v1736_v3 = vsel %vm5166_vm8, %v1735_v52, %v1731_v60  ;;  %v1741_v7 = vmul.f32 %v4021_v44, %v1740_v2  ;;  %v367_v9 = vmax.f32 %v239_v59, 1e-12 }
  0xac   : > { %v1737_v6 = vmul.f32 %v1736_v3, %v1131_v19  ;;  %v4025_v5 = vpop.eup %4024  ;;  %v1750_v11 = vor.u32 1.1754944e-38, %v1749_v57  ;;  %v1762_v12 = vand.u32 2147483647, %v5170_v43  ;;  %4028 = vrcp.f32 %v5200_v27 }
  0xad   : > { %3690 = vst.msk [vmem:[%s4640_s23 + $0xb0] sm:$0xff] %vm3667_vm14, %v3561_v58  ;;  %v623_v13 = vmax.f32 %v495_v61, 1e-12  ;;  %v1742_v1 = vadd.f32 %v4021_v44, %v1741_v7  ;;  %v1754_v15 = vmul.f32 %v4025_v5, %v5170_v43  ;;  %v750_v4 = vadd.f32 %v622_v53, %v366_v49  ;;  %v241_v49 = vld [vmem:[%s4501_s17 + $0xf0] sm:$0xff] }
  0xae   : > { %v4027_v14 = vpop.eup %4026  ;;  %4030 = vlog2.f32 %v1737_v6  ;;  %v1003_v17 = vmul.f32 0.5, %v5146_v22  ;;  %vm1758_vm15 = vweird.f32 %v5170_v43  ;;  %v1764_v18 = vand.u32 2147483648, %v5170_v43 }
  0xaf   : > { %v3330_v8 = vmul.f32 0.6931472, %v4027_v14  ;;  %v1746_v24 = vsel %vm5208_vm13, %v4021_v44, %v1742_v1  ;;  %v1133_v63 = vmul.f32 %v5202_v50, %v5202_v50  ;;  %v1755_v26 = vsub.f32 1.0, %v1754_v15 }
  0xb0   : > { %vm1759_vm0 = vweird.f32 %v4025_v5  ;;  %v1751_v51 = vsel %vm5196_vm12, %v1750_v11, %v1746_v24  ;;  %vm5226_vm1 = vcmp.eq.f32.partialorder %v1762_v12, 8.507059e+37  ;;  %v5230_v28 = vmul.f32 %v623_v13, %v367_v9  ;;  %v498_v12 = vld [vmem:[%s4507_s20 + $0xf8] sm:$0xff] }
  0xb1   : > { %v3562_v25 = vmul.f32 %v3330_v8, %v1002_v56  ;;  %v1752_v29 = vmul.f32 %v1751_v51, %v1132_v0  ;;  %v1756_v32 = vmul.f32 %v4025_v5, %v1755_v26  ;;  %v5232_v33 = vmul.f32 0.5, %v750_v4  ;;  %vm5238_vm2 = vmor %vm1758_vm15, %vm1759_vm0 }
  0xb2   : > { %v368_v31 = vmax.f32 %v240_v21, 1e-12  ;;  %v4029_v30 = vpop.eup %4028  ;;  %v1765_v62 = vor.u32 1.1754944e-38, %v1764_v18  ;;  %v1777_v19 = vand.u32 2147483647, %v5200_v27  ;;  %4032 = vrcp.f32 %v5230_v28 }
  0xb3   : > { %3691 = vst.msk [vmem:[%s4640_s23 + $0xb8] sm:$0xff] %vm3667_vm14, %v3562_v25  ;;  %v624_v40 = vmax.f32 %v496_v47, 1e-12  ;;  %4034 = vlog2.f32 %v1752_v29  ;;  %v1757_v20 = vadd.f32 %v4025_v5, %v1756_v32  ;;  %v1769_v42 = vmul.f32 %v4029_v30, %v5200_v27 }
  0xb4   : > { %v4031_v41 = vpop.eup %4030  ;;  %v751_v34 = vadd.f32 %v623_v13, %v367_v9  ;;  %v1004_v43 = vmul.f32 0.5, %v5172_v46  ;;  %vm1773_vm3 = vweird.f32 %v5200_v27  ;;  %v1779_v45 = vand.u32 2147483648, %v5200_v27  ;;  %v242_v9 = vld [vmem:[%s4501_s17 + $0xf8] sm:$0xff] }
  0xb5   : > { %v3332_v35 = vmul.f32 0.6931472, %v4031_v41  ;;  %v1761_v44 = vsel %vm5238_vm2, %v4025_v5, %v1757_v20  ;;  %v1134_v48 = vmul.f32 %v5232_v33, %v5232_v33  ;;  %v1770_v52 = vsub.f32 1.0, %v1769_v42 }
  0xb6   : > { %vm1774_vm4 = vweird.f32 %v4029_v30  ;;  %v1766_v39 = vsel %vm5226_vm1, %v1765_v62, %v1761_v44  ;;  %vm5256_vm5 = vcmp.eq.f32.partialorder %v1777_v19, 8.507059e+37  ;;  %v5260_v54 = vmul.f32 %v624_v40, %v368_v31  ;;  %v499_v19 = vld [vmem:[%s4507_s20 + $0x100] sm:$0xff] }
  0xb7   : > { %v3563_v53 = vmul.f32 %v3332_v35, %v1003_v17  ;;  %v1767_v36 = vmul.f32 %v1766_v39, %v1133_v63  ;;  %v1771_v16 = vmul.f32 %v4029_v30, %v1770_v52  ;;  %v5262_v55 = vmul.f32 0.5, %v751_v34  ;;  %vm5268_vm6 = vmor %vm1773_vm3, %vm1774_vm4 }
  0xb8   : > { %v369_v56 = vmax.f32 %v241_v49, 1e-12  ;;  %v4033_v57 = vpop.eup %4032  ;;  %v1780_v60 = vor.u32 1.1754944e-38, %v1779_v45  ;;  %v1792_v0 = vand.u32 2147483647, %v5230_v28  ;;  %4036 = vrcp.f32 %v5260_v54 }
  0xb9   : > { %3692 = vst.msk [vmem:[%s4640_s23 + $0xc0] sm:$0xff] %vm3667_vm14, %v3563_v53  ;;  %v625_v2 = vmax.f32 %v497_v23, 1e-12  ;;  %v4035_v61 = vpop.eup %4034  ;;  %4038 = vlog2.f32 %v1767_v36  ;;  %v1772_v58 = vadd.f32 %v4029_v30, %v1771_v16  ;;  %v1784_v3 = vmul.f32 %v4033_v57, %v5230_v28 }
  0xba   : > { %v752_v37 = vadd.f32 %v624_v40, %v368_v31  ;;  %v3334_v6 = vmul.f32 0.6931472, %v4035_v61  ;;  %v1005_v27 = vmul.f32 0.5, %v5202_v50  ;;  %vm1788_vm7 = vweird.f32 %v5230_v28  ;;  %v243_v31 = vld [vmem:[%s4501_s17 + $0x100] sm:$0xff] }
  0xbb   : > { %v1794_v7 = vand.u32 2147483648, %v5230_v28  ;;  %v1776_v5 = vsel %vm5268_vm6, %v4029_v30, %v1772_v58  ;;  %v1135_v10 = vmul.f32 %v5262_v55, %v5262_v55  ;;  %v1785_v11 = vsub.f32 1.0, %v1784_v3 }
  0xbc   : > { %vm1789_vm8 = vweird.f32 %v4033_v57  ;;  %v3564_v13 = vmul.f32 %v3334_v6, %v1004_v43  ;;  %v1781_v14 = vsel %vm5256_vm5, %v1780_v60, %v1776_v5  ;;  %vm5286_vm9 = vcmp.eq.f32.partialorder %v1792_v0, 8.507059e+37  ;;  %v500_v0 = vld [vmem:[%s4507_s20 + $0x108] sm:$0xff] }
  0xbd   : > { %v5290_v1 = vmul.f32 %v625_v2, %v369_v56  ;;  %v1782_v15 = vmul.f32 %v1781_v14, %v1134_v48  ;;  %v1786_v4 = vmul.f32 %v4033_v57, %v1785_v11  ;;  %v5292_v8 = vmul.f32 0.5, %v752_v37  ;;  %vm5298_vm10 = vmor %vm1788_vm7, %vm1789_vm8 }
  0xbe   : > { %v370_v17 = vmax.f32 %v242_v9, 1e-12  ;;  %v4037_v18 = vpop.eup %4036  ;;  %3693 = vst.msk [vmem:[%s4640_s23 + $0xc8] sm:$0xff] %vm3667_vm14, %v3564_v13  ;;  %v1795_v24 = vor.u32 1.1754944e-38, %v1794_v7  ;;  %v1807_v63 = vand.u32 2147483647, %v5260_v54  ;;  %v753_v22 = vadd.f32 %v625_v2, %v369_v56 }
  0xbf   : > { %4040 = vrcp.f32 %v5290_v1  ;;  %v626_v26 = vmax.f32 %v498_v12, 1e-12  ;;  %v4039_v47 = vpop.eup %4038  ;;  %v1787_v25 = vadd.f32 %v4033_v57, %v1786_v4  ;;  %v1799_v51 = vmul.f32 %v4037_v18, %v5260_v54  ;;  %v244_v56 = vld [vmem:[%s4501_s17 + $0x108] sm:$0xff] }
  0xc0   : > { %4042 = vlog2.f32 %v1782_v15  ;;  %v3336_v29 = vmul.f32 0.6931472, %v4039_v47  ;;  %v1006_v28 = vmul.f32 0.5, %v5232_v33  ;;  %vm1803_vm11 = vweird.f32 %v5260_v54 }
  0xc1   : > { %v1809_v32 = vand.u32 2147483648, %v5260_v54  ;;  %v1791_v30 = vsel %vm5298_vm10, %v4033_v57, %v1787_v25  ;;  %v1136_v38 = vmul.f32 %v5292_v8, %v5292_v8  ;;  %v1800_v62 = vsub.f32 1.0, %v1799_v51 }
  0xc2   : > { %vm1804_vm12 = vweird.f32 %v4037_v18  ;;  %v3565_v40 = vmul.f32 %v3336_v29, %v1005_v27  ;;  %v1796_v41 = vsel %vm5286_vm9, %v1795_v24, %v1791_v30  ;;  %vm5316_vm13 = vcmp.eq.f32.partialorder %v1807_v63, 8.507059e+37  ;;  %v501_v63 = vld [vmem:[%s4507_s20 + $0x110] sm:$0xff] }
  0xc3   : > { %v5320_v20 = vmul.f32 %v626_v26, %v370_v17  ;;  %v1797_v42 = vmul.f32 %v1796_v41, %v1135_v10  ;;  %v1801_v34 = vmul.f32 %v4037_v18, %v1800_v62  ;;  %v5322_v35 = vmul.f32 0.5, %v753_v22  ;;  %vm5328_vm15 = vmor %vm1803_vm11, %vm1804_vm12 }
  0xc4   : > { %v371_v43 = vmax.f32 %v243_v31, 1e-12  ;;  %3694 = vst.msk [vmem:[%s4640_s23 + $0xd0] sm:$0xff] %vm3667_vm14, %v3565_v40  ;;  %v1810_v44 = vor.u32 1.1754944e-38, %v1809_v32  ;;  %v1822_v48 = vand.u32 2147483647, %v5290_v1  ;;  %v754_v46 = vadd.f32 %v626_v26, %v370_v17 }
  0xc5   : > { %v4041_v45 = vpop.eup %4040  ;;  %4044 = vrcp.f32 %v5320_v20  ;;  %v627_v52 = vmax.f32 %v499_v19, 1e-12  ;;  %v1802_v53 = vadd.f32 %v4037_v18, %v1801_v34  ;;  %v1007_v54 = vmul.f32 0.5, %v5262_v55  ;;  %v245_v17 = vld [vmem:[%s4501_s17 + $0x110] sm:$0xff] }
  0xc6   : > { %v4043_v23 = vpop.eup %4042  ;;  %4046 = vlog2.f32 %v1797_v42  ;;  %v1814_v39 = vmul.f32 %v4041_v45, %v5290_v1  ;;  %vm1818_vm0 = vweird.f32 %v5290_v1  ;;  %v1824_v16 = vand.u32 2147483648, %v5290_v1 }
  0xc7   : > { %v3338_v36 = vmul.f32 0.6931472, %v4043_v23  ;;  %v1806_v57 = vsel %vm5328_vm15, %v4037_v18, %v1802_v53  ;;  %v1137_v59 = vmul.f32 %v5322_v35, %v5322_v35  ;;  %vm1819_vm1 = vweird.f32 %v4041_v45 }
  0xc8   : > { %v1815_v60 = vsub.f32 1.0, %v1814_v39  ;;  %v1811_v61 = vsel %vm5316_vm13, %v1810_v44, %v1806_v57  ;;  %vm5346_vm2 = vcmp.eq.f32.partialorder %v1822_v48, 8.507059e+37  ;;  %v5350_v58 = vmul.f32 %v627_v52, %v371_v43  ;;  %vm5358_vm3 = vmor %vm1818_vm0, %vm1819_vm1  ;;  %v502_v48 = vld [vmem:[%s4507_s20 + $0x118] sm:$0xff] }
  0xc9   : > { %v3566_v2 = vmul.f32 %v3338_v36, %v1006_v28  ;;  %v1812_v3 = vmul.f32 %v1811_v61, %v1136_v38  ;;  %v5352_v6 = vmul.f32 0.5, %v754_v46  ;;  %v372_v27 = vmax.f32 %v244_v56, 1e-12 }
  0xca   : > { %v1816_v37 = vmul.f32 %v4041_v45, %v1815_v60  ;;  %v1825_v5 = vor.u32 1.1754944e-38, %v1824_v16  ;;  %v1837_v10 = vand.u32 2147483647, %v5320_v20  ;;  %4048 = vrcp.f32 %v5350_v58 }
  0xcb   : > { %v4045_v7 = vpop.eup %4044  ;;  %3695 = vst.msk [vmem:[%s4640_s23 + $0xd8] sm:$0xff] %vm3667_vm14, %v3566_v2  ;;  %v628_v11 = vmax.f32 %v500_v0, 1e-12  ;;  %4050 = vlog2.f32 %v1812_v3  ;;  %v755_v50 = vadd.f32 %v627_v52, %v371_v43  ;;  %v1008_v1 = vmul.f32 0.5, %v5292_v8  ;;  %v246_v43 = vld [vmem:[%s4501_s17 + $0x118] sm:$0xff] }
  0xcc   : > { %v4047_v12 = vpop.eup %4046  ;;  %v1817_v13 = vadd.f32 %v4041_v45, %v1816_v37  ;;  %v1829_v14 = vmul.f32 %v4045_v7, %v5320_v20  ;;  %vm1833_vm4 = vweird.f32 %v5320_v20  ;;  %v1839_v4 = vand.u32 2147483648, %v5320_v20 }
  0xcd   : > { %v3340_v15 = vmul.f32 0.6931472, %v4047_v12  ;;  %v1138_v21 = vmul.f32 %v5352_v6, %v5352_v6  ;;  %vm1834_vm5 = vweird.f32 %v4045_v7  ;;  %vm5376_vm6 = vcmp.eq.f32.partialorder %v1837_v10, 8.507059e+37  ;;  %v503_v10 = vld [vmem:[%s4507_s20 + $0x120] sm:$0xff] }
  0xce   : > { %v1821_v18 = vsel %vm5358_vm3, %v4041_v45, %v1817_v13  ;;  %v1830_v24 = vsub.f32 1.0, %v1829_v14  ;;  %v5380_v25 = vmul.f32 %v628_v11, %v372_v27  ;;  %v5382_v29 = vmul.f32 0.5, %v755_v50  ;;  %vm5388_vm7 = vmor %vm1833_vm4, %vm1834_vm5 }
  0xcf   : > { %v3567_v26 = vmul.f32 %v3340_v15, %v1007_v54  ;;  %v1826_v47 = vsel %vm5346_vm2, %v1825_v5, %v1821_v18  ;;  %v373_v28 = vmax.f32 %v245_v17, 1e-12  ;;  %v1840_v30 = vor.u32 1.1754944e-38, %v1839_v4 }
  0xd0   : > { %v1827_v51 = vmul.f32 %v1826_v47, %v1137_v59  ;;  %v1831_v22 = vmul.f32 %v4045_v7, %v1830_v24  ;;  %v4049_v32 = vpop.eup %4048  ;;  %v1852_v38 = vand.u32 2147483647, %v5350_v58  ;;  %4052 = vrcp.f32 %v5380_v25 }
  0xd1   : > { %3696 = vst.msk [vmem:[%s4640_s23 + $0xe0] sm:$0xff] %vm3667_vm14, %v3567_v26  ;;  %v629_v62 = vmax.f32 %v501_v63, 1e-12  ;;  %v4051_v19 = vpop.eup %4050  ;;  %v1844_v41 = vmul.f32 %v4049_v32, %v5350_v58  ;;  %v756_v33 = vadd.f32 %v628_v11, %v372_v27  ;;  %v1009_v20 = vmul.f32 0.5, %v5322_v35  ;;  %v247_v27 = vld [vmem:[%s4501_s17 + $0x120] sm:$0xff] }
  0xd2   : > { %4054 = vlog2.f32 %v1827_v51  ;;  %v1832_v40 = vadd.f32 %v4045_v7, %v1831_v22  ;;  %v3342_v42 = vmul.f32 0.6931472, %v4051_v19  ;;  %vm1848_vm8 = vweird.f32 %v5350_v58 }
  0xd3   : > { %v1854_v34 = vand.u32 2147483648, %v5350_v58  ;;  %v1139_v49 = vmul.f32 %v5382_v29, %v5382_v29  ;;  %v1845_v44 = vsub.f32 1.0, %v1844_v41  ;;  %vm1849_vm9 = vweird.f32 %v4049_v32 }
  0xd4   : > { %v1836_v45 = vsel %vm5388_vm7, %v4045_v7, %v1832_v40  ;;  %v3568_v52 = vmul.f32 %v3342_v42, %v1008_v1  ;;  %vm5406_vm10 = vcmp.eq.f32.partialorder %v1852_v38, 8.507059e+37  ;;  %v5410_v53 = vmul.f32 %v629_v62, %v373_v28  ;;  %vm5418_vm11 = vmor %vm1848_vm8, %vm1849_vm9  ;;  %v504_v38 = vld [vmem:[%s4507_s20 + $0x128] sm:$0xff] }
  0xd5   : > { %v1841_v23 = vsel %vm5376_vm6, %v1840_v30, %v1836_v45  ;;  %v1846_v46 = vmul.f32 %v4049_v32, %v1845_v44  ;;  %v5412_v36 = vmul.f32 0.5, %v756_v33  ;;  %v374_v54 = vmax.f32 %v246_v43, 1e-12 }
  0xd6   : > { %v1842_v39 = vmul.f32 %v1841_v23, %v1138_v21  ;;  %v4053_v16 = vpop.eup %4052  ;;  %3697 = vst.msk [vmem:[%s4640_s23 + $0xe8] sm:$0xff] %vm3667_vm14, %v3568_v52  ;;  %v1855_v57 = vor.u32 1.1754944e-38, %v1854_v34  ;;  %v1867_v59 = vand.u32 2147483647, %v5380_v25  ;;  %4056 = vrcp.f32 %v5410_v53 }
  0xd7   : > { %v630_v60 = vmax.f32 %v502_v48, 1e-12  ;;  %v1847_v2 = vadd.f32 %v4049_v32, %v1846_v46  ;;  %v1859_v61 = vmul.f32 %v4053_v16, %v5380_v25  ;;  %v757_v55 = vadd.f32 %v629_v62, %v373_v28  ;;  %v248_v28 = vld [vmem:[%s4501_s17 + $0x128] sm:$0xff] }
  0xd8   : > { %v4055_v0 = vpop.eup %4054  ;;  %4058 = vlog2.f32 %v1842_v39  ;;  %v1010_v58 = vmul.f32 0.5, %v5352_v6  ;;  %vm1863_vm12 = vweird.f32 %v5380_v25  ;;  %v1869_v37 = vand.u32 2147483648, %v5380_v25 }
  0xd9   : > { %v3344_v3 = vmul.f32 0.6931472, %v4055_v0  ;;  %v1851_v7 = vsel %vm5418_vm11, %v4049_v32, %v1847_v2  ;;  %v1140_v9 = vmul.f32 %v5412_v36, %v5412_v36  ;;  %v1860_v5 = vsub.f32 1.0, %v1859_v61 }
  0xda   : > { %vm1864_vm13 = vweird.f32 %v4053_v16  ;;  %v1856_v12 = vsel %vm5406_vm10, %v1855_v57, %v1851_v7  ;;  %vm5436_vm15 = vcmp.eq.f32.partialorder %v1867_v59, 8.507059e+37  ;;  %v5440_v13 = vmul.f32 %v630_v60, %v374_v54  ;;  %v505_v59 = vld [vmem:[%s4507_s20 + $0x130] sm:$0xff] }
  0xdb   : > { %v3569_v11 = vmul.f32 %v3344_v3, %v1009_v20  ;;  %v1857_v14 = vmul.f32 %v1856_v12, %v1139_v49  ;;  %v1861_v50 = vmul.f32 %v4053_v16, %v1860_v5  ;;  %v5442_v15 = vmul.f32 0.5, %v757_v55  ;;  %vm5448_vm0 = vmor %vm1863_vm12, %vm1864_vm13 }
  0xdc   : > { %v375_v1 = vmax.f32 %v247_v27, 1e-12  ;;  %v4057_v4 = vpop.eup %4056  ;;  %v1870_v18 = vor.u32 1.1754944e-38, %v1869_v37  ;;  %v1882_v21 = vand.u32 2147483647, %v5410_v53  ;;  %4060 = vrcp.f32 %v5440_v13 }
  0xdd   : > { %3698 = vst.msk [vmem:[%s4640_s23 + $0xf0] sm:$0xff] %vm3667_vm14, %v3569_v11  ;;  %v631_v24 = vmax.f32 %v503_v10, 1e-12  ;;  %4062 = vlog2.f32 %v1857_v14  ;;  %v1862_v26 = vadd.f32 %v4053_v16, %v1861_v50  ;;  %v1874_v47 = vmul.f32 %v4057_v4, %v5410_v53 }
  0xde   : > { %v4059_v63 = vpop.eup %4058  ;;  %v758_v8 = vadd.f32 %v630_v60, %v374_v54  ;;  %v1011_v25 = vmul.f32 0.5, %v5382_v29  ;;  %vm1878_vm1 = vweird.f32 %v5410_v53  ;;  %v1884_v22 = vand.u32 2147483648, %v5410_v53  ;;  %v249_v54 = vld [vmem:[%s4501_s17 + $0x130] sm:$0xff] }
  0xdf   : > { %v3346_v51 = vmul.f32 0.6931472, %v4059_v63  ;;  %v1866_v32 = vsel %vm5448_vm0, %v4053_v16, %v1862_v26  ;;  %v1141_v31 = vmul.f32 %v5442_v15, %v5442_v15  ;;  %v1875_v30 = vsub.f32 1.0, %v1874_v47 }
  0xe0   : > { %vm1879_vm2 = vweird.f32 %v4057_v4  ;;  %v1871_v19 = vsel %vm5436_vm15, %v1870_v18, %v1866_v32  ;;  %vm5466_vm3 = vcmp.eq.f32.partialorder %v1882_v21, 8.507059e+37  ;;  %v5470_v40 = vmul.f32 %v631_v24, %v375_v1  ;;  %v506_v21 = vld [vmem:[%s4507_s20 + $0x138] sm:$0xff] }
  0xe1   : > { %v3570_v62 = vmul.f32 %v3346_v51, %v1010_v58  ;;  %v1872_v41 = vmul.f32 %v1871_v19, %v1140_v9  ;;  %v1876_v33 = vmul.f32 %v4057_v4, %v1875_v30  ;;  %v5472_v42 = vmul.f32 0.5, %v758_v8  ;;  %vm5478_vm4 = vmor %vm1878_vm1, %vm1879_vm2 }
  0xe2   : > { %v376_v20 = vmax.f32 %v248_v28, 1e-12  ;;  %v4061_v34 = vpop.eup %4060  ;;  %v1885_v45 = vor.u32 1.1754944e-38, %v1884_v22  ;;  %v1897_v49 = vand.u32 2147483647, %v5440_v13  ;;  %4064 = vrcp.f32 %v5470_v40 }
  0xe3   : > { %3699 = vst.msk [vmem:[%s4640_s23 + $0xf8] sm:$0xff] %vm3667_vm14, %v3570_v62  ;;  %v632_v44 = vmax.f32 %v504_v38, 1e-12  ;;  %v4063_v48 = vpop.eup %4062  ;;  %4066 = vlog2.f32 %v1872_v41  ;;  %v1877_v52 = vadd.f32 %v4057_v4, %v1876_v33  ;;  %v1889_v23 = vmul.f32 %v4061_v34, %v5440_v13 }
  0xe4   : > { %v759_v35 = vadd.f32 %v631_v24, %v375_v1  ;;  %v3348_v39 = vmul.f32 0.6931472, %v4063_v48  ;;  %v1012_v53 = vmul.f32 0.5, %v5412_v36  ;;  %vm1893_vm5 = vweird.f32 %v5440_v13  ;;  %v250_v1 = vld [vmem:[%s4501_s17 + $0x138] sm:$0xff] }
  0xe5   : > { %v1899_v46 = vand.u32 2147483648, %v5440_v13  ;;  %v1881_v16 = vsel %vm5478_vm4, %v4057_v4, %v1877_v52  ;;  %v1142_v56 = vmul.f32 %v5472_v42, %v5472_v42  ;;  %v1890_v57 = vsub.f32 1.0, %v1889_v23 }
  0xe6   : > { %vm1894_vm6 = vweird.f32 %v4061_v34  ;;  %v3571_v60 = vmul.f32 %v3348_v39, %v1011_v25  ;;  %v1886_v0 = vsel %vm5466_vm3, %v1885_v45, %v1881_v16  ;;  %vm5496_vm7 = vcmp.eq.f32.partialorder %v1897_v49, 8.507059e+37  ;;  %v507_v49 = vld [vmem:[%s4507_s20 + $0x140] sm:$0xff] }
  0xe7   : > { %v5500_v2 = vmul.f32 %v632_v44, %v376_v20  ;;  %v1887_v61 = vmul.f32 %v1886_v0, %v1141_v31  ;;  %v1891_v55 = vmul.f32 %v4061_v34, %v1890_v57  ;;  %v5502_v3 = vmul.f32 0.5, %v759_v35  ;;  %vm5508_vm8 = vmor %vm1893_vm5, %vm1894_vm6 }
  0xe8   : > { %v377_v58 = vmax.f32 %v249_v54, 1e-12  ;;  %v4065_v37 = vpop.eup %4064  ;;  %3700 = vst.msk [vmem:[%s4640_s23 + $0x100] sm:$0xff] %vm3667_vm14, %v3571_v60  ;;  %v1900_v7 = vor.u32 1.1754944e-38, %v1899_v46  ;;  %v1912_v9 = vand.u32 2147483647, %v5470_v40  ;;  %v760_v6 = vadd.f32 %v632_v44, %v376_v20 }
  0xe9   : > { %4068 = vrcp.f32 %v5500_v2  ;;  %v633_v5 = vmax.f32 %v505_v59, 1e-12  ;;  %v4067_v10 = vpop.eup %4066  ;;  %v1892_v11 = vadd.f32 %v4061_v34, %v1891_v55  ;;  %v1904_v12 = vmul.f32 %v4065_v37, %v5470_v40  ;;  %v251_v20 = vld [vmem:[%s4501_s17 + $0x140] sm:$0xff] }
  0xea   : > { %4070 = vlog2.f32 %v1887_v61  ;;  %v3350_v14 = vmul.f32 0.6931472, %v4067_v10  ;;  %v1013_v13 = vmul.f32 0.5, %v5442_v15  ;;  %vm1908_vm9 = vweird.f32 %v5470_v40 }
  0xeb   : > { %v1914_v50 = vand.u32 2147483648, %v5470_v40  ;;  %v1896_v4 = vsel %vm5508_vm8, %v4061_v34, %v1892_v11  ;;  %v1143_v17 = vmul.f32 %v5502_v3, %v5502_v3  ;;  %v1905_v18 = vsub.f32 1.0, %v1904_v12 }
  0xec   : > { %vm1909_vm10 = vweird.f32 %v4065_v37  ;;  %v3572_v24 = vmul.f32 %v3350_v14, %v1012_v53  ;;  %v1901_v63 = vsel %vm5496_vm7, %v1900_v7, %v1896_v4  ;;  %vm5526_vm11 = vcmp.eq.f32.partialorder %v1912_v9, 8.507059e+37  ;;  %v508_v9 = vld [vmem:[%s4507_s20 + $0x148] sm:$0xff] }
  0xed   : > { %v5530_v26 = vmul.f32 %v633_v5, %v377_v58  ;;  %v1902_v47 = vmul.f32 %v1901_v63, %v1142_v56  ;;  %v1906_v8 = vmul.f32 %v4065_v37, %v1905_v18  ;;  %v5532_v51 = vmul.f32 0.5, %v760_v6  ;;  %vm5538_vm12 = vmor %vm1908_vm9, %vm1909_vm10 }
  0xee   : > { %v378_v25 = vmax.f32 %v250_v1, 1e-12  ;;  %3701 = vst.msk [vmem:[%s4640_s23 + $0x108] sm:$0xff] %vm3667_vm14, %v3572_v24  ;;  %v1915_v32 = vor.u32 1.1754944e-38, %v1914_v50  ;;  %v1927_v31 = vand.u32 2147483647, %v5500_v2  ;;  %v761_v29 = vadd.f32 %v633_v5, %v377_v58 }
  0xef   : > { %v4069_v22 = vpop.eup %4068  ;;  %4072 = vrcp.f32 %v5530_v26  ;;  %v634_v30 = vmax.f32 %v506_v21, 1e-12  ;;  %v1907_v62 = vadd.f32 %v4065_v37, %v1906_v8  ;;  %v1014_v40 = vmul.f32 0.5, %v5472_v42  ;;  %v252_v58 = vld [vmem:[%s4501_s17 + $0x148] sm:$0xff] }
  0xf0   : > { %v4071_v38 = vpop.eup %4070  ;;  %4074 = vlog2.f32 %v1902_v47  ;;  %v1919_v19 = vmul.f32 %v4069_v22, %v5500_v2  ;;  %vm1923_vm13 = vweird.f32 %v5500_v2  ;;  %v1929_v33 = vand.u32 2147483648, %v5500_v2 }
  0xf1   : > { %v3352_v41 = vmul.f32 0.6931472, %v4071_v38  ;;  %v1911_v34 = vsel %vm5538_vm12, %v4065_v37, %v1907_v62  ;;  %v1144_v43 = vmul.f32 %v5532_v51, %v5532_v51  ;;  %vm1924_vm15 = vweird.f32 %v4069_v22 }
  0xf2   : > { %v1920_v45 = vsub.f32 1.0, %v1919_v19  ;;  %v1916_v48 = vsel %vm5526_vm11, %v1915_v32, %v1911_v34  ;;  %vm5556_vm0 = vcmp.eq.f32.partialorder %v1927_v31, 8.507059e+37  ;;  %v5560_v52 = vmul.f32 %v634_v30, %v378_v25  ;;  %vm5568_vm1 = vmor %vm1923_vm13, %vm1924_vm15  ;;  %v509_v31 = vld [vmem:[%s4507_s20 + $0x150] sm:$0xff] }
  0xf3   : > { %v3573_v44 = vmul.f32 %v3352_v41, %v1013_v13  ;;  %v1917_v23 = vmul.f32 %v1916_v48, %v1143_v17  ;;  %v5562_v39 = vmul.f32 0.5, %v761_v29  ;;  %v379_v53 = vmax.f32 %v251_v20, 1e-12 }
  0xf4   : > { %v1921_v35 = vmul.f32 %v4069_v22, %v1920_v45  ;;  %v1930_v16 = vor.u32 1.1754944e-38, %v1929_v33  ;;  %v1942_v56 = vand.u32 2147483647, %v5530_v26  ;;  %4076 = vrcp.f32 %v5560_v52 }
  0xf5   : > { %v4073_v46 = vpop.eup %4072  ;;  %3702 = vst.msk [vmem:[%s4640_s23 + $0x110] sm:$0xff] %vm3667_vm14, %v3573_v44  ;;  %v635_v57 = vmax.f32 %v507_v49, 1e-12  ;;  %4078 = vlog2.f32 %v1917_v23  ;;  %v762_v36 = vadd.f32 %v634_v30, %v378_v25  ;;  %v1015_v2 = vmul.f32 0.5, %v5502_v3  ;;  %v253_v25 = vld [vmem:[%s4501_s17 + $0x150] sm:$0xff] }
  0xf6   : > { %v4075_v59 = vpop.eup %4074  ;;  %v1922_v60 = vadd.f32 %v4069_v22, %v1921_v35  ;;  %v1934_v0 = vmul.f32 %v4073_v46, %v5530_v26  ;;  %vm1938_vm2 = vweird.f32 %v5530_v26  ;;  %v1944_v55 = vand.u32 2147483648, %v5530_v26 }
  0xf7   : > { %v3354_v61 = vmul.f32 0.6931472, %v4075_v59  ;;  %v1145_v27 = vmul.f32 %v5562_v39, %v5562_v39  ;;  %vm1939_vm3 = vweird.f32 %v4073_v46  ;;  %vm5586_vm4 = vcmp.eq.f32.partialorder %v1942_v56, 8.507059e+37  ;;  %v510_v56 = vld [vmem:[%s4507_s20 + $0x158] sm:$0xff] }
  0xf8   : > { %v1926_v37 = vsel %vm5568_vm1, %v4069_v22, %v1922_v60  ;;  %v1935_v7 = vsub.f32 1.0, %v1934_v0  ;;  %v5590_v11 = vmul.f32 %v635_v57, %v379_v53  ;;  %v5592_v14 = vmul.f32 0.5, %v762_v36  ;;  %vm5598_vm5 = vmor %vm1938_vm2, %vm1939_vm3 }
  0xf9   : > { %v3574_v5 = vmul.f32 %v3354_v61, %v1014_v40  ;;  %v1931_v10 = vsel %vm5556_vm0, %v1930_v16, %v1926_v37  ;;  %v380_v13 = vmax.f32 %v252_v58, 1e-12  ;;  %v1945_v4 = vor.u32 1.1754944e-38, %v1944_v55 }
  0xfa   : > { %v1932_v12 = vmul.f32 %v1931_v10, %v1144_v43  ;;  %v1936_v6 = vmul.f32 %v4073_v46, %v1935_v7  ;;  %v4077_v50 = vpop.eup %4076  ;;  %v1957_v17 = vand.u32 2147483647, %v5560_v52  ;;  %4080 = vrcp.f32 %v5590_v11 }
  0xfb   : > { %3703 = vst.msk [vmem:[%s4640_s23 + $0x118] sm:$0xff] %vm3667_vm14, %v3574_v5  ;;  %v636_v18 = vmax.f32 %v508_v9, 1e-12  ;;  %v4079_v21 = vpop.eup %4078  ;;  %v1949_v63 = vmul.f32 %v4077_v50, %v5560_v52  ;;  %v763_v15 = vadd.f32 %v635_v57, %v379_v53  ;;  %v1016_v26 = vmul.f32 0.5, %v5532_v51  ;;  %v254_v53 = vld [vmem:[%s4501_s17 + $0x158] sm:$0xff] }
  0xfc   : > { %4082 = vlog2.f32 %v1932_v12  ;;  %v1937_v24 = vadd.f32 %v4073_v46, %v1936_v6  ;;  %v3356_v47 = vmul.f32 0.6931472, %v4079_v21  ;;  %vm1953_vm6 = vweird.f32 %v5560_v52 }
  0xfd   : > { %v1959_v8 = vand.u32 2147483648, %v5560_v52  ;;  %v1146_v28 = vmul.f32 %v5592_v14, %v5592_v14  ;;  %v1950_v32 = vsub.f32 1.0, %v1949_v63  ;;  %vm1954_vm7 = vweird.f32 %v4077_v50 }
  0xfe   : > { %v1941_v22 = vsel %vm5598_vm5, %v4073_v46, %v1937_v24  ;;  %v3575_v30 = vmul.f32 %v3356_v47, %v1015_v2  ;;  %vm5616_vm8 = vcmp.eq.f32.partialorder %v1957_v17, 8.507059e+37  ;;  %v5620_v62 = vmul.f32 %v636_v18, %v380_v13  ;;  %vm5628_vm9 = vmor %vm1953_vm6, %vm1954_vm7  ;;  %v511_v17 = vld [vmem:[%s4507_s20 + $0x160] sm:$0xff] }
  0xff   : > { %v1946_v38 = vsel %vm5586_vm4, %v1945_v4, %v1941_v22  ;;  %v1951_v29 = vmul.f32 %v4077_v50, %v1950_v32  ;;  %v5622_v41 = vmul.f32 0.5, %v763_v15  ;;  %v381_v40 = vmax.f32 %v253_v25, 1e-12 }
 0x100   : > { %v1947_v19 = vmul.f32 %v1946_v38, %v1145_v27  ;;  %v4081_v33 = vpop.eup %4080  ;;  %3704 = vst.msk [vmem:[%s4640_s23 + $0x120] sm:$0xff] %vm3667_vm14, %v3575_v30  ;;  %v1960_v34 = vor.u32 1.1754944e-38, %v1959_v8  ;;  %v1972_v43 = vand.u32 2147483647, %v5590_v11  ;;  %4084 = vrcp.f32 %v5620_v62 }
 0x101   : > { %v637_v45 = vmax.f32 %v509_v31, 1e-12  ;;  %v1952_v44 = vadd.f32 %v4077_v50, %v1951_v29  ;;  %v1964_v48 = vmul.f32 %v4081_v33, %v5590_v11  ;;  %v764_v42 = vadd.f32 %v636_v18, %v380_v13  ;;  %v255_v13 = vld [vmem:[%s4501_s17 + $0x160] sm:$0xff] }
 0x102   : > { %v4083_v49 = vpop.eup %4082  ;;  %4086 = vlog2.f32 %v1947_v19  ;;  %v1017_v52 = vmul.f32 0.5, %v5562_v39  ;;  %vm1968_vm10 = vweird.f32 %v5590_v11  ;;  %v1974_v35 = vand.u32 2147483648, %v5590_v11 }
 0x103   : > { %v3358_v23 = vmul.f32 0.6931472, %v4083_v49  ;;  %v1956_v46 = vsel %vm5628_vm9, %v4077_v50, %v1952_v44  ;;  %v1147_v54 = vmul.f32 %v5622_v41, %v5622_v41  ;;  %v1965_v16 = vsub.f32 1.0, %v1964_v48 }
 0x104   : > { %vm1969_vm11 = vweird.f32 %v4081_v33  ;;  %v1961_v59 = vsel %vm5616_vm8, %v1960_v34, %v1956_v46  ;;  %vm5646_vm12 = vcmp.eq.f32.partialorder %v1972_v43, 8.507059e+37  ;;  %v5650_v60 = vmul.f32 %v637_v45, %v381_v40  ;;  %v512_v43 = vld [vmem:[%s4507_s20 + $0x168] sm:$0xff] }
 0x105   : > { %v3576_v57 = vmul.f32 %v3358_v23, %v1016_v26  ;;  %v1962_v0 = vmul.f32 %v1961_v59, %v1146_v28  ;;  %v1966_v36 = vmul.f32 %v4081_v33, %v1965_v16  ;;  %v5652_v61 = vmul.f32 0.5, %v764_v42  ;;  %vm5658_vm13 = vmor %vm1968_vm10, %vm1969_vm11 }
 0x106   : > { %v382_v2 = vmax.f32 %v254_v53, 1e-12  ;;  %v4085_v55 = vpop.eup %4084  ;;  %v1975_v37 = vor.u32 1.1754944e-38, %v1974_v35  ;;  %v1987_v27 = vand.u32 2147483647, %v5620_v62  ;;  %4088 = vrcp.f32 %v5650_v60 }
 0x107   : > { %3705 = vst.msk [vmem:[%s4640_s23 + $0x128] sm:$0xff] %vm3667_vm14, %v3576_v57  ;;  %v638_v7 = vmax.f32 %v510_v56, 1e-12  ;;  %4090 = vlog2.f32 %v1962_v0  ;;  %v1967_v5 = vadd.f32 %v4081_v33, %v1966_v36  ;;  %v1979_v10 = vmul.f32 %v4085_v55, %v5620_v62 }
 0x108   : > { %v4087_v9 = vpop.eup %4086  ;;  %v765_v3 = vadd.f32 %v637_v45, %v381_v40  ;;  %v1018_v11 = vmul.f32 0.5, %v5592_v14  ;;  %vm1983_vm15 = vweird.f32 %v5620_v62  ;;  %v1989_v6 = vand.u32 2147483648, %v5620_v62  ;;  %v256_v40 = vld [vmem:[%s4501_s17 + $0x168] sm:$0xff] }
 0x109   : > { %v3360_v12 = vmul.f32 0.6931472, %v4087_v9  ;;  %v1971_v50 = vsel %vm5658_vm13, %v4081_v33, %v1967_v5  ;;  %v1148_v1 = vmul.f32 %v5652_v61, %v5652_v61  ;;  %v1980_v4 = vsub.f32 1.0, %v1979_v10 }
 0x10a   : > { %vm1984_vm0 = vweird.f32 %v4085_v55  ;;  %v1976_v21 = vsel %vm5646_vm12, %v1975_v37, %v1971_v50  ;;  %vm5676_vm1 = vcmp.eq.f32.partialorder %v1987_v27, 8.507059e+37  ;;  %v5680_v24 = vmul.f32 %v638_v7, %v382_v2  ;;  %v513_v27 = vld [vmem:[%s4507_s20 + $0x170] sm:$0xff] }
 0x10b   : > { %v3577_v18 = vmul.f32 %v3360_v12, %v1017_v52  ;;  %v1977_v63 = vmul.f32 %v1976_v21, %v1147_v54  ;;  %v1981_v15 = vmul.f32 %v4085_v55, %v1980_v4  ;;  %v5682_v47 = vmul.f32 0.5, %v765_v3  ;;  %vm5688_vm2 = vmor %vm1983_vm15, %vm1984_vm0 }
 0x10c   : > { %v383_v26 = vmax.f32 %v255_v13, 1e-12  ;;  %v4089_v8 = vpop.eup %4088  ;;  %v1990_v22 = vor.u32 1.1754944e-38, %v1989_v6  ;;  %v2002_v28 = vand.u32 2147483647, %v5650_v60  ;;  %4092 = vrcp.f32 %v5680_v24 }
 0x10d   : > { %3706 = vst.msk [vmem:[%s4640_s23 + $0x130] sm:$0xff] %vm3667_vm14, %v3577_v18  ;;  %v639_v32 = vmax.f32 %v511_v17, 1e-12  ;;  %v4091_v31 = vpop.eup %4090  ;;  %4094 = vlog2.f32 %v1977_v63  ;;  %v1982_v30 = vadd.f32 %v4085_v55, %v1981_v15  ;;  %v1994_v38 = vmul.f32 %v4089_v8, %v5650_v60 }
 0x10e   : > { %v766_v51 = vadd.f32 %v638_v7, %v382_v2  ;;  %v3362_v19 = vmul.f32 0.6931472, %v4091_v31  ;;  %v1019_v62 = vmul.f32 0.5, %v5622_v41  ;;  %vm1998_vm3 = vweird.f32 %v5650_v60  ;;  %v257_v2 = vld [vmem:[%s4501_s17 + $0x170] sm:$0xff] }
 0x10f   : > { %v2004_v29 = vand.u32 2147483648, %v5650_v60  ;;  %v1986_v33 = vsel %vm5688_vm2, %v4085_v55, %v1982_v30  ;;  %v1149_v20 = vmul.f32 %v5682_v47, %v5682_v47  ;;  %v1995_v34 = vsub.f32 1.0, %v1994_v38 }
 0x110   : > { %vm1999_vm4 = vweird.f32 %v4089_v8  ;;  %v3578_v45 = vmul.f32 %v3362_v19, %v1018_v11  ;;  %v1991_v49 = vsel %vm5676_vm1, %v1990_v22, %v1986_v33  ;;  %vm5706_vm5 = vcmp.eq.f32.partialorder %v2002_v28, 8.507059e+37  ;;  %v514_v28 = vld [vmem:[%s4507_s20 + $0x178] sm:$0xff] }
 0x111   : > { %v5710_v44 = vmul.f32 %v639_v32, %v383_v26  ;;  %v1992_v48 = vmul.f32 %v1991_v49, %v1148_v1  ;;  %v1996_v42 = vmul.f32 %v4089_v8, %v1995_v34  ;;  %v5712_v23 = vmul.f32 0.5, %v766_v51  ;;  %vm5718_vm6 = vmor %vm1998_vm3, %vm1999_vm4 }
 0x112   : > { %v384_v52 = vmax.f32 %v256_v40, 1e-12  ;;  %v4093_v35 = vpop.eup %4092  ;;  %3707 = vst.msk [vmem:[%s4640_s23 + $0x138] sm:$0xff] %vm3667_vm14, %v3578_v45  ;;  %v2005_v46 = vor.u32 1.1754944e-38, %v2004_v29  ;;  %v2017_v54 = vand.u32 2147483647, %v5680_v24  ;;  %v767_v39 = vadd.f32 %v639_v32, %v383_v26 }
 0x113   : > { %4096 = vrcp.f32 %v5710_v44  ;;  %v640_v16 = vmax.f32 %v512_v43, 1e-12  ;;  %v4095_v56 = vpop.eup %4094  ;;  %v1997_v57 = vadd.f32 %v4089_v8, %v1996_v42  ;;  %v2009_v59 = vmul.f32 %v4093_v35, %v5680_v24  ;;  %v258_v26 = vld [vmem:[%s4501_s17 + $0x178] sm:$0xff] }
 0x114   : > { %4098 = vlog2.f32 %v1992_v48  ;;  %v3364_v0 = vmul.f32 0.6931472, %v4095_v56  ;;  %v1020_v60 = vmul.f32 0.5, %v5652_v61  ;;  %vm2013_vm7 = vweird.f32 %v5680_v24 }
 0x115   : > { %v2019_v36 = vand.u32 2147483648, %v5680_v24  ;;  %v2001_v55 = vsel %vm5718_vm6, %v4089_v8, %v1997_v57  ;;  %v1150_v58 = vmul.f32 %v5712_v23, %v5712_v23  ;;  %v2010_v37 = vsub.f32 1.0, %v2009_v59 }
 0x116   : > { %vm2014_vm8 = vweird.f32 %v4093_v35  ;;  %v3579_v7 = vmul.f32 %v3364_v0, %v1019_v62  ;;  %v2006_v9 = vsel %vm5706_vm5, %v2005_v46, %v2001_v55  ;;  %vm5736_vm9 = vcmp.eq.f32.partialorder %v2017_v54, 8.507059e+37  ;;  %v515_v54 = vld [vmem:[%s4507_s20 + $0x180] sm:$0xff] }
 0x117   : > { %v5740_v5 = vmul.f32 %v640_v16, %v384_v52  ;;  %v2007_v10 = vmul.f32 %v2006_v9, %v1149_v20  ;;  %v2011_v3 = vmul.f32 %v4093_v35, %v2010_v37  ;;  %v5742_v12 = vmul.f32 0.5, %v767_v39  ;;  %vm5748_vm10 = vmor %vm2013_vm7, %vm2014_vm8 }
 0x118   : > { %v385_v11 = vmax.f32 %v257_v2, 1e-12  ;;  %3708 = vst.msk [vmem:[%s4640_s23 + $0x140] sm:$0xff] %vm3667_vm14, %v3579_v7  ;;  %v2020_v50 = vor.u32 1.1754944e-38, %v2019_v36  ;;  %v2032_v1 = vand.u32 2147483647, %v5710_v44  ;;  %v768_v14 = vadd.f32 %v640_v16, %v384_v52 }
 0x119   : > { %v4097_v6 = vpop.eup %4096  ;;  %4100 = vrcp.f32 %v5740_v5  ;;  %v641_v4 = vmax.f32 %v513_v27, 1e-12  ;;  %v2012_v18 = vadd.f32 %v4093_v35, %v2011_v3  ;;  %v1021_v24 = vmul.f32 0.5, %v5682_v47  ;;  %v259_v52 = vld [vmem:[%s4501_s17 + $0x180] sm:$0xff] }
 0x11a   : > { %v4099_v17 = vpop.eup %4098  ;;  %4102 = vlog2.f32 %v2007_v10  ;;  %v2024_v21 = vmul.f32 %v4097_v6, %v5710_v44  ;;  %vm2028_vm11 = vweird.f32 %v5710_v44  ;;  %v2034_v15 = vand.u32 2147483648, %v5710_v44 }
 0x11b   : > { %v3366_v63 = vmul.f32 0.6931472, %v4099_v17  ;;  %v2016_v8 = vsel %vm5748_vm10, %v4093_v35, %v2012_v18  ;;  %v1151_v25 = vmul.f32 %v5742_v12, %v5742_v12  ;;  %vm2029_vm12 = vweird.f32 %v4097_v6 }
 0x11c   : > { %v2025_v22 = vsub.f32 1.0, %v2024_v21  ;;  %v2021_v31 = vsel %vm5736_vm9, %v2020_v50, %v2016_v8  ;;  %vm5766_vm13 = vcmp.eq.f32.partialorder %v2032_v1, 8.507059e+37  ;;  %v5770_v30 = vmul.f32 %v641_v4, %v385_v11  ;;  %vm5778_vm15 = vmor %vm2028_vm11, %vm2029_vm12  ;;  %v516_v1 = vld [vmem:[%s4507_s20 + $0x188] sm:$0xff] }
 0x11d   : > { %v3580_v32 = vmul.f32 %v3366_v63, %v1020_v60  ;;  %v2022_v38 = vmul.f32 %v2021_v31, %v1150_v58  ;;  %v5772_v19 = vmul.f32 0.5, %v768_v14  ;;  %v386_v62 = vmax.f32 %v258_v26, 1e-12 }
 0x11e   : > { %v2026_v51 = vmul.f32 %v4097_v6, %v2025_v22  ;;  %v2035_v33 = vor.u32 1.1754944e-38, %v2034_v15  ;;  %v2047_v20 = vand.u32 2147483647, %v5740_v5  ;;  %4104 = vrcp.f32 %v5770_v30 }
 0x11f   : > { %v4101_v29 = vpop.eup %4100  ;;  %3709 = vst.msk [vmem:[%s4640_s23 + $0x148] sm:$0xff] %vm3667_vm14, %v3580_v32  ;;  %v642_v34 = vmax.f32 %v514_v28, 1e-12  ;;  %4106 = vlog2.f32 %v2022_v38  ;;  %v769_v41 = vadd.f32 %v641_v4, %v385_v11  ;;  %v1022_v44 = vmul.f32 0.5, %v5712_v23  ;;  %v260_v11 = vld [vmem:[%s4501_s17 + $0x188] sm:$0xff] }
 0x120   : > { %v4103_v43 = vpop.eup %4102  ;;  %v2027_v45 = vadd.f32 %v4097_v6, %v2026_v51  ;;  %v2039_v49 = vmul.f32 %v4101_v29, %v5740_v5  ;;  %vm2043_vm0 = vweird.f32 %v5740_v5  ;;  %v2049_v42 = vand.u32 2147483648, %v5740_v5 }
 0x121   : > { %v3368_v48 = vmul.f32 0.6931472, %v4103_v43  ;;  %v1152_v53 = vmul.f32 %v5772_v19, %v5772_v19  ;;  %vm2044_vm1 = vweird.f32 %v4101_v29  ;;  %vm5796_vm2 = vcmp.eq.f32.partialorder %v2047_v20, 8.507059e+37  ;;  %v517_v20 = vld [vmem:[%s4507_s20 + $0x190] sm:$0xff] }
 0x122   : > { %v2031_v35 = vsel %vm5778_vm15, %v4097_v6, %v2027_v45  ;;  %v2040_v46 = vsub.f32 1.0, %v2039_v49  ;;  %v5800_v57 = vmul.f32 %v642_v34, %v386_v62  ;;  %v5802_v0 = vmul.f32 0.5, %v769_v41  ;;  %vm5808_vm3 = vmor %vm2043_vm0, %vm2044_vm1 }
 0x123   : > { %v3581_v16 = vmul.f32 %v3368_v48, %v1021_v24  ;;  %v2036_v56 = vsel %vm5766_vm13, %v2035_v33, %v2031_v35  ;;  %v387_v60 = vmax.f32 %v259_v52, 1e-12  ;;  %v2050_v55 = vor.u32 1.1754944e-38, %v2049_v42 }
 0x124   : > { %v2037_v59 = vmul.f32 %v2036_v56, %v1151_v25  ;;  %v2041_v39 = vmul.f32 %v4101_v29, %v2040_v46  ;;  %v4105_v36 = vpop.eup %4104  ;;  %v2062_v58 = vand.u32 2147483647, %v5770_v30  ;;  %4108 = vrcp.f32 %v5800_v57 }
 0x125   : > { %3710 = vst.msk [vmem:[%s4640_s23 + $0x150] sm:$0xff] %vm3667_vm14, %v3581_v16  ;;  %v643_v37 = vmax.f32 %v515_v54, 1e-12  ;;  %v4107_v27 = vpop.eup %4106  ;;  %v2054_v9 = vmul.f32 %v4105_v36, %v5770_v30  ;;  %v770_v61 = vadd.f32 %v642_v34, %v386_v62  ;;  %v1023_v5 = vmul.f32 0.5, %v5742_v12  ;;  %v261_v62 = vld [vmem:[%s4501_s17 + $0x190] sm:$0xff] }
 0x126   : > { %4110 = vlog2.f32 %v2037_v59  ;;  %v2042_v7 = vadd.f32 %v4101_v29, %v2041_v39  ;;  %v3370_v10 = vmul.f32 0.6931472, %v4107_v27  ;;  %vm2058_vm4 = vweird.f32 %v5770_v30 }
 0x127   : > { %v2064_v3 = vand.u32 2147483648, %v5770_v30  ;;  %v1153_v13 = vmul.f32 %v5802_v0, %v5802_v0  ;;  %v2055_v50 = vsub.f32 1.0, %v2054_v9  ;;  %vm2059_vm5 = vweird.f32 %v4105_v36 }
 0x128   : > { %v2046_v6 = vsel %vm5808_vm3, %v4101_v29, %v2042_v7  ;;  %v3582_v4 = vmul.f32 %v3370_v10, %v1022_v44  ;;  %vm5826_vm6 = vcmp.eq.f32.partialorder %v2062_v58, 8.507059e+37  ;;  %v5830_v18 = vmul.f32 %v643_v37, %v387_v60  ;;  %vm5838_vm7 = vmor %vm2058_vm4, %vm2059_vm5  ;;  %v518_v58 = vld [vmem:[%s4507_s20 + $0x198] sm:$0xff] }
 0x129   : > { %v2051_v17 = vsel %vm5796_vm2, %v2050_v55, %v2046_v6  ;;  %v2056_v14 = vmul.f32 %v4105_v36, %v2055_v50  ;;  %v5832_v63 = vmul.f32 0.5, %v770_v61  ;;  %v388_v24 = vmax.f32 %v260_v11, 1e-12 }
 0x12a   : > { %v2052_v21 = vmul.f32 %v2051_v17, %v1152_v53  ;;  %v4109_v15 = vpop.eup %4108  ;;  %3711 = vst.msk [vmem:[%s4640_s23 + $0x158] sm:$0xff] %vm3667_vm14, %v3582_v4  ;;  %v2065_v8 = vor.u32 1.1754944e-38, %v2064_v3  ;;  %v2077_v25 = vand.u32 2147483647, %v5800_v57  ;;  %4112 = vrcp.f32 %v5830_v18 }
 0x12b   : > { %v644_v22 = vmax.f32 %v516_v1, 1e-12  ;;  %v2057_v32 = vadd.f32 %v4105_v36, %v2056_v14  ;;  %v2069_v31 = vmul.f32 %v4109_v15, %v5800_v57  ;;  %v771_v47 = vadd.f32 %v643_v37, %v387_v60  ;;  %v262_v60 = vld [vmem:[%s4501_s17 + $0x198] sm:$0xff] }
 0x12c   : > { %v4111_v28 = vpop.eup %4110  ;;  %4114 = vlog2.f32 %v2052_v21  ;;  %v1024_v30 = vmul.f32 0.5, %v5772_v19  ;;  %vm2073_vm8 = vweird.f32 %v5800_v57  ;;  %v2079_v51 = vand.u32 2147483648, %v5800_v57 }
 0x12d   : > { %v3372_v38 = vmul.f32 0.6931472, %v4111_v28  ;;  %v2061_v29 = vsel %vm5838_vm7, %v4105_v36, %v2057_v32  ;;  %v1154_v40 = vmul.f32 %v5832_v63, %v5832_v63  ;;  %v2070_v33 = vsub.f32 1.0, %v2069_v31 }
 0x12e   : > { %vm2074_vm9 = vweird.f32 %v4109_v15  ;;  %v2066_v43 = vsel %vm5826_vm6, %v2065_v8, %v2061_v29  ;;  %vm5856_vm10 = vcmp.eq.f32.partialorder %v2077_v25, 8.507059e+37  ;;  %v5860_v45 = vmul.f32 %v644_v22, %v388_v24  ;;  %v519_v25 = vld [vmem:[%s4507_s20 + $0x1a0] sm:$0xff] }
 0x12f   : > { %v3583_v34 = vmul.f32 %v3372_v38, %v1023_v5  ;;  %v2067_v49 = vmul.f32 %v2066_v43, %v1153_v13  ;;  %v2071_v41 = vmul.f32 %v4109_v15, %v2070_v33  ;;  %v5862_v48 = vmul.f32 0.5, %v771_v47  ;;  %vm5868_vm11 = vmor %vm2073_vm8, %vm2074_vm9 }
 0x130   : > { %v389_v44 = vmax.f32 %v261_v62, 1e-12  ;;  %v4113_v42 = vpop.eup %4112  ;;  %v2080_v35 = vor.u32 1.1754944e-38, %v2079_v51  ;;  %v2092_v53 = vand.u32 2147483647, %v5830_v18  ;;  %4116 = vrcp.f32 %v5860_v45 }
 0x131   : > { %3712 = vst.msk [vmem:[%s4640_s23 + $0x160] sm:$0xff] %vm3667_vm14, %v3583_v34  ;;  %v645_v46 = vmax.f32 %v517_v20, 1e-12  ;;  %4118 = vlog2.f32 %v2067_v49  ;;  %v2072_v16 = vadd.f32 %v4109_v15, %v2071_v41  ;;  %v2084_v56 = vmul.f32 %v4113_v42, %v5830_v18 }
 0x132   : > { %v4115_v54 = vpop.eup %4114  ;;  %v772_v23 = vadd.f32 %v644_v22, %v388_v24  ;;  %v1025_v57 = vmul.f32 0.5, %v5802_v0  ;;  %vm2088_vm12 = vweird.f32 %v5830_v18  ;;  %v2094_v39 = vand.u32 2147483648, %v5830_v18  ;;  %v263_v24 = vld [vmem:[%s4501_s17 + $0x1a0] sm:$0xff] }
 0x133   : > { %v3374_v59 = vmul.f32 0.6931472, %v4115_v54  ;;  %v2076_v36 = vsel %vm5868_vm11, %v4109_v15, %v2072_v16  ;;  %v1155_v2 = vmul.f32 %v5862_v48, %v5862_v48  ;;  %v2085_v55 = vsub.f32 1.0, %v2084_v56 }
 0x134   : > { %vm2089_vm13 = vweird.f32 %v4113_v42  ;;  %v2081_v27 = vsel %vm5856_vm10, %v2080_v35, %v2076_v36  ;;  %vm5886_vm15 = vcmp.eq.f32.partialorder %v2092_v53, 8.507059e+37  ;;  %v5890_v7 = vmul.f32 %v645_v46, %v389_v44  ;;  %v520_v53 = vld [vmem:[%s4507_s20 + $0x1a8] sm:$0xff] }
 0x135   : > { %v3584_v37 = vmul.f32 %v3374_v59, %v1024_v30  ;;  %v2082_v9 = vmul.f32 %v2081_v27, %v1154_v40  ;;  %v2086_v61 = vmul.f32 %v4113_v42, %v2085_v55  ;;  %v5892_v10 = vmul.f32 0.5, %v772_v23  ;;  %vm5898_vm0 = vmor %vm2088_vm12, %vm2089_vm13 }
 0x136   : > { %v390_v5 = vmax.f32 %v262_v60, 1e-12  ;;  %v4117_v3 = vpop.eup %4116  ;;  %v2095_v6 = vor.u32 1.1754944e-38, %v2094_v39  ;;  %v2107_v13 = vand.u32 2147483647, %v5860_v45  ;;  %4120 = vrcp.f32 %v5890_v7 }
 0x137   : > { %3713 = vst.msk [vmem:[%s4640_s23 + $0x168] sm:$0xff] %vm3667_vm14, %v3584_v37  ;;  %v646_v50 = vmax.f32 %v518_v58, 1e-12  ;;  %v4119_v1 = vpop.eup %4118  ;;  %4122 = vlog2.f32 %v2082_v9  ;;  %v2087_v4 = vadd.f32 %v4113_v42, %v2086_v61  ;;  %v2099_v17 = vmul.f32 %v4117_v3, %v5860_v45 }
 0x138   : > { %v773_v12 = vadd.f32 %v645_v46, %v389_v44  ;;  %v3376_v21 = vmul.f32 0.6931472, %v4119_v1  ;;  %v1026_v18 = vmul.f32 0.5, %v5832_v63  ;;  %vm2103_vm1 = vweird.f32 %v5860_v45  ;;  %v264_v44 = vld [vmem:[%s4501_s17 + $0x1a8] sm:$0xff] }
 0x139   : > { %v2109_v14 = vand.u32 2147483648, %v5860_v45  ;;  %v2091_v15 = vsel %vm5898_vm0, %v4113_v42, %v2087_v4  ;;  %v1156_v26 = vmul.f32 %v5892_v10, %v5892_v10  ;;  %v2100_v8 = vsub.f32 1.0, %v2099_v17 }
 0x13a   : > { %vm2104_vm2 = vweird.f32 %v4117_v3  ;;  %v3585_v22 = vmul.f32 %v3376_v21, %v1025_v57  ;;  %v2096_v28 = vsel %vm5886_vm15, %v2095_v6, %v2091_v15  ;;  %vm5916_vm3 = vcmp.eq.f32.partialorder %v2107_v13, 8.507059e+37  ;;  %v521_v13 = vld [vmem:[%s4507_s20 + $0x1b0] sm:$0xff] }
 0x13b   : > { %v5920_v32 = vmul.f32 %v646_v50, %v390_v5  ;;  %v2097_v31 = vmul.f32 %v2096_v28, %v1155_v2  ;;  %v2101_v47 = vmul.f32 %v4117_v3, %v2100_v8  ;;  %v5922_v38 = vmul.f32 0.5, %v773_v12  ;;  %vm5928_vm4 = vmor %vm2103_vm1, %vm2104_vm2 }
 0x13c   : > { %v391_v30 = vmax.f32 %v263_v24, 1e-12  ;;  %v4121_v51 = vpop.eup %4120  ;;  %3714 = vst.msk [vmem:[%s4640_s23 + $0x170] sm:$0xff] %vm3667_vm14, %v3585_v22  ;;  %v2110_v29 = vor.u32 1.1754944e-38, %v2109_v14  ;;  %v2122_v40 = vand.u32 2147483647, %v5890_v7  ;;  %v774_v19 = vadd.f32 %v646_v50, %v390_v5 }
 0x13d   : > { %4124 = vrcp.f32 %v5920_v32  ;;  %v647_v33 = vmax.f32 %v519_v25, 1e-12  ;;  %v4123_v20 = vpop.eup %4122  ;;  %v2102_v34 = vadd.f32 %v4117_v3, %v2101_v47  ;;  %v2114_v43 = vmul.f32 %v4121_v51, %v5890_v7  ;;  %v265_v5 = vld [vmem:[%s4501_s17 + $0x1b0] sm:$0xff] }
 0x13e   : > { %4126 = vlog2.f32 %v2097_v31  ;;  %v3378_v49 = vmul.f32 0.6931472, %v4123_v20  ;;  %v1027_v45 = vmul.f32 0.5, %v5862_v48  ;;  %vm2118_vm5 = vweird.f32 %v5890_v7 }
 0x13f   : > { %v2124_v41 = vand.u32 2147483648, %v5890_v7  ;;  %v2106_v42 = vsel %vm5928_vm4, %v4117_v3, %v2102_v34  ;;  %v1157_v52 = vmul.f32 %v5922_v38, %v5922_v38  ;;  %v2115_v35 = vsub.f32 1.0, %v2114_v43 }
 0x140   : > { %vm2119_vm6 = vweird.f32 %v4121_v51  ;;  %v3586_v46 = vmul.f32 %v3378_v49, %v1026_v18  ;;  %v2111_v54 = vsel %vm5916_vm3, %v2110_v29, %v2106_v42  ;;  %vm5946_vm7 = vcmp.eq.f32.partialorder %v2122_v40, 8.507059e+37  ;;  %v522_v40 = vld [vmem:[%s4507_s20 + $0x1b8] sm:$0xff] }
 0x141   : > { %v5950_v16 = vmul.f32 %v647_v33, %v391_v30  ;;  %v2112_v56 = vmul.f32 %v2111_v54, %v1156_v26  ;;  %v2116_v23 = vmul.f32 %v4121_v51, %v2115_v35  ;;  %v5952_v59 = vmul.f32 0.5, %v774_v19  ;;  %vm5958_vm8 = vmor %vm2118_vm5, %vm2119_vm6 }
 0x142   : > { %v392_v57 = vmax.f32 %v264_v44, 1e-12  ;;  %3715 = vst.msk [vmem:[%s4640_s23 + $0x178] sm:$0xff] %vm3667_vm14, %v3586_v46  ;;  %v2125_v36 = vor.u32 1.1754944e-38, %v2124_v41  ;;  %v2137_v2 = vand.u32 2147483647, %v5920_v32  ;;  %v775_v0 = vadd.f32 %v647_v33, %v391_v30 }
 0x143   : > { %v4125_v39 = vpop.eup %4124  ;;  %4128 = vrcp.f32 %v5950_v16  ;;  %v648_v55 = vmax.f32 %v520_v53, 1e-12  ;;  %v2117_v37 = vadd.f32 %v4121_v51, %v2116_v23  ;;  %v1028_v7 = vmul.f32 0.5, %v5892_v10  ;;  %v266_v30 = vld [vmem:[%s4501_s17 + $0x1b8] sm:$0xff] }
 0x144   : > { %v4127_v58 = vpop.eup %4126  ;;  %4130 = vlog2.f32 %v2112_v56  ;;  %v2129_v27 = vmul.f32 %v4125_v39, %v5920_v32  ;;  %vm2133_vm9 = vweird.f32 %v5920_v32  ;;  %v2139_v61 = vand.u32 2147483648, %v5920_v32 }
 0x145   : > { %v3380_v9 = vmul.f32 0.6931472, %v4127_v58  ;;  %v2121_v3 = vsel %vm5958_vm8, %v4121_v51, %v2117_v37  ;;  %v1158_v11 = vmul.f32 %v5952_v59, %v5952_v59  ;;  %vm2134_vm10 = vweird.f32 %v4125_v39 }
 0x146   : > { %v2130_v6 = vsub.f32 1.0, %v2129_v27  ;;  %v2126_v1 = vsel %vm5946_vm7, %v2125_v36, %v2121_v3  ;;  %vm5976_vm11 = vcmp.eq.f32.partialorder %v2137_v2, 8.507059e+37  ;;  %v5980_v4 = vmul.f32 %v648_v55, %v392_v57  ;;  %vm5988_vm12 = vmor %vm2133_vm9, %vm2134_vm10  ;;  %v523_v2 = vld [vmem:[%s4507_s20 + $0x1c0] sm:$0xff] }
 0x147   : > { %v3587_v50 = vmul.f32 %v3380_v9, %v1027_v45  ;;  %v2127_v17 = vmul.f32 %v2126_v1, %v1157_v52  ;;  %v5982_v21 = vmul.f32 0.5, %v775_v0  ;;  %v393_v18 = vmax.f32 %v265_v5, 1e-12 }
 0x148   : > { %v2131_v12 = vmul.f32 %v4125_v39, %v2130_v6  ;;  %v2140_v15 = vor.u32 1.1754944e-38, %v2139_v61  ;;  %v2152_v26 = vand.u32 2147483647, %v5950_v16  ;;  %4132 = vrcp.f32 %v5980_v4 }
 0x149   : > { %v4129_v14 = vpop.eup %4128  ;;  %3716 = vst.msk [vmem:[%s4640_s23 + $0x180] sm:$0xff] %vm3667_vm14, %v3587_v50  ;;  %v649_v8 = vmax.f32 %v521_v13, 1e-12  ;;  %4134 = vlog2.f32 %v2127_v17  ;;  %v776_v63 = vadd.f32 %v648_v55, %v392_v57  ;;  %v1029_v32 = vmul.f32 0.5, %v5922_v38  ;;  %v267_v57 = vld [vmem:[%s4501_s17 + $0x1c0] sm:$0xff] }
 0x14a   : > { %v4131_v25 = vpop.eup %4130  ;;  %v2132_v22 = vadd.f32 %v4125_v39, %v2131_v12  ;;  %v2144_v28 = vmul.f32 %v4129_v14, %v5950_v16  ;;  %vm2148_vm13 = vweird.f32 %v5950_v16  ;;  %v2154_v47 = vand.u32 2147483648, %v5950_v16 }
 0x14b   : > { %v3382_v31 = vmul.f32 0.6931472, %v4131_v25  ;;  %v1159_v62 = vmul.f32 %v5982_v21, %v5982_v21  ;;  %vm2149_vm15 = vweird.f32 %v4129_v14  ;;  %vm6006_vm0 = vcmp.eq.f32.partialorder %v2152_v26, 8.507059e+37  ;;  %v524_v26 = vld [vmem:[%s4507_s20 + $0x1c8] sm:$0xff] }
 0x14c   : > { %v2136_v51 = vsel %vm5988_vm12, %v4125_v39, %v2132_v22  ;;  %v2145_v29 = vsub.f32 1.0, %v2144_v28  ;;  %v6010_v34 = vmul.f32 %v649_v8, %v393_v18  ;;  %v6012_v49 = vmul.f32 0.5, %v776_v63  ;;  %vm6018_vm1 = vmor %vm2148_vm13, %vm2149_vm15 }
 0x14d   : > { %v3588_v33 = vmul.f32 %v3382_v31, %v1028_v7  ;;  %v2141_v20 = vsel %vm5976_vm11, %v2140_v15, %v2136_v51  ;;  %v394_v45 = vmax.f32 %v266_v30, 1e-12  ;;  %v2155_v42 = vor.u32 1.1754944e-38, %v2154_v47 }
 0x14e   : > { %v2142_v43 = vmul.f32 %v2141_v20, %v1158_v11  ;;  %v2146_v19 = vmul.f32 %v4129_v14, %v2145_v29  ;;  %v4133_v41 = vpop.eup %4132  ;;  %v2167_v52 = vand.u32 2147483647, %v5980_v4  ;;  %4136 = vrcp.f32 %v6010_v34 }
 0x14f   : > { %3717 = vst.msk [vmem:[%s4640_s23 + $0x188] sm:$0xff] %vm3667_vm14, %v3588_v33  ;;  %v650_v35 = vmax.f32 %v522_v40, 1e-12  ;;  %v4135_v53 = vpop.eup %4134  ;;  %v2159_v54 = vmul.f32 %v4133_v41, %v5980_v4  ;;  %v777_v48 = vadd.f32 %v649_v8, %v393_v18  ;;  %v1030_v16 = vmul.f32 0.5, %v5952_v59  ;;  %v268_v18 = vld [vmem:[%s4501_s17 + $0x1c8] sm:$0xff] }
 0x150   : > { %4138 = vlog2.f32 %v2142_v43  ;;  %v2147_v46 = vadd.f32 %v4129_v14, %v2146_v19  ;;  %v3384_v56 = vmul.f32 0.6931472, %v4135_v53  ;;  %vm2163_vm2 = vweird.f32 %v5980_v4 }
 0x151   : > { %v2169_v23 = vand.u32 2147483648, %v5980_v4  ;;  %v1160_v60 = vmul.f32 %v6012_v49, %v6012_v49  ;;  %v2160_v36 = vsub.f32 1.0, %v2159_v54  ;;  %vm2164_vm3 = vweird.f32 %v4133_v41 }
 0x152   : > { %v2151_v39 = vsel %vm6018_vm1, %v4129_v14, %v2147_v46  ;;  %v3589_v55 = vmul.f32 %v3384_v56, %v1029_v32  ;;  %vm6036_vm4 = vcmp.eq.f32.partialorder %v2167_v52, 8.507059e+37  ;;  %v6040_v37 = vmul.f32 %v650_v35, %v394_v45  ;;  %vm6048_vm5 = vmor %vm2163_vm2, %vm2164_vm3  ;;  %v525_v52 = vld [vmem:[%s4507_s20 + $0x1d0] sm:$0xff] }
 0x153   : > { %v2156_v58 = vsel %vm6006_vm0, %v2155_v42, %v2151_v39  ;;  %v2161_v0 = vmul.f32 %v4133_v41, %v2160_v36  ;;  %v6042_v9 = vmul.f32 0.5, %v777_v48  ;;  %v395_v7 = vmax.f32 %v267_v57, 1e-12 }
 0x154   : > { %v2157_v27 = vmul.f32 %v2156_v58, %v1159_v62  ;;  %v4137_v61 = vpop.eup %4136  ;;  %3718 = vst.msk [vmem:[%s4640_s23 + $0x190] sm:$0xff] %vm3667_vm14, %v3589_v55  ;;  %v2170_v3 = vor.u32 1.1754944e-38, %v2169_v23  ;;  %v2182_v11 = vand.u32 2147483647, %v6010_v34  ;;  %4140 = vrcp.f32 %v6040_v37 }
 0x155   : > { %v651_v6 = vmax.f32 %v523_v2, 1e-12  ;;  %v2162_v50 = vadd.f32 %v4133_v41, %v2161_v0  ;;  %v2174_v1 = vmul.f32 %v4137_v61, %v6010_v34  ;;  %v778_v10 = vadd.f32 %v650_v35, %v394_v45  ;;  %v269_v45 = vld [vmem:[%s4501_s17 + $0x1d0] sm:$0xff] }
 0x156   : > { %v4139_v13 = vpop.eup %4138  ;;  %4142 = vlog2.f32 %v2157_v27  ;;  %v1031_v4 = vmul.f32 0.5, %v5982_v21  ;;  %vm2178_vm6 = vweird.f32 %v6010_v34  ;;  %v2184_v12 = vand.u32 2147483648, %v6010_v34 }
 0x157   : > { %v3386_v17 = vmul.f32 0.6931472, %v4139_v13  ;;  %v2166_v14 = vsel %vm6048_vm5, %v4133_v41, %v2162_v50  ;;  %v1161_v24 = vmul.f32 %v6042_v9, %v6042_v9  ;;  %v2175_v15 = vsub.f32 1.0, %v2174_v1 }
 0x158   : > { %vm2179_vm7 = vweird.f32 %v4137_v61  ;;  %v2171_v25 = vsel %vm6036_vm4, %v2170_v3, %v2166_v14  ;;  %vm6066_vm8 = vcmp.eq.f32.partialorder %v2182_v11, 8.507059e+37  ;;  %v6070_v22 = vmul.f32 %v651_v6, %v395_v7  ;;  %v526_v11 = vld [vmem:[%s4507_s20 + $0x1d8] sm:$0xff] }
 0x159   : > { %v3590_v8 = vmul.f32 %v3386_v17, %v1030_v16  ;;  %v2172_v28 = vmul.f32 %v2171_v25, %v1160_v60  ;;  %v2176_v63 = vmul.f32 %v4137_v61, %v2175_v15  ;;  %v6072_v31 = vmul.f32 0.5, %v778_v10  ;;  %vm6078_vm9 = vmor %vm2178_vm6, %vm2179_vm7 }
 0x15a   : > { %v396_v32 = vmax.f32 %v268_v18, 1e-12  ;;  %v4141_v47 = vpop.eup %4140  ;;  %v2185_v51 = vor.u32 1.1754944e-38, %v2184_v12  ;;  %v2197_v62 = vand.u32 2147483647, %v6040_v37  ;;  %4144 = vrcp.f32 %v6070_v22 }
 0x15b   : > { %3719 = vst.msk [vmem:[%s4640_s23 + $0x198] sm:$0xff] %vm3667_vm14, %v3590_v8  ;;  %v652_v29 = vmax.f32 %v524_v26, 1e-12  ;;  %4146 = vlog2.f32 %v2172_v28  ;;  %v2177_v33 = vadd.f32 %v4137_v61, %v2176_v63  ;;  %v2189_v20 = vmul.f32 %v4141_v47, %v6040_v37 }
 0x15c   : > { %v4143_v40 = vpop.eup %4142  ;;  %v779_v38 = vadd.f32 %v651_v6, %v395_v7  ;;  %v1032_v34 = vmul.f32 0.5, %v6012_v49  ;;  %vm2193_vm10 = vweird.f32 %v6040_v37  ;;  %v2199_v19 = vand.u32 2147483648, %v6040_v37  ;;  %v270_v7 = vld [vmem:[%s4501_s17 + $0x1d8] sm:$0xff] }
 0x15d   : > { %v3388_v43 = vmul.f32 0.6931472, %v4143_v40  ;;  %v2181_v41 = vsel %vm6078_vm9, %v4137_v61, %v2177_v33  ;;  %v1162_v44 = vmul.f32 %v6072_v31, %v6072_v31  ;;  %v2190_v42 = vsub.f32 1.0, %v2189_v20 }
 0x15e   : > { %vm2194_vm11 = vweird.f32 %v4141_v47  ;;  %v2186_v53 = vsel %vm6066_vm8, %v2185_v51, %v2181_v41  ;;  %vm6096_vm12 = vcmp.eq.f32.partialorder %v2197_v62, 8.507059e+37  ;;  %v6100_v46 = vmul.f32 %v652_v29, %v396_v32  ;;  %v527_v62 = vld [vmem:[%s4507_s20 + $0x1e0] sm:$0xff] }
 0x15f   : > { %v3591_v35 = vmul.f32 %v3388_v43, %v1031_v4  ;;  %v2187_v54 = vmul.f32 %v2186_v53, %v1161_v24  ;;  %v2191_v48 = vmul.f32 %v4141_v47, %v2190_v42  ;;  %v6102_v56 = vmul.f32 0.5, %v779_v38  ;;  %vm6108_vm13 = vmor %vm2193_vm10, %vm2194_vm11 }
 0x160   : > { %v397_v16 = vmax.f32 %v269_v45, 1e-12  ;;  %v4145_v23 = vpop.eup %4144  ;;  %v2200_v39 = vor.u32 1.1754944e-38, %v2199_v19  ;;  %v2212_v60 = vand.u32 2147483647, %v6070_v22  ;;  %4148 = vrcp.f32 %v6100_v46 }
 0x161   : > { %3720 = vst.msk [vmem:[%s4640_s23 + $0x1a0] sm:$0xff] %vm3667_vm14, %v3591_v35  ;;  %v653_v36 = vmax.f32 %v525_v52, 1e-12  ;;  %v4147_v2 = vpop.eup %4146  ;;  %4150 = vlog2.f32 %v2187_v54  ;;  %v2192_v55 = vadd.f32 %v4141_v47, %v2191_v48  ;;  %v2204_v58 = vmul.f32 %v4145_v23, %v6070_v22 }
 0x162   : > { %v780_v59 = vadd.f32 %v652_v29, %v396_v32  ;;  %v3390_v27 = vmul.f32 0.6931472, %v4147_v2  ;;  %v1033_v37 = vmul.f32 0.5, %v6042_v9  ;;  %vm2208_vm15 = vweird.f32 %v6070_v22  ;;  %v271_v32 = vld [vmem:[%s4501_s17 + $0x1e0] sm:$0xff] }
 0x163   : > { %v2214_v0 = vand.u32 2147483648, %v6070_v22  ;;  %v2196_v61 = vsel %vm6108_vm13, %v4141_v47, %v2192_v55  ;;  %v1163_v5 = vmul.f32 %v6102_v56, %v6102_v56  ;;  %v2205_v3 = vsub.f32 1.0, %v2204_v58 }
 0x164   : > { %vm2209_vm0 = vweird.f32 %v4145_v23  ;;  %v3592_v6 = vmul.f32 %v3390_v27, %v1032_v34  ;;  %v2201_v13 = vsel %vm6096_vm12, %v2200_v39, %v2196_v61  ;;  %vm6126_vm1 = vcmp.eq.f32.partialorder %v2212_v60, 8.507059e+37  ;;  %v528_v60 = vld [vmem:[%s4507_s20 + $0x1e8] sm:$0xff] }
 0x165   : > { %v6130_v50 = vmul.f32 %v653_v36, %v397_v16  ;;  %v2202_v1 = vmul.f32 %v2201_v13, %v1162_v44  ;;  %v2206_v10 = vmul.f32 %v4145_v23, %v2205_v3  ;;  %v6132_v17 = vmul.f32 0.5, %v780_v59  ;;  %vm6138_vm2 = vmor %vm2208_vm15, %vm2209_vm0 }
 0x166   : > { %v398_v4 = vmax.f32 %v270_v7, 1e-12  ;;  %v4149_v12 = vpop.eup %4148  ;;  %3721 = vst.msk [vmem:[%s4640_s23 + $0x1a8] sm:$0xff] %vm3667_vm14, %v3592_v6  ;;  %v2215_v14 = vor.u32 1.1754944e-38, %v2214_v0  ;;  %v2227_v24 = vand.u32 2147483647, %v6100_v46  ;;  %v781_v21 = vadd.f32 %v653_v36, %v397_v16 }
 0x167   : > { %4152 = vrcp.f32 %v6130_v50  ;;  %v654_v15 = vmax.f32 %v526_v11, 1e-12  ;;  %v4151_v26 = vpop.eup %4150  ;;  %v2207_v8 = vadd.f32 %v4145_v23, %v2206_v10  ;;  %v2219_v25 = vmul.f32 %v4149_v12, %v6100_v46  ;;  %v272_v16 = vld [vmem:[%s4501_s17 + $0x1e8] sm:$0xff] }
 0x168   : > { %4154 = vlog2.f32 %v2202_v1  ;;  %v3392_v28 = vmul.f32 0.6931472, %v4151_v26  ;;  %v1034_v22 = vmul.f32 0.5, %v6072_v31  ;;  %vm2223_vm3 = vweird.f32 %v6100_v46 }
 0x169   : > { %v2229_v63 = vand.u32 2147483648, %v6100_v46  ;;  %v2211_v47 = vsel %vm6138_vm2, %v4145_v23, %v2207_v8  ;;  %v1164_v30 = vmul.f32 %v6132_v17, %v6132_v17  ;;  %v2220_v51 = vsub.f32 1.0, %v2219_v25 }
 0x16a   : > { %vm2224_vm4 = vweird.f32 %v4149_v12  ;;  %v3593_v29 = vmul.f32 %v3392_v28, %v1033_v37  ;;  %v2216_v40 = vsel %vm6126_vm1, %v2215_v14, %v2211_v47  ;;  %vm6156_vm5 = vcmp.eq.f32.partialorder %v2227_v24, 8.507059e+37  ;;  %v529_v24 = vld [vmem:[%s4507_s20 + $0x1f0] sm:$0xff] }
 0x16b   : > { %v6160_v33 = vmul.f32 %v654_v15, %v398_v4  ;;  %v2217_v20 = vmul.f32 %v2216_v40, %v1163_v5  ;;  %v2221_v38 = vmul.f32 %v4149_v12, %v2220_v51  ;;  %v6162_v43 = vmul.f32 0.5, %v781_v21  ;;  %vm6168_vm6 = vmor %vm2223_vm3, %vm2224_vm4 }
 0x16c   : > { %v399_v34 = vmax.f32 %v271_v32, 1e-12  ;;  %3722 = vst.msk [vmem:[%s4640_s23 + $0x1b0] sm:$0xff] %vm3667_vm14, %v3593_v29  ;;  %v2230_v41 = vor.u32 1.1754944e-38, %v2229_v63  ;;  %v2242_v44 = vand.u32 2147483647, %v6130_v50  ;;  %v782_v49 = vadd.f32 %v654_v15, %v398_v4 }
 0x16d   : > { %v4153_v19 = vpop.eup %4152  ;;  %4156 = vrcp.f32 %v6160_v33  ;;  %v655_v42 = vmax.f32 %v527_v62, 1e-12  ;;  %v2222_v35 = vadd.f32 %v4149_v12, %v2221_v38  ;;  %v1035_v46 = vmul.f32 0.5, %v6102_v56  ;;  %v273_v4 = vld [vmem:[%s4501_s17 + $0x1f0] sm:$0xff] }
 0x16e   : > { %v4155_v52 = vpop.eup %4154  ;;  %4158 = vlog2.f32 %v2217_v20  ;;  %v2234_v53 = vmul.f32 %v4153_v19, %v6130_v50  ;;  %vm2238_vm7 = vweird.f32 %v6130_v50  ;;  %v2244_v48 = vand.u32 2147483648, %v6130_v50 }
 0x16f   : > { %v3394_v54 = vmul.f32 0.6931472, %v4155_v52  ;;  %v2226_v23 = vsel %vm6168_vm6, %v4149_v12, %v2222_v35  ;;  %v1165_v57 = vmul.f32 %v6162_v43, %v6162_v43  ;;  %vm2239_vm8 = vweird.f32 %v4153_v19 }
 0x170   : > { %v2235_v39 = vsub.f32 1.0, %v2234_v53  ;;  %v2231_v2 = vsel %vm6156_vm5, %v2230_v41, %v2226_v23  ;;  %vm6186_vm9 = vcmp.eq.f32.partialorder %v2242_v44, 8.507059e+37  ;;  %v6190_v55 = vmul.f32 %v655_v42, %v399_v34  ;;  %vm6198_vm10 = vmor %vm2238_vm7, %vm2239_vm8  ;;  %v530_v44 = vld [vmem:[%s4507_s20 + $0x1f8] sm:$0xff] }
 0x171   : > { %v3594_v36 = vmul.f32 %v3394_v54, %v1034_v22  ;;  %v2232_v58 = vmul.f32 %v2231_v2, %v1164_v30  ;;  %v6192_v27 = vmul.f32 0.5, %v782_v49  ;;  %v400_v37 = vmax.f32 %v272_v16, 1e-12 }
 0x172   : > { %v2236_v59 = vmul.f32 %v4153_v19, %v2235_v39  ;;  %v2245_v61 = vor.u32 1.1754944e-38, %v2244_v48  ;;  %v2257_v5 = vand.u32 2147483647, %v6160_v33  ;;  %4160 = vrcp.f32 %v6190_v55 }
 0x173   : > { %v4157_v0 = vpop.eup %4156  ;;  %3723 = vst.msk [vmem:[%s4640_s23 + $0x1b8] sm:$0xff] %vm3667_vm14, %v3594_v36  ;;  %v656_v3 = vmax.f32 %v528_v60, 1e-12  ;;  %4162 = vlog2.f32 %v2232_v58  ;;  %v783_v9 = vadd.f32 %v655_v42, %v399_v34  ;;  %v1036_v50 = vmul.f32 0.5, %v6132_v17  ;;  %v274_v34 = vld [vmem:[%s4501_s17 + $0x1f8] sm:$0xff] }
 0x174   : > { %v4159_v11 = vpop.eup %4158  ;;  %v2237_v6 = vadd.f32 %v4153_v19, %v2236_v59  ;;  %v2249_v13 = vmul.f32 %v4157_v0, %v6160_v33  ;;  %vm2253_vm11 = vweird.f32 %v6160_v33  ;;  %v2259_v10 = vand.u32 2147483648, %v6160_v33 }
 0x175   : > { %v3396_v1 = vmul.f32 0.6931472, %v4159_v11  ;;  %v1166_v18 = vmul.f32 %v6192_v27, %v6192_v27  ;;  %vm2254_vm12 = vweird.f32 %v4157_v0  ;;  %vm6216_vm13 = vcmp.eq.f32.partialorder %v2257_v5, 8.507059e+37  ;;  %v531_v5 = vld [vmem:[%s4507_s20 + $0x200] sm:$0xff] }
 0x176   : > { %v2241_v12 = vsel %vm6198_vm10, %v4153_v19, %v2237_v6  ;;  %v2250_v14 = vsub.f32 1.0, %v2249_v13  ;;  %v6220_v8 = vmul.f32 %v656_v3, %v400_v37  ;;  %v6222_v28 = vmul.f32 0.5, %v783_v9  ;;  %vm6228_vm15 = vmor %vm2253_vm11, %vm2254_vm12 }
 0x177   : > { %v3595_v15 = vmul.f32 %v3396_v1, %v1035_v46  ;;  %v2246_v26 = vsel %vm6186_vm9, %v2245_v61, %v2241_v12  ;;  %v401_v22 = vmax.f32 %v273_v4, 1e-12  ;;  %v2260_v47 = vor.u32 1.1754944e-38, %v2259_v10 }
 0x178   : > { %v2247_v25 = vmul.f32 %v2246_v26, %v1165_v57  ;;  %v2251_v21 = vmul.f32 %v4157_v0, %v2250_v14  ;;  %v4161_v63 = vpop.eup %4160  ;;  %v2272_v30 = vand.u32 2147483647, %v6190_v55  ;;  %4164 = vrcp.f32 %v6220_v8 }
 0x179   : > { %3724 = vst.msk [vmem:[%s4640_s23 + $0x1c0] sm:$0xff] %vm3667_vm14, %v3595_v15  ;;  %v657_v51 = vmax.f32 %v529_v24, 1e-12  ;;  %v4163_v62 = vpop.eup %4162  ;;  %v2264_v40 = vmul.f32 %v4161_v63, %v6190_v55  ;;  %v784_v31 = vadd.f32 %v656_v3, %v400_v37  ;;  %v1037_v33 = vmul.f32 0.5, %v6162_v43  ;;  %v275_v37 = vld [vmem:[%s4501_s17 + $0x200] sm:$0xff] }
 0x17a   : > { %4166 = vlog2.f32 %v2247_v25  ;;  %v2252_v29 = vadd.f32 %v4157_v0, %v2251_v21  ;;  %v3398_v20 = vmul.f32 0.6931472, %v4163_v62  ;;  %vm2268_vm0 = vweird.f32 %v6190_v55 }
 0x17b   : > { %v2274_v38 = vand.u32 2147483648, %v6190_v55  ;;  %v1167_v45 = vmul.f32 %v6222_v28, %v6222_v28  ;;  %v2265_v41 = vsub.f32 1.0, %v2264_v40  ;;  %vm2269_vm1 = vweird.f32 %v4161_v63 }
 0x17c   : > { %v2256_v19 = vsel %vm6228_vm15, %v4157_v0, %v2252_v29  ;;  %v3596_v42 = vmul.f32 %v3398_v20, %v1036_v50  ;;  %vm6246_vm2 = vcmp.eq.f32.partialorder %v2272_v30, 8.507059e+37  ;;  %v6250_v35 = vmul.f32 %v657_v51, %v401_v22  ;;  %vm6258_vm3 = vmor %vm2268_vm0, %vm2269_vm1  ;;  %v532_v30 = vld [vmem:[%s4507_s20 + $0x208] sm:$0xff] }
 0x17d   : > { %v2261_v52 = vsel %vm6216_vm13, %v2260_v47, %v2256_v19  ;;  %v2266_v49 = vmul.f32 %v4161_v63, %v2265_v41  ;;  %v6252_v54 = vmul.f32 0.5, %v784_v31  ;;  %v402_v46 = vmax.f32 %v274_v34, 1e-12 }
 0x17e   : > { %v2262_v53 = vmul.f32 %v2261_v52, %v1166_v18  ;;  %v4165_v48 = vpop.eup %4164  ;;  %3725 = vst.msk [vmem:[%s4640_s23 + $0x1c8] sm:$0xff] %vm3667_vm14, %v3596_v42  ;;  %v2275_v23 = vor.u32 1.1754944e-38, %v2274_v38  ;;  %v2287_v57 = vand.u32 2147483647, %v6220_v8  ;;  %4168 = vrcp.f32 %v6250_v35 }
 0x17f   : > { %v658_v39 = vmax.f32 %v530_v44, 1e-12  ;;  %v2267_v36 = vadd.f32 %v4161_v63, %v2266_v49  ;;  %v2279_v2 = vmul.f32 %v4165_v48, %v6220_v8  ;;  %v785_v56 = vadd.f32 %v657_v51, %v401_v22  ;;  %v276_v22 = vld [vmem:[%s4501_s17 + $0x208] sm:$0xff] }
 0x180   : > { %v4167_v60 = vpop.eup %4166  ;;  %4170 = vlog2.f32 %v2262_v53  ;;  %v1038_v55 = vmul.f32 0.5, %v6192_v27  ;;  %vm2283_vm4 = vweird.f32 %v6220_v8  ;;  %v2289_v59 = vand.u32 2147483648, %v6220_v8 }
 0x181   : > { %v3400_v58 = vmul.f32 0.6931472, %v4167_v60  ;;  %v2271_v0 = vsel %vm6258_vm3, %v4161_v63, %v2267_v36  ;;  %v1168_v7 = vmul.f32 %v6252_v54, %v6252_v54  ;;  %v2280_v61 = vsub.f32 1.0, %v2279_v2 }
 0x182   : > { %vm2284_vm5 = vweird.f32 %v4165_v48  ;;  %v2276_v11 = vsel %vm6246_vm2, %v2275_v23, %v2271_v0  ;;  %vm6276_vm6 = vcmp.eq.f32.partialorder %v2287_v57, 8.507059e+37  ;;  %v6280_v6 = vmul.f32 %v658_v39, %v402_v46  ;;  %v533_v57 = vld [vmem:[%s4507_s20 + $0x210] sm:$0xff] }
 0x183   : > { %v3597_v3 = vmul.f32 %v3400_v58, %v1037_v33  ;;  %v2277_v13 = vmul.f32 %v2276_v11, %v1167_v45  ;;  %v2281_v9 = vmul.f32 %v4165_v48, %v2280_v61  ;;  %v6282_v1 = vmul.f32 0.5, %v785_v56  ;;  %vm6288_vm7 = vmor %vm2283_vm4, %vm2284_vm5 }
 0x184   : > { %v403_v50 = vmax.f32 %v275_v37, 1e-12  ;;  %v4169_v10 = vpop.eup %4168  ;;  %v2290_v12 = vor.u32 1.1754944e-38, %v2289_v59  ;;  %v2302_v18 = vand.u32 2147483647, %v6250_v35  ;;  %4172 = vrcp.f32 %v6280_v6 }
 0x185   : > { %3726 = vst.msk [vmem:[%s4640_s23 + $0x1d0] sm:$0xff] %vm3667_vm14, %v3597_v3  ;;  %v659_v14 = vmax.f32 %v531_v5, 1e-12  ;;  %4174 = vlog2.f32 %v2277_v13  ;;  %v2282_v15 = vadd.f32 %v4165_v48, %v2281_v9  ;;  %v2294_v26 = vmul.f32 %v4169_v10, %v6250_v35 }
 0x186   : > { %v4171_v24 = vpop.eup %4170  ;;  %v786_v17 = vadd.f32 %v658_v39, %v402_v46  ;;  %v1039_v8 = vmul.f32 0.5, %v6222_v28  ;;  %vm2298_vm8 = vweird.f32 %v6250_v35  ;;  %v2304_v21 = vand.u32 2147483648, %v6250_v35  ;;  %v277_v46 = vld [vmem:[%s4501_s17 + $0x210] sm:$0xff] }
 0x187   : > { %v3402_v25 = vmul.f32 0.6931472, %v4171_v24  ;;  %v2286_v63 = vsel %vm6288_vm7, %v4165_v48, %v2282_v15  ;;  %v1169_v32 = vmul.f32 %v6282_v1, %v6282_v1  ;;  %v2295_v47 = vsub.f32 1.0, %v2294_v26 }
 0x188   : > { %vm2299_vm9 = vweird.f32 %v4169_v10  ;;  %v2291_v62 = vsel %vm6276_vm6, %v2290_v12, %v2286_v63  ;;  %vm6306_vm10 = vcmp.eq.f32.partialorder %v2302_v18, 8.507059e+37  ;;  %v6310_v29 = vmul.f32 %v659_v14, %v403_v50  ;;  %v534_v18 = vld [vmem:[%s4507_s20 + $0x218] sm:$0xff] }
 0x189   : > { %v3598_v51 = vmul.f32 %v3402_v25, %v1038_v55  ;;  %v2292_v40 = vmul.f32 %v2291_v62, %v1168_v7  ;;  %v2296_v31 = vmul.f32 %v4169_v10, %v2295_v47  ;;  %v6312_v20 = vmul.f32 0.5, %v786_v17  ;;  %vm6318_vm11 = vmor %vm2298_vm8, %vm2299_vm9 }
 0x18a   : > { %v404_v33 = vmax.f32 %v276_v22, 1e-12  ;;  %v4173_v38 = vpop.eup %4172  ;;  %v2305_v19 = vor.u32 1.1754944e-38, %v2304_v21  ;;  %v2317_v45 = vand.u32 2147483647, %v6280_v6  ;;  %4176 = vrcp.f32 %v6310_v29 }
 0x18b   : > { %3727 = vst.msk [vmem:[%s4640_s23 + $0x1d8] sm:$0xff] %vm3667_vm14, %v3598_v51  ;;  %v660_v41 = vmax.f32 %v532_v30, 1e-12  ;;  %v4175_v44 = vpop.eup %4174  ;;  %4178 = vlog2.f32 %v2292_v40  ;;  %v2297_v42 = vadd.f32 %v4169_v10, %v2296_v31  ;;  %v2309_v52 = vmul.f32 %v4173_v38, %v6280_v6 }
 0x18c   : > { %v787_v43 = vadd.f32 %v659_v14, %v403_v50  ;;  %v3404_v53 = vmul.f32 0.6931472, %v4175_v44  ;;  %v1040_v35 = vmul.f32 0.5, %v6252_v54  ;;  %vm2313_vm12 = vweird.f32 %v6280_v6  ;;  %v278_v50 = vld [vmem:[%s4501_s17 + $0x218] sm:$0xff] }
 0x18d   : > { %v2319_v49 = vand.u32 2147483648, %v6280_v6  ;;  %v2301_v48 = vsel %vm6318_vm11, %v4169_v10, %v2297_v42  ;;  %v1170_v16 = vmul.f32 %v6312_v20, %v6312_v20  ;;  %v2310_v23 = vsub.f32 1.0, %v2309_v52 }
 0x18e   : > { %vm2314_vm13 = vweird.f32 %v4173_v38  ;;  %v3599_v39 = vmul.f32 %v3404_v53, %v1039_v8  ;;  %v2306_v60 = vsel %vm6306_vm10, %v2305_v19, %v2301_v48  ;;  %vm6336_vm15 = vcmp.eq.f32.partialorder %v2317_v45, 8.507059e+37  ;;  %v535_v45 = vld [vmem:[%s4507_s20 + $0x220] sm:$0xff] }
 0x18f   : > { %v6340_v36 = vmul.f32 %v660_v41, %v404_v33  ;;  %v2307_v2 = vmul.f32 %v2306_v60, %v1169_v32  ;;  %v2311_v56 = vmul.f32 %v4173_v38, %v2310_v23  ;;  %v6342_v58 = vmul.f32 0.5, %v787_v43  ;;  %vm6348_vm0 = vmor %vm2313_vm12, %vm2314_vm13 }
 0x190   : > { %v405_v55 = vmax.f32 %v277_v46, 1e-12  ;;  %v4177_v59 = vpop.eup %4176  ;;  %3728 = vst.msk [vmem:[%s4640_s23 + $0x1e0] sm:$0xff] %vm3667_vm14, %v3599_v39  ;;  %v2320_v0 = vor.u32 1.1754944e-38, %v2319_v49  ;;  %v2332_v7 = vand.u32 2147483647, %v6310_v29  ;;  %v788_v27 = vadd.f32 %v660_v41, %v404_v33 }
 0x191   : > { %4180 = vrcp.f32 %v6340_v36  ;;  %v661_v61 = vmax.f32 %v533_v57, 1e-12  ;;  %v4179_v5 = vpop.eup %4178  ;;  %v2312_v3 = vadd.f32 %v4173_v38, %v2311_v56  ;;  %v2324_v11 = vmul.f32 %v4177_v59, %v6310_v29  ;;  %v279_v33 = vld [vmem:[%s4501_s17 + $0x220] sm:$0xff] }
 0x192   : > { %4182 = vlog2.f32 %v2307_v2  ;;  %v3406_v13 = vmul.f32 0.6931472, %v4179_v5  ;;  %v1041_v6 = vmul.f32 0.5, %v6282_v1  ;;  %vm2328_vm1 = vweird.f32 %v6310_v29 }
 0x193   : > { %v2334_v9 = vand.u32 2147483648, %v6310_v29  ;;  %v2316_v10 = vsel %vm6348_vm0, %v4173_v38, %v2312_v3  ;;  %v1171_v4 = vmul.f32 %v6342_v58, %v6342_v58  ;;  %v2325_v12 = vsub.f32 1.0, %v2324_v11 }
 0x194   : > { %vm2329_vm2 = vweird.f32 %v4177_v59  ;;  %v3600_v14 = vmul.f32 %v3406_v13, %v1040_v35  ;;  %v2321_v24 = vsel %vm6336_vm15, %v2320_v0, %v2316_v10  ;;  %vm6366_vm3 = vcmp.eq.f32.partialorder %v2332_v7, 8.507059e+37  ;;  %v536_v7 = vld [vmem:[%s4507_s20 + $0x228] sm:$0xff] }
 0x195   : > { %v6370_v15 = vmul.f32 %v661_v61, %v405_v55  ;;  %v2322_v26 = vmul.f32 %v2321_v24, %v1170_v16  ;;  %v2326_v17 = vmul.f32 %v4177_v59, %v2325_v12  ;;  %v6372_v25 = vmul.f32 0.5, %v788_v27  ;;  %vm6378_vm4 = vmor %vm2328_vm1, %vm2329_vm2 }
 0x196   : > { %v406_v8 = vmax.f32 %v278_v50, 1e-12  ;;  %3729 = vst.msk [vmem:[%s4640_s23 + $0x1e8] sm:$0xff] %vm3667_vm14, %v3600_v14  ;;  %v2335_v63 = vor.u32 1.1754944e-38, %v2334_v9  ;;  %v2347_v32 = vand.u32 2147483647, %v6340_v36  ;;  %v789_v28 = vadd.f32 %v661_v61, %v405_v55 }
 0x197   : > { %v4181_v21 = vpop.eup %4180  ;;  %4184 = vrcp.f32 %v6370_v15  ;;  %v662_v47 = vmax.f32 %v534_v18, 1e-12  ;;  %v2327_v51 = vadd.f32 %v4177_v59, %v2326_v17  ;;  %v1042_v29 = vmul.f32 0.5, %v6312_v20  ;;  %v280_v55 = vld [vmem:[%s4501_s17 + $0x228] sm:$0xff] }
 0x198   : > { %v4183_v30 = vpop.eup %4182  ;;  %4186 = vlog2.f32 %v2322_v26  ;;  %v2339_v62 = vmul.f32 %v4181_v21, %v6340_v36  ;;  %vm2343_vm5 = vweird.f32 %v6340_v36  ;;  %v2349_v31 = vand.u32 2147483648, %v6340_v36 }
 0x199   : > { %v3408_v40 = vmul.f32 0.6931472, %v4183_v30  ;;  %v2331_v38 = vsel %vm6378_vm4, %v4177_v59, %v2327_v51  ;;  %v1172_v34 = vmul.f32 %v6372_v25, %v6372_v25  ;;  %vm2344_vm6 = vweird.f32 %v4181_v21 }
 0x19a   : > { %v2340_v19 = vsub.f32 1.0, %v2339_v62  ;;  %v2336_v44 = vsel %vm6366_vm3, %v2335_v63, %v2331_v38  ;;  %vm6396_vm7 = vcmp.eq.f32.partialorder %v2347_v32, 8.507059e+37  ;;  %v6400_v42 = vmul.f32 %v662_v47, %v406_v8  ;;  %vm6408_vm8 = vmor %vm2343_vm5, %vm2344_vm6  ;;  %v537_v32 = vld [vmem:[%s4507_s20 + $0x230] sm:$0xff] }
 0x19b   : > { %v3601_v41 = vmul.f32 %v3408_v40, %v1041_v6  ;;  %v2337_v52 = vmul.f32 %v2336_v44, %v1171_v4  ;;  %v6402_v53 = vmul.f32 0.5, %v789_v28  ;;  %v407_v35 = vmax.f32 %v279_v33, 1e-12 }
 0x19c   : > { %v2341_v43 = vmul.f32 %v4181_v21, %v2340_v19  ;;  %v2350_v48 = vor.u32 1.1754944e-38, %v2349_v31  ;;  %v2362_v16 = vand.u32 2147483647, %v6370_v15  ;;  %4188 = vrcp.f32 %v6400_v42 }
 0x19d   : > { %v4185_v49 = vpop.eup %4184  ;;  %3730 = vst.msk [vmem:[%s4640_s23 + $0x1f0] sm:$0xff] %vm3667_vm14, %v3601_v41  ;;  %v663_v23 = vmax.f32 %v535_v45, 1e-12  ;;  %4190 = vlog2.f32 %v2337_v52  ;;  %v790_v54 = vadd.f32 %v662_v47, %v406_v8  ;;  %v1043_v36 = vmul.f32 0.5, %v6342_v58  ;;  %v281_v8 = vld [vmem:[%s4501_s17 + $0x230] sm:$0xff] }
 0x19e   : > { %v4187_v57 = vpop.eup %4186  ;;  %v2342_v39 = vadd.f32 %v4181_v21, %v2341_v43  ;;  %v2354_v60 = vmul.f32 %v4185_v49, %v6370_v15  ;;  %vm2358_vm9 = vweird.f32 %v6370_v15  ;;  %v2364_v56 = vand.u32 2147483648, %v6370_v15 }
 0x19f   : > { %v3410_v2 = vmul.f32 0.6931472, %v4187_v57  ;;  %v1173_v37 = vmul.f32 %v6402_v53, %v6402_v53  ;;  %vm2359_vm10 = vweird.f32 %v4185_v49  ;;  %vm6426_vm11 = vcmp.eq.f32.partialorder %v2362_v16, 8.507059e+37  ;;  %v538_v16 = vld [vmem:[%s4507_s20 + $0x238] sm:$0xff] }
 0x1a0   : > { %v2346_v59 = vsel %vm6408_vm8, %v4181_v21, %v2342_v39  ;;  %v2355_v0 = vsub.f32 1.0, %v2354_v60  ;;  %v6430_v3 = vmul.f32 %v663_v23, %v407_v35  ;;  %v6432_v13 = vmul.f32 0.5, %v790_v54  ;;  %vm6438_vm12 = vmor %vm2358_vm9, %vm2359_vm10 }
 0x1a1   : > { %v3602_v61 = vmul.f32 %v3410_v2, %v1042_v29  ;;  %v2351_v5 = vsel %vm6396_vm7, %v2350_v48, %v2346_v59  ;;  %v408_v6 = vmax.f32 %v280_v55, 1e-12  ;;  %v2365_v10 = vor.u32 1.1754944e-38, %v2364_v56 }
 0x1a2   : > { %v2352_v11 = vmul.f32 %v2351_v5, %v1172_v34  ;;  %v2356_v27 = vmul.f32 %v4185_v49, %v2355_v0  ;;  %v4189_v9 = vpop.eup %4188  ;;  %v2377_v4 = vand.u32 2147483647, %v6400_v42  ;;  %4192 = vrcp.f32 %v6430_v3 }
 0x1a3   : > { %3731 = vst.msk [vmem:[%s4640_s23 + $0x1f8] sm:$0xff] %vm3667_vm14, %v3602_v61  ;;  %v664_v12 = vmax.f32 %v536_v7, 1e-12  ;;  %v4191_v18 = vpop.eup %4190  ;;  %v2369_v24 = vmul.f32 %v4189_v9, %v6400_v42  ;;  %v791_v1 = vadd.f32 %v663_v23, %v407_v35  ;;  %v1044_v15 = vmul.f32 0.5, %v6372_v25  ;;  %v282_v35 = vld [vmem:[%s4501_s17 + $0x238] sm:$0xff] }
 0x1a4   : > { %4194 = vlog2.f32 %v2352_v11  ;;  %v2357_v14 = vadd.f32 %v4185_v49, %v2356_v27  ;;  %v3412_v26 = vmul.f32 0.6931472, %v4191_v18  ;;  %vm2373_vm13 = vweird.f32 %v6400_v42 }
 0x1a5   : > { %v2379_v17 = vand.u32 2147483648, %v6400_v42  ;;  %v1174_v22 = vmul.f32 %v6432_v13, %v6432_v13  ;;  %v2370_v63 = vsub.f32 1.0, %v2369_v24  ;;  %vm2374_vm15 = vweird.f32 %v4189_v9 }
 0x1a6   : > { %v2361_v21 = vsel %vm6438_vm12, %v4185_v49, %v2357_v14  ;;  %v3603_v47 = vmul.f32 %v3412_v26, %v1043_v36  ;;  %vm6456_vm0 = vcmp.eq.f32.partialorder %v2377_v4, 8.507059e+37  ;;  %v6460_v51 = vmul.f32 %v664_v12, %v408_v6  ;;  %vm6468_vm1 = vmor %vm2373_vm13, %vm2374_vm15  ;;  %v539_v4 = vld [vmem:[%s4507_s20 + $0x240] sm:$0xff] }
 0x1a7   : > { %v2366_v30 = vsel %vm6426_vm11, %v2365_v10, %v2361_v21  ;;  %v2371_v28 = vmul.f32 %v4189_v9, %v2370_v63  ;;  %v6462_v40 = vmul.f32 0.5, %v791_v1  ;;  %v409_v29 = vmax.f32 %v281_v8, 1e-12 }
 0x1a8   : > { %v2367_v62 = vmul.f32 %v2366_v30, %v1173_v37  ;;  %v4193_v31 = vpop.eup %4192  ;;  %3732 = vst.msk [vmem:[%s4640_s23 + $0x200] sm:$0xff] %vm3667_vm14, %v3603_v47  ;;  %v2380_v38 = vor.u32 1.1754944e-38, %v2379_v17  ;;  %v2392_v34 = vand.u32 2147483647, %v6430_v3  ;;  %4196 = vrcp.f32 %v6460_v51 }
 0x1a9   : > { %v665_v19 = vmax.f32 %v537_v32, 1e-12  ;;  %v2372_v41 = vadd.f32 %v4189_v9, %v2371_v28  ;;  %v2384_v44 = vmul.f32 %v4193_v31, %v6430_v3  ;;  %v792_v20 = vadd.f32 %v664_v12, %v408_v6  ;;  %v283_v6 = vld [vmem:[%s4501_s17 + $0x240] sm:$0xff] }
 0x1aa   : > { %v4195_v45 = vpop.eup %4194  ;;  %4198 = vlog2.f32 %v2367_v62  ;;  %v1045_v42 = vmul.f32 0.5, %v6402_v53  ;;  %vm2388_vm2 = vweird.f32 %v6430_v3  ;;  %v2394_v43 = vand.u32 2147483648, %v6430_v3 }
 0x1ab   : > { %v3414_v52 = vmul.f32 0.6931472, %v4195_v45  ;;  %v2376_v49 = vsel %vm6468_vm1, %v4189_v9, %v2372_v41  ;;  %v1175_v46 = vmul.f32 %v6462_v40, %v6462_v40  ;;  %v2385_v48 = vsub.f32 1.0, %v2384_v44 }
 0x1ac   : > { %vm2389_vm3 = vweird.f32 %v4193_v31  ;;  %v2381_v57 = vsel %vm6456_vm0, %v2380_v38, %v2376_v49  ;;  %vm6486_vm4 = vcmp.eq.f32.partialorder %v2392_v34, 8.507059e+37  ;;  %v6490_v39 = vmul.f32 %v665_v19, %v409_v29  ;;  %v540_v34 = vld [vmem:[%s4507_s20 + $0x248] sm:$0xff] }
 0x1ad   : > { %v3604_v23 = vmul.f32 %v3414_v52, %v1044_v15  ;;  %v2382_v60 = vmul.f32 %v2381_v57, %v1174_v22  ;;  %v2386_v54 = vmul.f32 %v4193_v31, %v2385_v48  ;;  %v6492_v2 = vmul.f32 0.5, %v792_v20  ;;  %vm6498_vm5 = vmor %vm2388_vm2, %vm2389_vm3 }
 0x1ae   : > { %v410_v36 = vmax.f32 %v282_v35, 1e-12  ;;  %v4197_v56 = vpop.eup %4196  ;;  %v2395_v59 = vor.u32 1.1754944e-38, %v2394_v43  ;;  %v2407_v37 = vand.u32 2147483647, %v6460_v51  ;;  %4200 = vrcp.f32 %v6490_v39 }
 0x1af   : > { %3733 = vst.msk [vmem:[%s4640_s23 + $0x208] sm:$0xff] %vm3667_vm14, %v3604_v23  ;;  %v666_v0 = vmax.f32 %v538_v16, 1e-12  ;;  %4202 = vlog2.f32 %v2382_v60  ;;  %v2387_v61 = vadd.f32 %v4193_v31, %v2386_v54  ;;  %v2399_v5 = vmul.f32 %v4197_v56, %v6460_v51 }
 0x1b0   : > { %v4199_v7 = vpop.eup %4198  ;;  %v793_v58 = vadd.f32 %v665_v19, %v409_v29  ;;  %v1046_v3 = vmul.f32 0.5, %v6432_v13  ;;  %vm2403_vm6 = vweird.f32 %v6460_v51  ;;  %v2409_v27 = vand.u32 2147483648, %v6460_v51  ;;  %v284_v29 = vld [vmem:[%s4501_s17 + $0x248] sm:$0xff] }
 0x1b1   : > { %v3416_v11 = vmul.f32 0.6931472, %v4199_v7  ;;  %v2391_v9 = vsel %vm6498_vm5, %v4193_v31, %v2387_v61  ;;  %v1176_v50 = vmul.f32 %v6492_v2, %v6492_v2  ;;  %v2400_v10 = vsub.f32 1.0, %v2399_v5 }
 0x1b2   : > { %vm2404_vm7 = vweird.f32 %v4197_v56  ;;  %v2396_v18 = vsel %vm6486_vm4, %v2395_v59, %v2391_v9  ;;  %vm6516_vm8 = vcmp.eq.f32.partialorder %v2407_v37, 8.507059e+37  ;;  %v6520_v14 = vmul.f32 %v666_v0, %v410_v36  ;;  %v541_v37 = vld [vmem:[%s4507_s20 + $0x250] sm:$0xff] }
 0x1b3   : > { %v3605_v12 = vmul.f32 %v3416_v11, %v1045_v42  ;;  %v2397_v24 = vmul.f32 %v2396_v18, %v1175_v46  ;;  %v2401_v1 = vmul.f32 %v4197_v56, %v2400_v10  ;;  %v6522_v26 = vmul.f32 0.5, %v793_v58  ;;  %vm6528_vm9 = vmor %vm2403_vm6, %vm2404_vm7 }
 0x1b4   : > { %v411_v15 = vmax.f32 %v283_v6, 1e-12  ;;  %v4201_v17 = vpop.eup %4200  ;;  %v2410_v21 = vor.u32 1.1754944e-38, %v2409_v27  ;;  %v2422_v22 = vand.u32 2147483647, %v6490_v39  ;;  %4204 = vrcp.f32 %v6520_v14 }
 0x1b5   : > { %3734 = vst.msk [vmem:[%s4640_s23 + $0x210] sm:$0xff] %vm3667_vm14, %v3605_v12  ;;  %v667_v63 = vmax.f32 %v539_v4, 1e-12  ;;  %v4203_v32 = vpop.eup %4202  ;;  %4206 = vlog2.f32 %v2397_v24  ;;  %v2402_v47 = vadd.f32 %v4197_v56, %v2401_v1  ;;  %v2414_v30 = vmul.f32 %v4201_v17, %v6490_v39 }
 0x1b6   : > { %v794_v25 = vadd.f32 %v666_v0, %v410_v36  ;;  %v3418_v62 = vmul.f32 0.6931472, %v4203_v32  ;;  %v1047_v51 = vmul.f32 0.5, %v6462_v40  ;;  %vm2418_vm10 = vweird.f32 %v6490_v39  ;;  %v285_v36 = vld [vmem:[%s4501_s17 + $0x250] sm:$0xff] }
 0x1b7   : > { %v2424_v28 = vand.u32 2147483648, %v6490_v39  ;;  %v2406_v31 = vsel %vm6528_vm9, %v4197_v56, %v2402_v47  ;;  %v1177_v33 = vmul.f32 %v6522_v26, %v6522_v26  ;;  %v2415_v38 = vsub.f32 1.0, %v2414_v30 }
 0x1b8   : > { %vm2419_vm11 = vweird.f32 %v4201_v17  ;;  %v3606_v19 = vmul.f32 %v3418_v62, %v1046_v3  ;;  %v2411_v45 = vsel %vm6516_vm8, %v2410_v21, %v2406_v31  ;;  %vm6546_vm12 = vcmp.eq.f32.partialorder %v2422_v22, 8.507059e+37  ;;  %v542_v22 = vld [vmem:[%s4507_s20 + $0x258] sm:$0xff] }
 0x1b9   : > { %v6550_v41 = vmul.f32 %v667_v63, %v411_v15  ;;  %v2412_v44 = vmul.f32 %v2411_v45, %v1176_v50  ;;  %v2416_v20 = vmul.f32 %v4201_v17, %v2415_v38  ;;  %v6552_v52 = vmul.f32 0.5, %v794_v25  ;;  %vm6558_vm13 = vmor %vm2418_vm10, %vm2419_vm11 }
 0x1ba   : > { %v412_v42 = vmax.f32 %v284_v29, 1e-12  ;;  %v4205_v43 = vpop.eup %4204  ;;  %3735 = vst.msk [vmem:[%s4640_s23 + $0x218] sm:$0xff] %vm3667_vm14, %v3606_v19  ;;  %v2425_v49 = vor.u32 1.1754944e-38, %v2424_v28  ;;  %v2437_v46 = vand.u32 2147483647, %v6520_v14  ;;  %v795_v53 = vadd.f32 %v667_v63, %v411_v15 }
 0x1bb   : > { %4208 = vrcp.f32 %v6550_v41  ;;  %v668_v48 = vmax.f32 %v540_v34, 1e-12  ;;  %v4207_v16 = vpop.eup %4206  ;;  %v2417_v23 = vadd.f32 %v4201_v17, %v2416_v20  ;;  %v2429_v57 = vmul.f32 %v4205_v43, %v6520_v14  ;;  %v286_v15 = vld [vmem:[%s4501_s17 + $0x258] sm:$0xff] }
 0x1bc   : > { %4210 = vlog2.f32 %v2412_v44  ;;  %v3420_v60 = vmul.f32 0.6931472, %v4207_v16  ;;  %v1048_v39 = vmul.f32 0.5, %v6492_v2  ;;  %vm2433_vm15 = vweird.f32 %v6520_v14 }
 0x1bd   : > { %v2439_v54 = vand.u32 2147483648, %v6520_v14  ;;  %v2421_v56 = vsel %vm6558_vm13, %v4201_v17, %v2417_v23  ;;  %v1178_v55 = vmul.f32 %v6552_v52, %v6552_v52  ;;  %v2430_v59 = vsub.f32 1.0, %v2429_v57 }
 0x1be   : > { %vm2434_vm0 = vweird.f32 %v4205_v43  ;;  %v3607_v0 = vmul.f32 %v3420_v60, %v1047_v51  ;;  %v2426_v7 = vsel %vm6546_vm12, %v2425_v49, %v2421_v56  ;;  %vm6576_vm1 = vcmp.eq.f32.partialorder %v2437_v46, 8.507059e+37  ;;  %v543_v46 = vld [vmem:[%s4507_s20 + $0x260] sm:$0xff] }
 0x1bf   : > { %v6580_v61 = vmul.f32 %v668_v48, %v412_v42  ;;  %v2427_v5 = vmul.f32 %v2426_v7, %v1177_v33  ;;  %v2431_v58 = vmul.f32 %v4205_v43, %v2430_v59  ;;  %v6582_v11 = vmul.f32 0.5, %v795_v53  ;;  %vm6588_vm2 = vmor %vm2433_vm15, %vm2434_vm0 }
 0x1c0   : > { %v413_v3 = vmax.f32 %v285_v36, 1e-12  ;;  %3736 = vst.msk [vmem:[%s4640_s23 + $0x220] sm:$0xff] %vm3667_vm14, %v3607_v0  ;;  %v2440_v9 = vor.u32 1.1754944e-38, %v2439_v54  ;;  %v2452_v50 = vand.u32 2147483647, %v6550_v41  ;;  %v796_v13 = vadd.f32 %v668_v48, %v412_v42 }
 0x1c1   : > { %v4209_v27 = vpop.eup %4208  ;;  %4212 = vrcp.f32 %v6580_v61  ;;  %v669_v10 = vmax.f32 %v541_v37, 1e-12  ;;  %v2432_v12 = vadd.f32 %v4205_v43, %v2431_v58  ;;  %v1049_v14 = vmul.f32 0.5, %v6522_v26  ;;  %v287_v42 = vld [vmem:[%s4501_s17 + $0x260] sm:$0xff] }
 0x1c2   : > { %v4211_v4 = vpop.eup %4210  ;;  %4214 = vlog2.f32 %v2427_v5  ;;  %v2444_v18 = vmul.f32 %v4209_v27, %v6550_v41  ;;  %vm2448_vm3 = vweird.f32 %v6550_v41  ;;  %v2454_v1 = vand.u32 2147483648, %v6550_v41 }
 0x1c3   : > { %v3422_v24 = vmul.f32 0.6931472, %v4211_v4  ;;  %v2436_v17 = vsel %vm6588_vm2, %v4205_v43, %v2432_v12  ;;  %v1179_v8 = vmul.f32 %v6582_v11, %v6582_v11  ;;  %vm2449_vm4 = vweird.f32 %v4209_v27 }
 0x1c4   : > { %v2445_v21 = vsub.f32 1.0, %v2444_v18  ;;  %v2441_v32 = vsel %vm6576_vm1, %v2440_v9, %v2436_v17  ;;  %vm6606_vm5 = vcmp.eq.f32.partialorder %v2452_v50, 8.507059e+37  ;;  %v6610_v47 = vmul.f32 %v669_v10, %v413_v3  ;;  %vm6618_vm6 = vmor %vm2448_vm3, %vm2449_vm4  ;;  %v544_v50 = vld [vmem:[%s4507_s20 + $0x268] sm:$0xff] }
 0x1c5   : > { %v3608_v63 = vmul.f32 %v3422_v24, %v1048_v39  ;;  %v2442_v30 = vmul.f32 %v2441_v32, %v1178_v55  ;;  %v6612_v62 = vmul.f32 0.5, %v796_v13  ;;  %v414_v51 = vmax.f32 %v286_v15, 1e-12 }
 0x1c6   : > { %v2446_v25 = vmul.f32 %v4209_v27, %v2445_v21  ;;  %v2455_v31 = vor.u32 1.1754944e-38, %v2454_v1  ;;  %v2467_v33 = vand.u32 2147483647, %v6580_v61  ;;  %4216 = vrcp.f32 %v6610_v47 }
 0x1c7   : > { %v4213_v28 = vpop.eup %4212  ;;  %3737 = vst.msk [vmem:[%s4640_s23 + $0x228] sm:$0xff] %vm3667_vm14, %v3608_v63  ;;  %v670_v38 = vmax.f32 %v542_v22, 1e-12  ;;  %4218 = vlog2.f32 %v2442_v30  ;;  %v797_v40 = vadd.f32 %v669_v10, %v413_v3  ;;  %v1050_v41 = vmul.f32 0.5, %v6552_v52  ;;  %v288_v3 = vld [vmem:[%s4501_s17 + $0x268] sm:$0xff] }
 0x1c8   : > { %v4215_v34 = vpop.eup %4214  ;;  %v2447_v19 = vadd.f32 %v4209_v27, %v2446_v25  ;;  %v2459_v45 = vmul.f32 %v4213_v28, %v6580_v61  ;;  %vm2463_vm7 = vweird.f32 %v6580_v61  ;;  %v2469_v20 = vand.u32 2147483648, %v6580_v61 }
 0x1c9   : > { %v3424_v44 = vmul.f32 0.6931472, %v4215_v34  ;;  %v1180_v35 = vmul.f32 %v6612_v62, %v6612_v62  ;;  %vm2464_vm8 = vweird.f32 %v4213_v28  ;;  %vm6636_vm9 = vcmp.eq.f32.partialorder %v2467_v33, 8.507059e+37  ;;  %v545_v33 = vld [vmem:[%s4507_s20 + $0x270] sm:$0xff] }
 0x1ca   : > { %v2451_v43 = vsel %vm6618_vm6, %v4209_v27, %v2447_v19  ;;  %v2460_v49 = vsub.f32 1.0, %v2459_v45  ;;  %v6640_v23 = vmul.f32 %v670_v38, %v414_v51  ;;  %v6642_v60 = vmul.f32 0.5, %v797_v40  ;;  %vm6648_vm10 = vmor %vm2463_vm7, %vm2464_vm8 }
 0x1cb   : > { %v3609_v48 = vmul.f32 %v3424_v44, %v1049_v14  ;;  %v2456_v16 = vsel %vm6606_vm5, %v2455_v31, %v2451_v43  ;;  %v415_v39 = vmax.f32 %v287_v42, 1e-12  ;;  %v2470_v56 = vor.u32 1.1754944e-38, %v2469_v20 }
 0x1cc   : > { %v2457_v57 = vmul.f32 %v2456_v16, %v1179_v8  ;;  %v2461_v53 = vmul.f32 %v4213_v28, %v2460_v49  ;;  %v4217_v54 = vpop.eup %4216  ;;  %v2482_v55 = vand.u32 2147483647, %v6610_v47  ;;  %4220 = vrcp.f32 %v6640_v23 }
 0x1cd   : > { %3738 = vst.msk [vmem:[%s4640_s23 + $0x230] sm:$0xff] %vm3667_vm14, %v3609_v48  ;;  %v671_v59 = vmax.f32 %v543_v46, 1e-12  ;;  %v4219_v37 = vpop.eup %4218  ;;  %v2474_v7 = vmul.f32 %v4217_v54, %v6610_v47  ;;  %v798_v2 = vadd.f32 %v670_v38, %v414_v51  ;;  %v1051_v61 = vmul.f32 0.5, %v6582_v11  ;;  %v289_v51 = vld [vmem:[%s4501_s17 + $0x270] sm:$0xff] }
 0x1ce   : > { %4222 = vlog2.f32 %v2457_v57  ;;  %v2462_v0 = vadd.f32 %v4213_v28, %v2461_v53  ;;  %v3426_v5 = vmul.f32 0.6931472, %v4219_v37  ;;  %vm2478_vm11 = vweird.f32 %v6610_v47 }
 0x1cf   : > { %v2484_v58 = vand.u32 2147483648, %v6610_v47  ;;  %v1181_v6 = vmul.f32 %v6642_v60, %v6642_v60  ;;  %v2475_v9 = vsub.f32 1.0, %v2474_v7  ;;  %vm2479_vm12 = vweird.f32 %v4217_v54 }
 0x1d0   : > { %v2466_v27 = vsel %vm6648_vm10, %v4213_v28, %v2462_v0  ;;  %v3610_v10 = vmul.f32 %v3426_v5, %v1050_v41  ;;  %vm6666_vm13 = vcmp.eq.f32.partialorder %v2482_v55, 8.507059e+37  ;;  %v6670_v12 = vmul.f32 %v671_v59, %v415_v39  ;;  %vm6678_vm15 = vmor %vm2478_vm11, %vm2479_vm12  ;;  %v546_v55 = vld [vmem:[%s4507_s20 + $0x278] sm:$0xff] }
 0x1d1   : > { %v2471_v4 = vsel %vm6636_vm9, %v2470_v56, %v2466_v27  ;;  %v2476_v13 = vmul.f32 %v4217_v54, %v2475_v9  ;;  %v6672_v24 = vmul.f32 0.5, %v798_v2  ;;  %v416_v14 = vmax.f32 %v288_v3, 1e-12 }
 0x1d2   : > { %v2472_v18 = vmul.f32 %v2471_v4, %v1180_v35  ;;  %v4221_v1 = vpop.eup %4220  ;;  %3739 = vst.msk [vmem:[%s4640_s23 + $0x238] sm:$0xff] %vm3667_vm14, %v3610_v10  ;;  %v2485_v17 = vor.u32 1.1754944e-38, %v2484_v58  ;;  %v2497_v8 = vand.u32 2147483647, %v6640_v23  ;;  %4224 = vrcp.f32 %v6670_v12 }
 0x1d3   : > { %v672_v21 = vmax.f32 %v544_v50, 1e-12  ;;  %v2477_v63 = vadd.f32 %v4217_v54, %v2476_v13  ;;  %v2489_v32 = vmul.f32 %v4221_v1, %v6640_v23  ;;  %v799_v26 = vadd.f32 %v671_v59, %v415_v39  ;;  %v290_v39 = vld [vmem:[%s4501_s17 + $0x278] sm:$0xff] }
 0x1d4   : > { %v4223_v22 = vpop.eup %4222  ;;  %4226 = vlog2.f32 %v2472_v18  ;;  %v1052_v47 = vmul.f32 0.5, %v6612_v62  ;;  %vm2493_vm0 = vweird.f32 %v6640_v23  ;;  %v2499_v25 = vand.u32 2147483648, %v6640_v23 }
 0x1d5   : > { %v3428_v30 = vmul.f32 0.6931472, %v4223_v22  ;;  %v2481_v28 = vsel %vm6678_vm15, %v4217_v54, %v2477_v63  ;;  %v1182_v29 = vmul.f32 %v6672_v24, %v6672_v24  ;;  %v2490_v31 = vsub.f32 1.0, %v2489_v32 }
 0x1d6   : > { %vm2494_vm1 = vweird.f32 %v4221_v1  ;;  %v2486_v34 = vsel %vm6666_vm13, %v2485_v17, %v2481_v28  ;;  %vm6696_vm2 = vcmp.eq.f32.partialorder %v2497_v8, 8.507059e+37  ;;  %v6700_v19 = vmul.f32 %v672_v21, %v416_v14  ;;  %v547_v8 = vld [vmem:[%s4507_s20 + $0x280] sm:$0xff] }
 0x1d7   : > { %v3611_v38 = vmul.f32 %v3428_v30, %v1051_v61  ;;  %v2487_v45 = vmul.f32 %v2486_v34, %v1181_v6  ;;  %v2491_v40 = vmul.f32 %v4221_v1, %v2490_v31  ;;  %v6702_v44 = vmul.f32 0.5, %v799_v26  ;;  %vm6708_vm3 = vmor %vm2493_vm0, %vm2494_vm1 }
 0x1d8   : > { %v417_v41 = vmax.f32 %v289_v51, 1e-12  ;;  %v4225_v20 = vpop.eup %4224  ;;  %v2500_v43 = vor.u32 1.1754944e-38, %v2499_v25  ;;  %v2512_v35 = vand.u32 2147483647, %v6670_v12  ;;  %4228 = vrcp.f32 %v6700_v19 }
 0x1d9   : > { %3740 = vst.msk [vmem:[%s4640_s23 + $0x240] sm:$0xff] %vm3667_vm14, %v3611_v38  ;;  %v673_v49 = vmax.f32 %v545_v33, 1e-12  ;;  %4230 = vlog2.f32 %v2487_v45  ;;  %v2492_v48 = vadd.f32 %v4221_v1, %v2491_v40  ;;  %v2504_v16 = vmul.f32 %v4225_v20, %v6670_v12 }
 0x1da   : > { %v4227_v46 = vpop.eup %4226  ;;  %v800_v52 = vadd.f32 %v672_v21, %v416_v14  ;;  %v1053_v23 = vmul.f32 0.5, %v6642_v60  ;;  %vm2508_vm4 = vweird.f32 %v6670_v12  ;;  %v2514_v53 = vand.u32 2147483648, %v6670_v12  ;;  %v291_v14 = vld [vmem:[%s4501_s17 + $0x280] sm:$0xff] }
 0x1db   : > { %v3430_v57 = vmul.f32 0.6931472, %v4227_v46  ;;  %v2496_v54 = vsel %vm6708_vm3, %v4221_v1, %v2492_v48  ;;  %v1183_v36 = vmul.f32 %v6702_v44, %v6702_v44  ;;  %v2505_v56 = vsub.f32 1.0, %v2504_v16 }
 0x1dc   : > { %vm2509_vm5 = vweird.f32 %v4225_v20  ;;  %v2501_v37 = vsel %vm6696_vm2, %v2500_v43, %v2496_v54  ;;  %vm6726_vm6 = vcmp.eq.f32.partialorder %v2512_v35, 8.507059e+37  ;;  %v6730_v0 = vmul.f32 %v673_v49, %v417_v41  ;;  %v548_v35 = vld [vmem:[%s4507_s20 + $0x288] sm:$0xff] }
 0x1dd   : > { %v3612_v59 = vmul.f32 %v3430_v57, %v1052_v47  ;;  %v2502_v7 = vmul.f32 %v2501_v37, %v1182_v29  ;;  %v2506_v2 = vmul.f32 %v4225_v20, %v2505_v56  ;;  %v6732_v5 = vmul.f32 0.5, %v800_v52  ;;  %vm6738_vm7 = vmor %vm2508_vm4, %vm2509_vm5 }
 0x1de   : > { %v418_v61 = vmax.f32 %v290_v39, 1e-12  ;;  %v4229_v58 = vpop.eup %4228  ;;  %v2515_v27 = vor.u32 1.1754944e-38, %v2514_v53  ;;  %v2527_v6 = vand.u32 2147483647, %v6700_v19  ;;  %4232 = vrcp.f32 %v6730_v0 }
 0x1df   : > { %3741 = vst.msk [vmem:[%s4640_s23 + $0x248] sm:$0xff] %vm3667_vm14, %v3612_v59  ;;  %v674_v9 = vmax.f32 %v546_v55, 1e-12  ;;  %v4231_v50 = vpop.eup %4230  ;;  %4234 = vlog2.f32 %v2502_v7  ;;  %v2507_v10 = vadd.f32 %v4225_v20, %v2506_v2  ;;  %v2519_v4 = vmul.f32 %v4229_v58, %v6700_v19 }
 0x1e0   : > { %v801_v11 = vadd.f32 %v673_v49, %v417_v41  ;;  %v3432_v18 = vmul.f32 0.6931472, %v4231_v50  ;;  %v1054_v12 = vmul.f32 0.5, %v6672_v24  ;;  %vm2523_vm8 = vweird.f32 %v6700_v19  ;;  %v292_v41 = vld [vmem:[%s4501_s17 + $0x288] sm:$0xff] }
 0x1e1   : > { %v2529_v13 = vand.u32 2147483648, %v6700_v19  ;;  %v2511_v1 = vsel %vm6738_vm7, %v4225_v20, %v2507_v10  ;;  %v1184_v15 = vmul.f32 %v6732_v5, %v6732_v5  ;;  %v2520_v17 = vsub.f32 1.0, %v2519_v4 }
 0x1e2   : > { %vm2524_vm9 = vweird.f32 %v4229_v58  ;;  %v3613_v21 = vmul.f32 %v3432_v18, %v1053_v23  ;;  %v2516_v22 = vsel %vm6726_vm6, %v2515_v27, %v2511_v1  ;;  %vm6756_vm10 = vcmp.eq.f32.partialorder %v2527_v6, 8.507059e+37  ;;  %v549_v6 = vld [vmem:[%s4507_s20 + $0x290] sm:$0xff] }
 0x1e3   : > { %v6760_v63 = vmul.f32 %v674_v9, %v418_v61  ;;  %v2517_v32 = vmul.f32 %v2516_v22, %v1183_v36  ;;  %v2521_v26 = vmul.f32 %v4229_v58, %v2520_v17  ;;  %v6762_v30 = vmul.f32 0.5, %v801_v11  ;;  %vm6768_vm11 = vmor %vm2523_vm8, %vm2524_vm9 }
 0x1e4   : > { %v419_v47 = vmax.f32 %v291_v14, 1e-12  ;;  %v4233_v25 = vpop.eup %4232  ;;  %3742 = vst.msk [vmem:[%s4640_s23 + $0x250] sm:$0xff] %vm3667_vm14, %v3613_v21  ;;  %v2530_v28 = vor.u32 1.1754944e-38, %v2529_v13  ;;  %v2542_v29 = vand.u32 2147483647, %v6730_v0  ;;  %v802_v62 = vadd.f32 %v674_v9, %v418_v61 }
 0x1e5   : > { %4236 = vrcp.f32 %v6760_v63  ;;  %v675_v31 = vmax.f32 %v547_v8, 1e-12  ;;  %v4235_v33 = vpop.eup %4234  ;;  %v2522_v38 = vadd.f32 %v4229_v58, %v2521_v26  ;;  %v2534_v34 = vmul.f32 %v4233_v25, %v6730_v0  ;;  %v293_v61 = vld [vmem:[%s4501_s17 + $0x290] sm:$0xff] }
 0x1e6   : > { %4238 = vlog2.f32 %v2517_v32  ;;  %v3434_v45 = vmul.f32 0.6931472, %v4235_v33  ;;  %v1055_v19 = vmul.f32 0.5, %v6702_v44  ;;  %vm2538_vm12 = vweird.f32 %v6730_v0 }
 0x1e7   : > { %v2544_v40 = vand.u32 2147483648, %v6730_v0  ;;  %v2526_v20 = vsel %vm6768_vm11, %v4229_v58, %v2522_v38  ;;  %v1185_v42 = vmul.f32 %v6762_v30, %v6762_v30  ;;  %v2535_v43 = vsub.f32 1.0, %v2534_v34 }
 0x1e8   : > { %vm2539_vm13 = vweird.f32 %v4233_v25  ;;  %v3614_v49 = vmul.f32 %v3434_v45, %v1054_v12  ;;  %v2531_v46 = vsel %vm6756_vm10, %v2530_v28, %v2526_v20  ;;  %vm6786_vm15 = vcmp.eq.f32.partialorder %v2542_v29, 8.507059e+37  ;;  %v550_v29 = vld [vmem:[%s4507_s20 + $0x298] sm:$0xff] }
 0x1e9   : > { %v6790_v48 = vmul.f32 %v675_v31, %v419_v47  ;;  %v2532_v16 = vmul.f32 %v2531_v46, %v1184_v15  ;;  %v2536_v52 = vmul.f32 %v4233_v25, %v2535_v43  ;;  %v6792_v57 = vmul.f32 0.5, %v802_v62  ;;  %vm6798_vm0 = vmor %vm2538_vm12, %vm2539_vm13 }
 0x1ea   : > { %v420_v23 = vmax.f32 %v292_v41, 1e-12  ;;  %3743 = vst.msk [vmem:[%s4640_s23 + $0x258] sm:$0xff] %vm3667_vm14, %v3614_v49  ;;  %v2545_v54 = vor.u32 1.1754944e-38, %v2544_v40  ;;  %v2557_v36 = vand.u32 2147483647, %v6760_v63  ;;  %v803_v60 = vadd.f32 %v675_v31, %v419_v47 }
 0x1eb   : > { %v4237_v53 = vpop.eup %4236  ;;  %4240 = vrcp.f32 %v6790_v48  ;;  %v676_v56 = vmax.f32 %v548_v35, 1e-12  ;;  %v2537_v59 = vadd.f32 %v4233_v25, %v2536_v52  ;;  %v1056_v0 = vmul.f32 0.5, %v6732_v5  ;;  %v294_v47 = vld [vmem:[%s4501_s17 + $0x298] sm:$0xff] }
 0x1ec   : > { %v4239_v55 = vpop.eup %4238  ;;  %4242 = vlog2.f32 %v2532_v16  ;;  %v2549_v37 = vmul.f32 %v4237_v53, %v6760_v63  ;;  %vm2553_vm1 = vweird.f32 %v6760_v63  ;;  %v2559_v2 = vand.u32 2147483648, %v6760_v63 }
 0x1ed   : > { %v3436_v7 = vmul.f32 0.6931472, %v4239_v55  ;;  %v2541_v58 = vsel %vm6798_vm0, %v4233_v25, %v2537_v59  ;;  %v1186_v3 = vmul.f32 %v6792_v57, %v6792_v57  ;;  %vm2554_vm2 = vweird.f32 %v4237_v53 }
 0x1ee   : > { %v2550_v27 = vsub.f32 1.0, %v2549_v37  ;;  %v2546_v50 = vsel %vm6786_vm15, %v2545_v54, %v2541_v58  ;;  %vm6816_vm3 = vcmp.eq.f32.partialorder %v2557_v36, 8.507059e+37  ;;  %v6820_v10 = vmul.f32 %v676_v56, %v420_v23  ;;  %vm6828_vm4 = vmor %vm2553_vm1, %vm2554_vm2  ;;  %v551_v36 = vld [vmem:[%s4507_s20 + $0x2a0] sm:$0xff] }
 0x1ef   : > { %v3615_v9 = vmul.f32 %v3436_v7, %v1055_v19  ;;  %v2547_v4 = vmul.f32 %v2546_v50, %v1185_v42  ;;  %v6822_v18 = vmul.f32 0.5, %v803_v60  ;;  %v421_v12 = vmax.f32 %v293_v61, 1e-12 }
 0x1f0   : > { %v2551_v11 = vmul.f32 %v4237_v53, %v2550_v27  ;;  %v2560_v1 = vor.u32 1.1754944e-38, %v2559_v2  ;;  %v2572_v15 = vand.u32 2147483647, %v6790_v48  ;;  %4244 = vrcp.f32 %v6820_v10 }
 0x1f1   : > { %v4241_v13 = vpop.eup %4240  ;;  %3744 = vst.msk [vmem:[%s4640_s23 + $0x260] sm:$0xff] %vm3667_vm14, %v3615_v9  ;;  %v677_v17 = vmax.f32 %v549_v6, 1e-12  ;;  %4246 = vlog2.f32 %v2547_v4  ;;  %v804_v24 = vadd.f32 %v676_v56, %v420_v23  ;;  %v1057_v63 = vmul.f32 0.5, %v6762_v30  ;;  %v295_v23 = vld [vmem:[%s4501_s17 + $0x2a0] sm:$0xff] }
 0x1f2   : > { %v4243_v8 = vpop.eup %4242  ;;  %v2552_v21 = vadd.f32 %v4237_v53, %v2551_v11  ;;  %v2564_v22 = vmul.f32 %v4241_v13, %v6790_v48  ;;  %vm2568_vm5 = vweird.f32 %v6790_v48  ;;  %v2574_v26 = vand.u32 2147483648, %v6790_v48 }
 0x1f3   : > { %v3438_v32 = vmul.f32 0.6931472, %v4243_v8  ;;  %v1187_v51 = vmul.f32 %v6822_v18, %v6822_v18  ;;  %vm2569_vm6 = vweird.f32 %v4241_v13  ;;  %vm6846_vm7 = vcmp.eq.f32.partialorder %v2572_v15, 8.507059e+37  ;;  %v552_v15 = vld [vmem:[%s4507_s20 + $0x2a8] sm:$0xff] }
 0x1f4   : > { %v2556_v25 = vsel %vm6828_vm4, %v4237_v53, %v2552_v21  ;;  %v2565_v28 = vsub.f32 1.0, %v2564_v22  ;;  %v6850_v38 = vmul.f32 %v677_v17, %v421_v12  ;;  %v6852_v45 = vmul.f32 0.5, %v804_v24  ;;  %vm6858_vm8 = vmor %vm2568_vm5, %vm2569_vm6 }
 0x1f5   : > { %v3616_v31 = vmul.f32 %v3438_v32, %v1056_v0  ;;  %v2561_v33 = vsel %vm6816_vm3, %v2560_v1, %v2556_v25  ;;  %v422_v19 = vmax.f32 %v294_v47, 1e-12  ;;  %v2575_v20 = vor.u32 1.1754944e-38, %v2574_v26 }
 0x1f6   : > { %v2562_v34 = vmul.f32 %v2561_v33, %v1186_v3  ;;  %v2566_v62 = vmul.f32 %v4241_v13, %v2565_v28  ;;  %v4245_v40 = vpop.eup %4244  ;;  %v2587_v42 = vand.u32 2147483647, %v6820_v10  ;;  %4248 = vrcp.f32 %v6850_v38 }
 0x1f7   : > { %3745 = vst.msk [vmem:[%s4640_s23 + $0x268] sm:$0xff] %vm3667_vm14, %v3616_v31  ;;  %v678_v43 = vmax.f32 %v550_v29, 1e-12  ;;  %v4247_v35 = vpop.eup %4246  ;;  %v2579_v46 = vmul.f32 %v4245_v40, %v6820_v10  ;;  %v805_v44 = vadd.f32 %v677_v17, %v421_v12  ;;  %v1058_v48 = vmul.f32 0.5, %v6792_v57  ;;  %v296_v12 = vld [vmem:[%s4501_s17 + $0x2a8] sm:$0xff] }
 0x1f8   : > { %4250 = vlog2.f32 %v2562_v34  ;;  %v2567_v49 = vadd.f32 %v4241_v13, %v2566_v62  ;;  %v3440_v16 = vmul.f32 0.6931472, %v4247_v35  ;;  %vm2583_vm9 = vweird.f32 %v6820_v10 }
 0x1f9   : > { %v2589_v52 = vand.u32 2147483648, %v6820_v10  ;;  %v1188_v39 = vmul.f32 %v6852_v45, %v6852_v45  ;;  %v2580_v54 = vsub.f32 1.0, %v2579_v46  ;;  %vm2584_vm10 = vweird.f32 %v4245_v40 }
 0x1fa   : > { %v2571_v53 = vsel %vm6858_vm8, %v4241_v13, %v2567_v49  ;;  %v3617_v56 = vmul.f32 %v3440_v16, %v1057_v63  ;;  %vm6876_vm11 = vcmp.eq.f32.partialorder %v2587_v42, 8.507059e+37  ;;  %v6880_v59 = vmul.f32 %v678_v43, %v422_v19  ;;  %vm6888_vm12 = vmor %vm2583_vm9, %vm2584_vm10  ;;  %v553_v42 = vld [vmem:[%s4507_s20 + $0x2b0] sm:$0xff] }
 0x1fb   : > { %v2576_v55 = vsel %vm6846_vm7, %v2575_v20, %v2571_v53  ;;  %v2581_v60 = vmul.f32 %v4245_v40, %v2580_v54  ;;  %v6882_v7 = vmul.f32 0.5, %v805_v44  ;;  %v423_v0 = vmax.f32 %v295_v23, 1e-12 }
 0x1fc   : > { %v2577_v37 = vmul.f32 %v2576_v55, %v1187_v51  ;;  %v4249_v2 = vpop.eup %4248  ;;  %3746 = vst.msk [vmem:[%s4640_s23 + $0x270] sm:$0xff] %vm3667_vm14, %v3617_v56  ;;  %v2590_v58 = vor.u32 1.1754944e-38, %v2589_v52  ;;  %v2602_v3 = vand.u32 2147483647, %v6850_v38  ;;  %4252 = vrcp.f32 %v6880_v59 }
 0x1fd   : > { %v679_v27 = vmax.f32 %v551_v36, 1e-12  ;;  %v2582_v9 = vadd.f32 %v4245_v40, %v2581_v60  ;;  %v2594_v50 = vmul.f32 %v4249_v2, %v6850_v38  ;;  %v806_v5 = vadd.f32 %v678_v43, %v422_v19  ;;  %v297_v19 = vld [vmem:[%s4501_s17 + $0x2b0] sm:$0xff] }
 0x1fe   : > { %v4251_v6 = vpop.eup %4250  ;;  %4254 = vlog2.f32 %v2577_v37  ;;  %v1059_v10 = vmul.f32 0.5, %v6822_v18  ;;  %vm2598_vm13 = vweird.f32 %v6850_v38  ;;  %v2604_v11 = vand.u32 2147483648, %v6850_v38 }
 0x1ff   : > { %v3442_v4 = vmul.f32 0.6931472, %v4251_v6  ;;  %v2586_v13 = vsel %vm6888_vm12, %v4245_v40, %v2582_v9  ;;  %v1189_v14 = vmul.f32 %v6882_v7, %v6882_v7  ;;  %v2595_v1 = vsub.f32 1.0, %v2594_v50 }
 0x200   : > { %vm2599_vm15 = vweird.f32 %v4249_v2  ;;  %v2591_v8 = vsel %vm6876_vm11, %v2590_v58, %v2586_v13  ;;  %vm6906_vm0 = vcmp.eq.f32.partialorder %v2602_v3, 8.507059e+37  ;;  %v6910_v21 = vmul.f32 %v679_v27, %v423_v0  ;;  %v554_v3 = vld [vmem:[%s4507_s20 + $0x2b8] sm:$0xff] }
 0x201   : > { %v3618_v17 = vmul.f32 %v3442_v4, %v1058_v48  ;;  %v2592_v22 = vmul.f32 %v2591_v8, %v1188_v39  ;;  %v2596_v24 = vmul.f32 %v4249_v2, %v2595_v1  ;;  %v6912_v32 = vmul.f32 0.5, %v806_v5  ;;  %vm6918_vm1 = vmor %vm2598_vm13, %vm2599_vm15 }
 0x202   : > { %v424_v63 = vmax.f32 %v296_v12, 1e-12  ;;  %v4253_v26 = vpop.eup %4252  ;;  %v2605_v25 = vor.u32 1.1754944e-38, %v2604_v11  ;;  %v2617_v51 = vand.u32 2147483647, %v6880_v59  ;;  %4256 = vrcp.f32 %v6910_v21 }
 0x203   : > { %3747 = vst.msk [vmem:[%s4640_s23 + $0x278] sm:$0xff] %vm3667_vm14, %v3618_v17  ;;  %v680_v28 = vmax.f32 %v552_v15, 1e-12  ;;  %4258 = vlog2.f32 %v2592_v22  ;;  %v2597_v31 = vadd.f32 %v4249_v2, %v2596_v24  ;;  %v2609_v33 = vmul.f32 %v4253_v26, %v6880_v59 }
 0x204   : > { %v4255_v29 = vpop.eup %4254  ;;  %v807_v30 = vadd.f32 %v679_v27, %v423_v0  ;;  %v1060_v38 = vmul.f32 0.5, %v6852_v45  ;;  %vm2613_vm2 = vweird.f32 %v6880_v59  ;;  %v2619_v62 = vand.u32 2147483648, %v6880_v59  ;;  %v298_v0 = vld [vmem:[%s4501_s17 + $0x2b8] sm:$0xff] }
 0x205   : > { %v3444_v34 = vmul.f32 0.6931472, %v4255_v29  ;;  %v2601_v40 = vsel %vm6918_vm1, %v4249_v2, %v2597_v31  ;;  %v1190_v41 = vmul.f32 %v6912_v32, %v6912_v32  ;;  %v2610_v20 = vsub.f32 1.0, %v2609_v33 }
 0x206   : > { %vm2614_vm3 = vweird.f32 %v4253_v26  ;;  %v2606_v35 = vsel %vm6906_vm0, %v2605_v25, %v2601_v40  ;;  %vm6936_vm4 = vcmp.eq.f32.partialorder %v2617_v51, 8.507059e+37  ;;  %v6940_v49 = vmul.f32 %v680_v28, %v424_v63  ;;  %v555_v51 = vld [vmem:[%s4507_s20 + $0x2c0] sm:$0xff] }
 0x207   : > { %v3619_v43 = vmul.f32 %v3444_v34, %v1059_v10  ;;  %v2607_v46 = vmul.f32 %v2606_v35, %v1189_v14  ;;  %v2611_v44 = vmul.f32 %v4253_v26, %v2610_v20  ;;  %v6942_v16 = vmul.f32 0.5, %v807_v30  ;;  %vm6948_vm5 = vmor %vm2613_vm2, %vm2614_vm3 }
 0x208   : > { %v425_v48 = vmax.f32 %v297_v19, 1e-12  ;;  %v4257_v52 = vpop.eup %4256  ;;  %v2620_v53 = vor.u32 1.1754944e-38, %v2619_v62  ;;  %v2632_v39 = vand.u32 2147483647, %v6910_v21  ;;  %4260 = vrcp.f32 %v6940_v49 }
 0x209   : > { %3748 = vst.msk [vmem:[%s4640_s23 + $0x280] sm:$0xff] %vm3667_vm14, %v3619_v43  ;;  %v681_v54 = vmax.f32 %v553_v42, 1e-12  ;;  %v4259_v36 = vpop.eup %4258  ;;  %4262 = vlog2.f32 %v2607_v46  ;;  %v2612_v56 = vadd.f32 %v4253_v26, %v2611_v44  ;;  %v2624_v55 = vmul.f32 %v4257_v52, %v6910_v21 }
 0x20a   : > { %v808_v57 = vadd.f32 %v680_v28, %v424_v63  ;;  %v3446_v37 = vmul.f32 0.6931472, %v4259_v36  ;;  %v1061_v59 = vmul.f32 0.5, %v6882_v7  ;;  %vm2628_vm6 = vweird.f32 %v6910_v21  ;;  %v299_v63 = vld [vmem:[%s4501_s17 + $0x2c0] sm:$0xff] }
 0x20b   : > { %v2634_v60 = vand.u32 2147483648, %v6910_v21  ;;  %v2616_v2 = vsel %vm6948_vm5, %v4253_v26, %v2612_v56  ;;  %v1191_v61 = vmul.f32 %v6942_v16, %v6942_v16  ;;  %v2625_v58 = vsub.f32 1.0, %v2624_v55 }
 0x20c   : > { %vm2629_vm7 = vweird.f32 %v4257_v52  ;;  %v3620_v27 = vmul.f32 %v3446_v37, %v1060_v38  ;;  %v2621_v6 = vsel %vm6936_vm4, %v2620_v53, %v2616_v2  ;;  %vm6966_vm8 = vcmp.eq.f32.partialorder %v2632_v39, 8.507059e+37  ;;  %v556_v39 = vld [vmem:[%s4507_s20 + $0x2c8] sm:$0xff] }
 0x20d   : > { %v6970_v9 = vmul.f32 %v681_v54, %v425_v48  ;;  %v2622_v50 = vmul.f32 %v2621_v6, %v1190_v41  ;;  %v2626_v5 = vmul.f32 %v4257_v52, %v2625_v58  ;;  %v6972_v4 = vmul.f32 0.5, %v808_v57  ;;  %vm6978_vm9 = vmor %vm2628_vm6, %vm2629_vm7 }
 0x20e   : > { %v426_v10 = vmax.f32 %v298_v0, 1e-12  ;;  %v4261_v11 = vpop.eup %4260  ;;  %3749 = vst.msk [vmem:[%s4640_s23 + $0x288] sm:$0xff] %vm3667_vm14, %v3620_v27  ;;  %v2635_v13 = vor.u32 1.1754944e-38, %v2634_v60  ;;  %v2647_v14 = vand.u32 2147483647, %v6940_v49  ;;  %v809_v18 = vadd.f32 %v681_v54, %v425_v48 }
 0x20f   : > { %4264 = vrcp.f32 %v6970_v9  ;;  %v682_v1 = vmax.f32 %v554_v3, 1e-12  ;;  %v4263_v15 = vpop.eup %4262  ;;  %v2627_v17 = vadd.f32 %v4257_v52, %v2626_v5  ;;  %v2639_v8 = vmul.f32 %v4261_v11, %v6940_v49  ;;  %v300_v48 = vld [vmem:[%s4501_s17 + $0x2c8] sm:$0xff] }
 0x210   : > { %4266 = vlog2.f32 %v2622_v50  ;;  %v3448_v22 = vmul.f32 0.6931472, %v4263_v15  ;;  %v1062_v21 = vmul.f32 0.5, %v6912_v32  ;;  %vm2643_vm10 = vweird.f32 %v6940_v49 }
 0x211   : > { %v2649_v24 = vand.u32 2147483648, %v6940_v49  ;;  %v2631_v26 = vsel %vm6978_vm9, %v4257_v52, %v2627_v17  ;;  %v1192_v47 = vmul.f32 %v6972_v4, %v6972_v4  ;;  %v2640_v25 = vsub.f32 1.0, %v2639_v8 }
 0x212   : > { %vm2644_vm11 = vweird.f32 %v4261_v11  ;;  %v3621_v28 = vmul.f32 %v3448_v22, %v1061_v59  ;;  %v2636_v29 = vsel %vm6966_vm8, %v2635_v13, %v2631_v26  ;;  %vm6996_vm12 = vcmp.eq.f32.partialorder %v2647_v14, 8.507059e+37  ;;  %v557_v14 = vld [vmem:[%s4507_s20 + $0x2d0] sm:$0xff] }
 0x213   : > { %v7000_v31 = vmul.f32 %v682_v1, %v426_v10  ;;  %v2637_v33 = vmul.f32 %v2636_v29, %v1191_v61  ;;  %v2641_v30 = vmul.f32 %v4261_v11, %v2640_v25  ;;  %v7002_v34 = vmul.f32 0.5, %v809_v18  ;;  %vm7008_vm13 = vmor %vm2643_vm10, %vm2644_vm11 }
 0x214   : > { %v427_v38 = vmax.f32 %v299_v63, 1e-12  ;;  %3750 = vst.msk [vmem:[%s4640_s23 + $0x290] sm:$0xff] %vm3667_vm14, %v3621_v28  ;;  %v2650_v40 = vor.u32 1.1754944e-38, %v2649_v24  ;;  %v2662_v41 = vand.u32 2147483647, %v6970_v9  ;;  %v810_v45 = vadd.f32 %v682_v1, %v426_v10 }
 0x215   : > { %v4265_v62 = vpop.eup %4264  ;;  %4268 = vrcp.f32 %v7000_v31  ;;  %v683_v20 = vmax.f32 %v555_v51, 1e-12  ;;  %v2642_v43 = vadd.f32 %v4261_v11, %v2641_v30  ;;  %v1063_v49 = vmul.f32 0.5, %v6942_v16  ;;  %v301_v10 = vld [vmem:[%s4501_s17 + $0x2d0] sm:$0xff] }
 0x216   : > { %v4267_v42 = vpop.eup %4266  ;;  %4270 = vlog2.f32 %v2637_v33  ;;  %v2654_v35 = vmul.f32 %v4265_v62, %v6970_v9  ;;  %vm2658_vm15 = vweird.f32 %v6970_v9  ;;  %v2664_v44 = vand.u32 2147483648, %v6970_v9 }
 0x217   : > { %v3450_v46 = vmul.f32 0.6931472, %v4267_v42  ;;  %v2646_v52 = vsel %vm7008_vm13, %v4261_v11, %v2642_v43  ;;  %v1193_v23 = vmul.f32 %v7002_v34, %v7002_v34  ;;  %vm2659_vm0 = vweird.f32 %v4265_v62 }
 0x218   : > { %v2655_v53 = vsub.f32 1.0, %v2654_v35  ;;  %v2651_v36 = vsel %vm6996_vm12, %v2650_v40, %v2646_v52  ;;  %vm7026_vm1 = vcmp.eq.f32.partialorder %v2662_v41, 8.507059e+37  ;;  %v7030_v56 = vmul.f32 %v683_v20, %v427_v38  ;;  %vm7038_vm2 = vmor %vm2658_vm15, %vm2659_vm0  ;;  %v558_v41 = vld [vmem:[%s4507_s20 + $0x2d8] sm:$0xff] }
 0x219   : > { %v3622_v54 = vmul.f32 %v3450_v46, %v1062_v21  ;;  %v2652_v55 = vmul.f32 %v2651_v36, %v1192_v47  ;;  %v7032_v37 = vmul.f32 0.5, %v810_v45  ;;  %v428_v59 = vmax.f32 %v300_v48, 1e-12 }
 0x21a   : > { %v2656_v57 = vmul.f32 %v4265_v62, %v2655_v53  ;;  %v2665_v2 = vor.u32 1.1754944e-38, %v2664_v44  ;;  %v2677_v61 = vand.u32 2147483647, %v7000_v31  ;;  %4272 = vrcp.f32 %v7030_v56 }
 0x21b   : > { %v4269_v60 = vpop.eup %4268  ;;  %3751 = vst.msk [vmem:[%s4640_s23 + $0x298] sm:$0xff] %vm3667_vm14, %v3622_v54  ;;  %v684_v58 = vmax.f32 %v556_v39, 1e-12  ;;  %4274 = vlog2.f32 %v2652_v55  ;;  %v811_v7 = vadd.f32 %v683_v20, %v427_v38  ;;  %v1064_v9 = vmul.f32 0.5, %v6972_v4  ;;  %v302_v38 = vld [vmem:[%s4501_s17 + $0x2d8] sm:$0xff] }
 0x21c   : > { %v4271_v3 = vpop.eup %4270  ;;  %v2657_v27 = vadd.f32 %v4265_v62, %v2656_v57  ;;  %v2669_v6 = vmul.f32 %v4269_v60, %v7000_v31  ;;  %vm2673_vm3 = vweird.f32 %v7000_v31  ;;  %v2679_v5 = vand.u32 2147483648, %v7000_v31 }
 0x21d   : > { %v3452_v50 = vmul.f32 0.6931472, %v4271_v3  ;;  %v1194_v12 = vmul.f32 %v7032_v37, %v7032_v37  ;;  %vm2674_vm4 = vweird.f32 %v4269_v60  ;;  %vm7056_vm5 = vcmp.eq.f32.partialorder %v2677_v61, 8.507059e+37  ;;  %v559_v61 = vld [vmem:[%s4507_s20 + $0x2e0] sm:$0xff] }
 0x21e   : > { %v2661_v11 = vsel %vm7038_vm2, %v4265_v62, %v2657_v27  ;;  %v2670_v13 = vsub.f32 1.0, %v2669_v6  ;;  %v7060_v17 = vmul.f32 %v684_v58, %v428_v59  ;;  %v7062_v22 = vmul.f32 0.5, %v811_v7  ;;  %vm7068_vm6 = vmor %vm2673_vm3, %vm2674_vm4 }
 0x21f   : > { %v3623_v1 = vmul.f32 %v3452_v50, %v1063_v49  ;;  %v2666_v15 = vsel %vm7026_vm1, %v2665_v2, %v2661_v11  ;;  %v429_v21 = vmax.f32 %v301_v10, 1e-12  ;;  %v2680_v26 = vor.u32 1.1754944e-38, %v2679_v5 }
 0x220   : > { %v2667_v8 = vmul.f32 %v2666_v15, %v1193_v23  ;;  %v2671_v18 = vmul.f32 %v4269_v60, %v2670_v13  ;;  %v4273_v24 = vpop.eup %4272  ;;  %v2692_v47 = vand.u32 2147483647, %v7030_v56  ;;  %4276 = vrcp.f32 %v7060_v17 }
 0x221   : > { %3752 = vst.msk [vmem:[%s4640_s23 + $0x2a0] sm:$0xff] %vm3667_vm14, %v3623_v1  ;;  %v685_v25 = vmax.f32 %v557_v14, 1e-12  ;;  %v4275_v51 = vpop.eup %4274  ;;  %v2684_v29 = vmul.f32 %v4273_v24, %v7030_v56  ;;  %v812_v32 = vadd.f32 %v684_v58, %v428_v59  ;;  %v1065_v31 = vmul.f32 0.5, %v7002_v34  ;;  %v303_v59 = vld [vmem:[%s4501_s17 + $0x2e0] sm:$0xff] }
 0x222   : > { %4278 = vlog2.f32 %v2667_v8  ;;  %v2672_v28 = vadd.f32 %v4269_v60, %v2671_v18  ;;  %v3454_v33 = vmul.f32 0.6931472, %v4275_v51  ;;  %vm2688_vm7 = vweird.f32 %v7030_v56 }
 0x223   : > { %v2694_v30 = vand.u32 2147483648, %v7030_v56  ;;  %v1195_v19 = vmul.f32 %v7062_v22, %v7062_v22  ;;  %v2685_v40 = vsub.f32 1.0, %v2684_v29  ;;  %vm2689_vm8 = vweird.f32 %v4273_v24 }
 0x224   : > { %v2676_v62 = vsel %vm7068_vm6, %v4269_v60, %v2672_v28  ;;  %v3624_v20 = vmul.f32 %v3454_v33, %v1064_v9  ;;  %vm7086_vm9 = vcmp.eq.f32.partialorder %v2692_v47, 8.507059e+37  ;;  %v7090_v43 = vmul.f32 %v685_v25, %v429_v21  ;;  %vm7098_vm10 = vmor %vm2688_vm7, %vm2689_vm8  ;;  %v560_v47 = vld [vmem:[%s4507_s20 + $0x2e8] sm:$0xff] }
 0x225   : > { %v2681_v42 = vsel %vm7056_vm5, %v2680_v26, %v2676_v62  ;;  %v2686_v45 = vmul.f32 %v4273_v24, %v2685_v40  ;;  %v7092_v46 = vmul.f32 0.5, %v812_v32  ;;  %v430_v49 = vmax.f32 %v302_v38, 1e-12 }
 0x226   : > { %v2682_v35 = vmul.f32 %v2681_v42, %v1194_v12  ;;  %v4277_v44 = vpop.eup %4276  ;;  %3753 = vst.msk [vmem:[%s4640_s23 + $0x2a8] sm:$0xff] %vm3667_vm14, %v3624_v20  ;;  %v2695_v52 = vor.u32 1.1754944e-38, %v2694_v30  ;;  %v2707_v23 = vand.u32 2147483647, %v7060_v17  ;;  %4280 = vrcp.f32 %v7090_v43 }
 0x227   : > { %v686_v53 = vmax.f32 %v558_v41, 1e-12  ;;  %v2687_v54 = vadd.f32 %v4273_v24, %v2686_v45  ;;  %v2699_v36 = vmul.f32 %v4277_v44, %v7060_v17  ;;  %v813_v16 = vadd.f32 %v685_v25, %v429_v21  ;;  %v304_v21 = vld [vmem:[%s4501_s17 + $0x2e8] sm:$0xff] }
 0x228   : > { %v4279_v39 = vpop.eup %4278  ;;  %4282 = vlog2.f32 %v2682_v35  ;;  %v1066_v56 = vmul.f32 0.5, %v7032_v37  ;;  %vm2703_vm11 = vweird.f32 %v7060_v17  ;;  %v2709_v57 = vand.u32 2147483648, %v7060_v17 }
 0x229   : > { %v3456_v55 = vmul.f32 0.6931472, %v4279_v39  ;;  %v2691_v60 = vsel %vm7098_vm10, %v4273_v24, %v2687_v54  ;;  %v1196_v0 = vmul.f32 %v7092_v46, %v7092_v46  ;;  %v2700_v2 = vsub.f32 1.0, %v2699_v36 }
 0x22a   : > { %vm2704_vm12 = vweird.f32 %v4277_v44  ;;  %v2696_v3 = vsel %vm7086_vm9, %v2695_v52, %v2691_v60  ;;  %vm7116_vm13 = vcmp.eq.f32.partialorder %v2707_v23, 8.507059e+37  ;;  %v7120_v27 = vmul.f32 %v686_v53, %v430_v49  ;;  %v561_v23 = vld [vmem:[%s4507_s20 + $0x2f0] sm:$0xff] }
 0x22b   : > { %v3625_v58 = vmul.f32 %v3456_v55, %v1065_v31  ;;  %v2697_v6 = vmul.f32 %v2696_v3, %v1195_v19  ;;  %v2701_v7 = vmul.f32 %v4277_v44, %v2700_v2  ;;  %v7122_v50 = vmul.f32 0.5, %v813_v16  ;;  %vm7128_vm15 = vmor %vm2703_vm11, %vm2704_vm12 }
 0x22c   : > { %v431_v9 = vmax.f32 %v303_v59, 1e-12  ;;  %v4281_v5 = vpop.eup %4280  ;;  %v2710_v11 = vor.u32 1.1754944e-38, %v2709_v57  ;;  %v2722_v12 = vand.u32 2147483647, %v7090_v43  ;;  %4284 = vrcp.f32 %v7120_v27 }
 0x22d   : > { %3754 = vst.msk [vmem:[%s4640_s23 + $0x2b0] sm:$0xff] %vm3667_vm14, %v3625_v58  ;;  %v687_v13 = vmax.f32 %v559_v61, 1e-12  ;;  %4286 = vlog2.f32 %v2697_v6  ;;  %v2702_v1 = vadd.f32 %v4277_v44, %v2701_v7  ;;  %v2714_v15 = vmul.f32 %v4281_v5, %v7090_v43 }
 0x22e   : > { %v4283_v14 = vpop.eup %4282  ;;  %v814_v4 = vadd.f32 %v686_v53, %v430_v49  ;;  %v1067_v17 = vmul.f32 0.5, %v7062_v22  ;;  %vm2718_vm0 = vweird.f32 %v7090_v43  ;;  %v2724_v18 = vand.u32 2147483648, %v7090_v43  ;;  %v305_v49 = vld [vmem:[%s4501_s17 + $0x2f0] sm:$0xff] }
 0x22f   : > { %v3458_v8 = vmul.f32 0.6931472, %v4283_v14  ;;  %v2706_v24 = vsel %vm7128_vm15, %v4277_v44, %v2702_v1  ;;  %v1197_v63 = vmul.f32 %v7122_v50, %v7122_v50  ;;  %v2715_v26 = vsub.f32 1.0, %v2714_v15 }
 0x230   : > { %vm2719_vm1 = vweird.f32 %v4281_v5  ;;  %v2711_v51 = vsel %vm7116_vm13, %v2710_v11, %v2706_v24  ;;  %vm7146_vm2 = vcmp.eq.f32.partialorder %v2722_v12, 8.507059e+37  ;;  %v7150_v28 = vmul.f32 %v687_v13, %v431_v9  ;;  %v562_v12 = vld [vmem:[%s4507_s20 + $0x2f8] sm:$0xff] }
 0x231   : > { %v3626_v25 = vmul.f32 %v3458_v8, %v1066_v56  ;;  %v2712_v29 = vmul.f32 %v2711_v51, %v1196_v0  ;;  %v2716_v32 = vmul.f32 %v4281_v5, %v2715_v26  ;;  %v7152_v33 = vmul.f32 0.5, %v814_v4  ;;  %vm7158_vm3 = vmor %vm2718_vm0, %vm2719_vm1 }
 0x232   : > { %v432_v31 = vmax.f32 %v304_v21, 1e-12  ;;  %v4285_v30 = vpop.eup %4284  ;;  %v2725_v62 = vor.u32 1.1754944e-38, %v2724_v18  ;;  %v2737_v19 = vand.u32 2147483647, %v7120_v27  ;;  %4288 = vrcp.f32 %v7150_v28 }
 0x233   : > { %3755 = vst.msk [vmem:[%s4640_s23 + $0x2b8] sm:$0xff] %vm3667_vm14, %v3626_v25  ;;  %v688_v40 = vmax.f32 %v560_v47, 1e-12  ;;  %v4287_v41 = vpop.eup %4286  ;;  %4290 = vlog2.f32 %v2712_v29  ;;  %v2717_v20 = vadd.f32 %v4281_v5, %v2716_v32  ;;  %v2729_v42 = vmul.f32 %v4285_v30, %v7120_v27 }
 0x234   : > { %v815_v34 = vadd.f32 %v687_v13, %v431_v9  ;;  %v3460_v35 = vmul.f32 0.6931472, %v4287_v41  ;;  %v1068_v43 = vmul.f32 0.5, %v7092_v46  ;;  %vm2733_vm4 = vweird.f32 %v7120_v27  ;;  %v306_v9 = vld [vmem:[%s4501_s17 + $0x2f8] sm:$0xff] }
 0x235   : > { %v2739_v45 = vand.u32 2147483648, %v7120_v27  ;;  %v2721_v44 = vsel %vm7158_vm3, %v4281_v5, %v2717_v20  ;;  %v1198_v48 = vmul.f32 %v7152_v33, %v7152_v33  ;;  %v2730_v52 = vsub.f32 1.0, %v2729_v42 }
 0x236   : > { %vm2734_vm5 = vweird.f32 %v4285_v30  ;;  %v3627_v53 = vmul.f32 %v3460_v35, %v1067_v17  ;;  %v2726_v39 = vsel %vm7146_vm2, %v2725_v62, %v2721_v44  ;;  %vm7176_vm6 = vcmp.eq.f32.partialorder %v2737_v19, 8.507059e+37  ;;  %v563_v19 = vld [vmem:[%s4507_s20 + $0x300] sm:$0xff] }
 0x237   : > { %v7180_v54 = vmul.f32 %v688_v40, %v432_v31  ;;  %v2727_v36 = vmul.f32 %v2726_v39, %v1197_v63  ;;  %v2731_v16 = vmul.f32 %v4285_v30, %v2730_v52  ;;  %v7182_v55 = vmul.f32 0.5, %v815_v34  ;;  %vm7188_vm7 = vmor %vm2733_vm4, %vm2734_vm5 }
 0x238   : > { %v433_v56 = vmax.f32 %v305_v49, 1e-12  ;;  %v4289_v57 = vpop.eup %4288  ;;  %3756 = vst.msk [vmem:[%s4640_s23 + $0x2c0] sm:$0xff] %vm3667_vm14, %v3627_v53  ;;  %v2740_v60 = vor.u32 1.1754944e-38, %v2739_v45  ;;  %v2752_v0 = vand.u32 2147483647, %v7150_v28  ;;  %v816_v37 = vadd.f32 %v688_v40, %v432_v31 }
 0x239   : > { %4292 = vrcp.f32 %v7180_v54  ;;  %v689_v2 = vmax.f32 %v561_v23, 1e-12  ;;  %v4291_v61 = vpop.eup %4290  ;;  %v2732_v58 = vadd.f32 %v4285_v30, %v2731_v16  ;;  %v2744_v3 = vmul.f32 %v4289_v57, %v7150_v28  ;;  %v307_v31 = vld [vmem:[%s4501_s17 + $0x300] sm:$0xff] }
 0x23a   : > { %4294 = vlog2.f32 %v2727_v36  ;;  %v3462_v6 = vmul.f32 0.6931472, %v4291_v61  ;;  %v1069_v27 = vmul.f32 0.5, %v7122_v50  ;;  %vm2748_vm8 = vweird.f32 %v7150_v28 }
 0x23b   : > { %v2754_v7 = vand.u32 2147483648, %v7150_v28  ;;  %v2736_v5 = vsel %vm7188_vm7, %v4285_v30, %v2732_v58  ;;  %v1199_v10 = vmul.f32 %v7182_v55, %v7182_v55  ;;  %v2745_v11 = vsub.f32 1.0, %v2744_v3 }
 0x23c   : > { %vm2749_vm9 = vweird.f32 %v4289_v57  ;;  %v3628_v13 = vmul.f32 %v3462_v6, %v1068_v43  ;;  %v2741_v14 = vsel %vm7176_vm6, %v2740_v60, %v2736_v5  ;;  %vm7206_vm10 = vcmp.eq.f32.partialorder %v2752_v0, 8.507059e+37  ;;  %v564_v0 = vld [vmem:[%s4507_s20 + $0x308] sm:$0xff] }
 0x23d   : > { %v7210_v1 = vmul.f32 %v689_v2, %v433_v56  ;;  %v2742_v15 = vmul.f32 %v2741_v14, %v1198_v48  ;;  %v2746_v4 = vmul.f32 %v4289_v57, %v2745_v11  ;;  %v7212_v8 = vmul.f32 0.5, %v816_v37  ;;  %vm7218_vm11 = vmor %vm2748_vm8, %vm2749_vm9 }
 0x23e   : > { %v434_v17 = vmax.f32 %v306_v9, 1e-12  ;;  %3757 = vst.msk [vmem:[%s4640_s23 + $0x2c8] sm:$0xff] %vm3667_vm14, %v3628_v13  ;;  %v2755_v24 = vor.u32 1.1754944e-38, %v2754_v7  ;;  %v2767_v63 = vand.u32 2147483647, %v7180_v54  ;;  %v817_v22 = vadd.f32 %v689_v2, %v433_v56 }
 0x23f   : > { %v4293_v18 = vpop.eup %4292  ;;  %4296 = vrcp.f32 %v7210_v1  ;;  %v690_v26 = vmax.f32 %v562_v12, 1e-12  ;;  %v2747_v25 = vadd.f32 %v4289_v57, %v2746_v4  ;;  %v1070_v28 = vmul.f32 0.5, %v7152_v33  ;;  %v308_v56 = vld [vmem:[%s4501_s17 + $0x308] sm:$0xff] }
 0x240   : > { %v4295_v47 = vpop.eup %4294  ;;  %4298 = vlog2.f32 %v2742_v15  ;;  %v2759_v51 = vmul.f32 %v4293_v18, %v7180_v54  ;;  %vm2763_vm12 = vweird.f32 %v7180_v54  ;;  %v2769_v32 = vand.u32 2147483648, %v7180_v54 }
 0x241   : > { %v3464_v29 = vmul.f32 0.6931472, %v4295_v47  ;;  %v2751_v30 = vsel %vm7218_vm11, %v4289_v57, %v2747_v25  ;;  %v1200_v38 = vmul.f32 %v7212_v8, %v7212_v8  ;;  %vm2764_vm13 = vweird.f32 %v4293_v18 }
 0x242   : > { %v2760_v62 = vsub.f32 1.0, %v2759_v51  ;;  %v2756_v41 = vsel %vm7206_vm10, %v2755_v24, %v2751_v30  ;;  %vm7236_vm15 = vcmp.eq.f32.partialorder %v2767_v63, 8.507059e+37  ;;  %v7240_v20 = vmul.f32 %v690_v26, %v434_v17  ;;  %vm7248_vm0 = vmor %vm2763_vm12, %vm2764_vm13  ;;  %v565_v63 = vld [vmem:[%s4507_s20 + $0x310] sm:$0xff] }
 0x243   : > { %v3629_v40 = vmul.f32 %v3464_v29, %v1069_v27  ;;  %v2757_v42 = vmul.f32 %v2756_v41, %v1199_v10  ;;  %v7242_v35 = vmul.f32 0.5, %v817_v22  ;;  %v435_v43 = vmax.f32 %v307_v31, 1e-12 }
 0x244   : > { %v2761_v34 = vmul.f32 %v4293_v18, %v2760_v62  ;;  %v2770_v44 = vor.u32 1.1754944e-38, %v2769_v32  ;;  %v2782_v48 = vand.u32 2147483647, %v7210_v1  ;;  %4300 = vrcp.f32 %v7240_v20 }
 0x245   : > { %v4297_v45 = vpop.eup %4296  ;;  %3758 = vst.msk [vmem:[%s4640_s23 + $0x2d0] sm:$0xff] %vm3667_vm14, %v3629_v40  ;;  %v691_v52 = vmax.f32 %v563_v19, 1e-12  ;;  %4302 = vlog2.f32 %v2757_v42  ;;  %v818_v46 = vadd.f32 %v690_v26, %v434_v17  ;;  %v1071_v54 = vmul.f32 0.5, %v7182_v55  ;;  %v309_v17 = vld [vmem:[%s4501_s17 + $0x310] sm:$0xff] }
 0x246   : > { %v4299_v23 = vpop.eup %4298  ;;  %v2762_v53 = vadd.f32 %v4293_v18, %v2761_v34  ;;  %v2774_v39 = vmul.f32 %v4297_v45, %v7210_v1  ;;  %vm2778_vm1 = vweird.f32 %v7210_v1  ;;  %v2784_v16 = vand.u32 2147483648, %v7210_v1 }
 0x247   : > { %v3466_v36 = vmul.f32 0.6931472, %v4299_v23  ;;  %v1201_v59 = vmul.f32 %v7242_v35, %v7242_v35  ;;  %vm2779_vm2 = vweird.f32 %v4297_v45  ;;  %vm7266_vm3 = vcmp.eq.f32.partialorder %v2782_v48, 8.507059e+37  ;;  %v566_v48 = vld [vmem:[%s4507_s20 + $0x318] sm:$0xff] }
 0x248   : > { %v2766_v57 = vsel %vm7248_vm0, %v4293_v18, %v2762_v53  ;;  %v2775_v60 = vsub.f32 1.0, %v2774_v39  ;;  %v7270_v58 = vmul.f32 %v691_v52, %v435_v43  ;;  %v7272_v6 = vmul.f32 0.5, %v818_v46  ;;  %vm7278_vm4 = vmor %vm2778_vm1, %vm2779_vm2 }
 0x249   : > { %v3630_v2 = vmul.f32 %v3466_v36, %v1070_v28  ;;  %v2771_v61 = vsel %vm7236_vm15, %v2770_v44, %v2766_v57  ;;  %v436_v27 = vmax.f32 %v308_v56, 1e-12  ;;  %v2785_v5 = vor.u32 1.1754944e-38, %v2784_v16 }
 0x24a   : > { %v2772_v3 = vmul.f32 %v2771_v61, %v1200_v38  ;;  %v2776_v37 = vmul.f32 %v4297_v45, %v2775_v60  ;;  %v4301_v7 = vpop.eup %4300  ;;  %v2797_v10 = vand.u32 2147483647, %v7240_v20  ;;  %4304 = vrcp.f32 %v7270_v58 }
 0x24b   : > { %3759 = vst.msk [vmem:[%s4640_s23 + $0x2d8] sm:$0xff] %vm3667_vm14, %v3630_v2  ;;  %v692_v11 = vmax.f32 %v564_v0, 1e-12  ;;  %v4303_v12 = vpop.eup %4302  ;;  %v2789_v14 = vmul.f32 %v4301_v7, %v7240_v20  ;;  %v819_v50 = vadd.f32 %v691_v52, %v435_v43  ;;  %v1072_v1 = vmul.f32 0.5, %v7212_v8  ;;  %v310_v43 = vld [vmem:[%s4501_s17 + $0x318] sm:$0xff] }
 0x24c   : > { %4306 = vlog2.f32 %v2772_v3  ;;  %v2777_v13 = vadd.f32 %v4297_v45, %v2776_v37  ;;  %v3468_v15 = vmul.f32 0.6931472, %v4303_v12  ;;  %vm2793_vm5 = vweird.f32 %v7240_v20 }
 0x24d   : > { %v2799_v4 = vand.u32 2147483648, %v7240_v20  ;;  %v1202_v21 = vmul.f32 %v7272_v6, %v7272_v6  ;;  %v2790_v24 = vsub.f32 1.0, %v2789_v14  ;;  %vm2794_vm6 = vweird.f32 %v4301_v7 }
 0x24e   : > { %v2781_v18 = vsel %vm7278_vm4, %v4297_v45, %v2777_v13  ;;  %v3631_v26 = vmul.f32 %v3468_v15, %v1071_v54  ;;  %vm7296_vm7 = vcmp.eq.f32.partialorder %v2797_v10, 8.507059e+37  ;;  %v7300_v25 = vmul.f32 %v692_v11, %v436_v27  ;;  %vm7308_vm8 = vmor %vm2793_vm5, %vm2794_vm6  ;;  %v567_v10 = vld [vmem:[%s4507_s20 + $0x320] sm:$0xff] }
 0x24f   : > { %v2786_v47 = vsel %vm7266_vm3, %v2785_v5, %v2781_v18  ;;  %v2791_v22 = vmul.f32 %v4301_v7, %v2790_v24  ;;  %v7302_v29 = vmul.f32 0.5, %v819_v50  ;;  %v437_v28 = vmax.f32 %v309_v17, 1e-12 }
 0x250   : > { %v2787_v51 = vmul.f32 %v2786_v47, %v1201_v59  ;;  %v4305_v32 = vpop.eup %4304  ;;  %3760 = vst.msk [vmem:[%s4640_s23 + $0x2e0] sm:$0xff] %vm3667_vm14, %v3631_v26  ;;  %v2800_v30 = vor.u32 1.1754944e-38, %v2799_v4  ;;  %v2812_v38 = vand.u32 2147483647, %v7270_v58  ;;  %4308 = vrcp.f32 %v7300_v25 }
 0x251   : > { %v693_v62 = vmax.f32 %v565_v63, 1e-12  ;;  %v2792_v40 = vadd.f32 %v4301_v7, %v2791_v22  ;;  %v2804_v41 = vmul.f32 %v4305_v32, %v7270_v58  ;;  %v820_v33 = vadd.f32 %v692_v11, %v436_v27  ;;  %v311_v27 = vld [vmem:[%s4501_s17 + $0x320] sm:$0xff] }
 0x252   : > { %v4307_v19 = vpop.eup %4306  ;;  %4310 = vlog2.f32 %v2787_v51  ;;  %v1073_v20 = vmul.f32 0.5, %v7242_v35  ;;  %vm2808_vm9 = vweird.f32 %v7270_v58  ;;  %v2814_v34 = vand.u32 2147483648, %v7270_v58 }
 0x253   : > { %v3470_v42 = vmul.f32 0.6931472, %v4307_v19  ;;  %v2796_v45 = vsel %vm7308_vm8, %v4301_v7, %v2792_v40  ;;  %v1203_v49 = vmul.f32 %v7302_v29, %v7302_v29  ;;  %v2805_v44 = vsub.f32 1.0, %v2804_v41 }
 0x254   : > { %vm2809_vm10 = vweird.f32 %v4305_v32  ;;  %v2801_v23 = vsel %vm7296_vm7, %v2800_v30, %v2796_v45  ;;  %vm7326_vm11 = vcmp.eq.f32.partialorder %v2812_v38, 8.507059e+37  ;;  %v7330_v53 = vmul.f32 %v693_v62, %v437_v28  ;;  %v568_v38 = vld [vmem:[%s4507_s20 + $0x328] sm:$0xff] }
 0x255   : > { %v3632_v52 = vmul.f32 %v3470_v42, %v1072_v1  ;;  %v2802_v39 = vmul.f32 %v2801_v23, %v1202_v21  ;;  %v2806_v46 = vmul.f32 %v4305_v32, %v2805_v44  ;;  %v7332_v36 = vmul.f32 0.5, %v820_v33  ;;  %vm7338_vm12 = vmor %vm2808_vm9, %vm2809_vm10 }
 0x256   : > { %v438_v54 = vmax.f32 %v310_v43, 1e-12  ;;  %v4309_v16 = vpop.eup %4308  ;;  %v2815_v57 = vor.u32 1.1754944e-38, %v2814_v34  ;;  %v2827_v59 = vand.u32 2147483647, %v7300_v25  ;;  %4312 = vrcp.f32 %v7330_v53 }
 0x257   : > { %3761 = vst.msk [vmem:[%s4640_s23 + $0x2e8] sm:$0xff] %vm3667_vm14, %v3632_v52  ;;  %v694_v60 = vmax.f32 %v566_v48, 1e-12  ;;  %4314 = vlog2.f32 %v2802_v39  ;;  %v2807_v2 = vadd.f32 %v4305_v32, %v2806_v46  ;;  %v2819_v61 = vmul.f32 %v4309_v16, %v7300_v25 }
 0x258   : > { %v4311_v0 = vpop.eup %4310  ;;  %v821_v55 = vadd.f32 %v693_v62, %v437_v28  ;;  %v1074_v58 = vmul.f32 0.5, %v7272_v6  ;;  %vm2823_vm13 = vweird.f32 %v7300_v25  ;;  %v2829_v37 = vand.u32 2147483648, %v7300_v25  ;;  %v312_v28 = vld [vmem:[%s4501_s17 + $0x328] sm:$0xff] }
 0x259   : > { %v3472_v3 = vmul.f32 0.6931472, %v4311_v0  ;;  %v2811_v7 = vsel %vm7338_vm12, %v4305_v32, %v2807_v2  ;;  %v1204_v9 = vmul.f32 %v7332_v36, %v7332_v36  ;;  %v2820_v5 = vsub.f32 1.0, %v2819_v61 }
 0x25a   : > { %vm2824_vm15 = vweird.f32 %v4309_v16  ;;  %v2816_v12 = vsel %vm7326_vm11, %v2815_v57, %v2811_v7  ;;  %vm7356_vm0 = vcmp.eq.f32.partialorder %v2827_v59, 8.507059e+37  ;;  %v7360_v13 = vmul.f32 %v694_v60, %v438_v54  ;;  %v569_v59 = vld [vmem:[%s4507_s20 + $0x330] sm:$0xff] }
 0x25b   : > { %v3633_v11 = vmul.f32 %v3472_v3, %v1073_v20  ;;  %v2817_v14 = vmul.f32 %v2816_v12, %v1203_v49  ;;  %v2821_v50 = vmul.f32 %v4309_v16, %v2820_v5  ;;  %v7362_v15 = vmul.f32 0.5, %v821_v55  ;;  %vm7368_vm1 = vmor %vm2823_vm13, %vm2824_vm15 }
 0x25c   : > { %v439_v1 = vmax.f32 %v311_v27, 1e-12  ;;  %v4313_v4 = vpop.eup %4312  ;;  %v2830_v18 = vor.u32 1.1754944e-38, %v2829_v37  ;;  %v2842_v21 = vand.u32 2147483647, %v7330_v53  ;;  %4316 = vrcp.f32 %v7360_v13 }
 0x25d   : > { %3762 = vst.msk [vmem:[%s4640_s23 + $0x2f0] sm:$0xff] %vm3667_vm14, %v3633_v11  ;;  %v695_v24 = vmax.f32 %v567_v10, 1e-12  ;;  %v4315_v63 = vpop.eup %4314  ;;  %4318 = vlog2.f32 %v2817_v14  ;;  %v2822_v26 = vadd.f32 %v4309_v16, %v2821_v50  ;;  %v2834_v47 = vmul.f32 %v4313_v4, %v7330_v53 }
 0x25e   : > { %v822_v8 = vadd.f32 %v694_v60, %v438_v54  ;;  %v3474_v51 = vmul.f32 0.6931472, %v4315_v63  ;;  %v1075_v25 = vmul.f32 0.5, %v7302_v29  ;;  %vm2838_vm2 = vweird.f32 %v7330_v53  ;;  %v313_v54 = vld [vmem:[%s4501_s17 + $0x330] sm:$0xff] }
 0x25f   : > { %v2844_v22 = vand.u32 2147483648, %v7330_v53  ;;  %v2826_v32 = vsel %vm7368_vm1, %v4309_v16, %v2822_v26  ;;  %v1205_v31 = vmul.f32 %v7362_v15, %v7362_v15  ;;  %v2835_v30 = vsub.f32 1.0, %v2834_v47 }
 0x260   : > { %vm2839_vm3 = vweird.f32 %v4313_v4  ;;  %v3634_v62 = vmul.f32 %v3474_v51, %v1074_v58  ;;  %v2831_v19 = vsel %vm7356_vm0, %v2830_v18, %v2826_v32  ;;  %vm7386_vm4 = vcmp.eq.f32.partialorder %v2842_v21, 8.507059e+37  ;;  %v570_v21 = vld [vmem:[%s4507_s20 + $0x338] sm:$0xff] }
 0x261   : > { %v7390_v40 = vmul.f32 %v695_v24, %v439_v1  ;;  %v2832_v41 = vmul.f32 %v2831_v19, %v1204_v9  ;;  %v2836_v33 = vmul.f32 %v4313_v4, %v2835_v30  ;;  %v7392_v42 = vmul.f32 0.5, %v822_v8  ;;  %vm7398_vm5 = vmor %vm2838_vm2, %vm2839_vm3 }
 0x262   : > { %v440_v20 = vmax.f32 %v312_v28, 1e-12  ;;  %v4317_v34 = vpop.eup %4316  ;;  %3763 = vst.msk [vmem:[%s4640_s23 + $0x2f8] sm:$0xff] %vm3667_vm14, %v3634_v62  ;;  %v2845_v45 = vor.u32 1.1754944e-38, %v2844_v22  ;;  %v2857_v49 = vand.u32 2147483647, %v7360_v13  ;;  %v823_v35 = vadd.f32 %v695_v24, %v439_v1 }
 0x263   : > { %4320 = vrcp.f32 %v7390_v40  ;;  %v696_v44 = vmax.f32 %v568_v38, 1e-12  ;;  %v4319_v48 = vpop.eup %4318  ;;  %v2837_v52 = vadd.f32 %v4313_v4, %v2836_v33  ;;  %v2849_v23 = vmul.f32 %v4317_v34, %v7360_v13  ;;  %v314_v1 = vld [vmem:[%s4501_s17 + $0x338] sm:$0xff] }
 0x264   : > { %4322 = vlog2.f32 %v2832_v41  ;;  %v3476_v39 = vmul.f32 0.6931472, %v4319_v48  ;;  %v1076_v53 = vmul.f32 0.5, %v7332_v36  ;;  %vm2853_vm6 = vweird.f32 %v7360_v13 }
 0x265   : > { %v2859_v46 = vand.u32 2147483648, %v7360_v13  ;;  %v2841_v16 = vsel %vm7398_vm5, %v4313_v4, %v2837_v52  ;;  %v1206_v56 = vmul.f32 %v7392_v42, %v7392_v42  ;;  %v2850_v57 = vsub.f32 1.0, %v2849_v23 }
 0x266   : > { %vm2854_vm7 = vweird.f32 %v4317_v34  ;;  %v3635_v60 = vmul.f32 %v3476_v39, %v1075_v25  ;;  %v2846_v0 = vsel %vm7386_vm4, %v2845_v45, %v2841_v16  ;;  %vm7416_vm8 = vcmp.eq.f32.partialorder %v2857_v49, 8.507059e+37  ;;  %v571_v49 = vld [vmem:[%s4507_s20 + $0x340] sm:$0xff] }
 0x267   : > { %v7420_v2 = vmul.f32 %v696_v44, %v440_v20  ;;  %v2847_v61 = vmul.f32 %v2846_v0, %v1205_v31  ;;  %v2851_v55 = vmul.f32 %v4317_v34, %v2850_v57  ;;  %v7422_v3 = vmul.f32 0.5, %v823_v35  ;;  %vm7428_vm9 = vmor %vm2853_vm6, %vm2854_vm7 }
 0x268   : > { %v441_v58 = vmax.f32 %v313_v54, 1e-12  ;;  %3764 = vst.msk [vmem:[%s4640_s23 + $0x300] sm:$0xff] %vm3667_vm14, %v3635_v60  ;;  %v2860_v7 = vor.u32 1.1754944e-38, %v2859_v46  ;;  %v2872_v9 = vand.u32 2147483647, %v7390_v40  ;;  %v824_v6 = vadd.f32 %v696_v44, %v440_v20 }
 0x269   : > { %v4321_v37 = vpop.eup %4320  ;;  %4324 = vrcp.f32 %v7420_v2  ;;  %v697_v5 = vmax.f32 %v569_v59, 1e-12  ;;  %v2852_v11 = vadd.f32 %v4317_v34, %v2851_v55  ;;  %v1077_v13 = vmul.f32 0.5, %v7362_v15  ;;  %v315_v20 = vld [vmem:[%s4501_s17 + $0x340] sm:$0xff] }
 0x26a   : > { %v4323_v10 = vpop.eup %4322  ;;  %4326 = vlog2.f32 %v2847_v61  ;;  %v2864_v12 = vmul.f32 %v4321_v37, %v7390_v40  ;;  %vm2868_vm10 = vweird.f32 %v7390_v40  ;;  %v2874_v50 = vand.u32 2147483648, %v7390_v40 }
 0x26b   : > { %v3478_v14 = vmul.f32 0.6931472, %v4323_v10  ;;  %v2856_v4 = vsel %vm7428_vm9, %v4317_v34, %v2852_v11  ;;  %v1207_v17 = vmul.f32 %v7422_v3, %v7422_v3  ;;  %vm2869_vm11 = vweird.f32 %v4321_v37 }
 0x26c   : > { %v2865_v18 = vsub.f32 1.0, %v2864_v12  ;;  %v2861_v63 = vsel %vm7416_vm8, %v2860_v7, %v2856_v4  ;;  %vm7446_vm12 = vcmp.eq.f32.partialorder %v2872_v9, 8.507059e+37  ;;  %v7450_v26 = vmul.f32 %v697_v5, %v441_v58  ;;  %vm7458_vm13 = vmor %vm2868_vm10, %vm2869_vm11  ;;  %v572_v9 = vld [vmem:[%s4507_s20 + $0x348] sm:$0xff] }
 0x26d   : > { %v3636_v24 = vmul.f32 %v3478_v14, %v1076_v53  ;;  %v2862_v47 = vmul.f32 %v2861_v63, %v1206_v56  ;;  %v7452_v51 = vmul.f32 0.5, %v824_v6  ;;  %v442_v25 = vmax.f32 %v314_v1, 1e-12 }
 0x26e   : > { %v2866_v8 = vmul.f32 %v4321_v37, %v2865_v18  ;;  %v2875_v32 = vor.u32 1.1754944e-38, %v2874_v50  ;;  %v2887_v31 = vand.u32 2147483647, %v7420_v2  ;;  %4328 = vrcp.f32 %v7450_v26 }
 0x26f   : > { %v4325_v22 = vpop.eup %4324  ;;  %3765 = vst.msk [vmem:[%s4640_s23 + $0x308] sm:$0xff] %vm3667_vm14, %v3636_v24  ;;  %v698_v30 = vmax.f32 %v570_v21, 1e-12  ;;  %4330 = vlog2.f32 %v2862_v47  ;;  %v825_v29 = vadd.f32 %v697_v5, %v441_v58  ;;  %v1078_v40 = vmul.f32 0.5, %v7392_v42  ;;  %v316_v58 = vld [vmem:[%s4501_s17 + $0x348] sm:$0xff] }
 0x270   : > { %v4327_v38 = vpop.eup %4326  ;;  %v2867_v62 = vadd.f32 %v4321_v37, %v2866_v8  ;;  %v2879_v19 = vmul.f32 %v4325_v22, %v7420_v2  ;;  %vm2883_vm15 = vweird.f32 %v7420_v2  ;;  %v2889_v33 = vand.u32 2147483648, %v7420_v2 }
 0x271   : > { %v3480_v41 = vmul.f32 0.6931472, %v4327_v38  ;;  %v1208_v43 = vmul.f32 %v7452_v51, %v7452_v51  ;;  %vm2884_vm0 = vweird.f32 %v4325_v22  ;;  %vm7476_vm1 = vcmp.eq.f32.partialorder %v2887_v31, 8.507059e+37  ;;  %v573_v31 = vld [vmem:[%s4507_s20 + $0x350] sm:$0xff] }
 0x272   : > { %v2871_v34 = vsel %vm7458_vm13, %v4321_v37, %v2867_v62  ;;  %v2880_v45 = vsub.f32 1.0, %v2879_v19  ;;  %v7480_v52 = vmul.f32 %v698_v30, %v442_v25  ;;  %v7482_v39 = vmul.f32 0.5, %v825_v29  ;;  %vm7488_vm2 = vmor %vm2883_vm15, %vm2884_vm0 }
 0x273   : > { %v3637_v44 = vmul.f32 %v3480_v41, %v1077_v13  ;;  %v2876_v48 = vsel %vm7446_vm12, %v2875_v32, %v2871_v34  ;;  %v443_v53 = vmax.f32 %v315_v20, 1e-12  ;;  %v2890_v16 = vor.u32 1.1754944e-38, %v2889_v33 }
 0x274   : > { %v2877_v23 = vmul.f32 %v2876_v48, %v1207_v17  ;;  %v2881_v35 = vmul.f32 %v4325_v22, %v2880_v45  ;;  %v4329_v46 = vpop.eup %4328  ;;  %v2902_v56 = vand.u32 2147483647, %v7450_v26  ;;  %4332 = vrcp.f32 %v7480_v52 }
 0x275   : > { %3766 = vst.msk [vmem:[%s4640_s23 + $0x310] sm:$0xff] %vm3667_vm14, %v3637_v44  ;;  %v699_v57 = vmax.f32 %v571_v49, 1e-12  ;;  %v4331_v59 = vpop.eup %4330  ;;  %v2894_v0 = vmul.f32 %v4329_v46, %v7450_v26  ;;  %v826_v36 = vadd.f32 %v698_v30, %v442_v25  ;;  %v1079_v2 = vmul.f32 0.5, %v7422_v3  ;;  %v317_v25 = vld [vmem:[%s4501_s17 + $0x350] sm:$0xff] }
 0x276   : > { %4334 = vlog2.f32 %v2877_v23  ;;  %v2882_v60 = vadd.f32 %v4325_v22, %v2881_v35  ;;  %v3482_v61 = vmul.f32 0.6931472, %v4331_v59  ;;  %vm2898_vm3 = vweird.f32 %v7450_v26 }
 0x277   : > { %v2904_v55 = vand.u32 2147483648, %v7450_v26  ;;  %v1209_v27 = vmul.f32 %v7482_v39, %v7482_v39  ;;  %v2895_v7 = vsub.f32 1.0, %v2894_v0  ;;  %vm2899_vm4 = vweird.f32 %v4329_v46 }
 0x278   : > { %v2886_v37 = vsel %vm7488_vm2, %v4325_v22, %v2882_v60  ;;  %v3638_v5 = vmul.f32 %v3482_v61, %v1078_v40  ;;  %vm7506_vm5 = vcmp.eq.f32.partialorder %v2902_v56, 8.507059e+37  ;;  %v7510_v11 = vmul.f32 %v699_v57, %v443_v53  ;;  %vm7518_vm6 = vmor %vm2898_vm3, %vm2899_vm4  ;;  %v574_v56 = vld [vmem:[%s4507_s20 + $0x358] sm:$0xff] }
 0x279   : > { %v2891_v10 = vsel %vm7476_vm1, %v2890_v16, %v2886_v37  ;;  %v2896_v6 = vmul.f32 %v4329_v46, %v2895_v7  ;;  %v7512_v14 = vmul.f32 0.5, %v826_v36  ;;  %v444_v13 = vmax.f32 %v316_v58, 1e-12 }
 0x27a   : > { %v2892_v12 = vmul.f32 %v2891_v10, %v1208_v43  ;;  %v4333_v50 = vpop.eup %4332  ;;  %3767 = vst.msk [vmem:[%s4640_s23 + $0x318] sm:$0xff] %vm3667_vm14, %v3638_v5  ;;  %v2905_v4 = vor.u32 1.1754944e-38, %v2904_v55  ;;  %v2917_v17 = vand.u32 2147483647, %v7480_v52  ;;  %4336 = vrcp.f32 %v7510_v11 }
 0x27b   : > { %v700_v18 = vmax.f32 %v572_v9, 1e-12  ;;  %v2897_v24 = vadd.f32 %v4329_v46, %v2896_v6  ;;  %v2909_v63 = vmul.f32 %v4333_v50, %v7480_v52  ;;  %v827_v15 = vadd.f32 %v699_v57, %v443_v53  ;;  %v318_v53 = vld [vmem:[%s4501_s17 + $0x358] sm:$0xff] }
 0x27c   : > { %v4335_v21 = vpop.eup %4334  ;;  %4338 = vlog2.f32 %v2892_v12  ;;  %v1080_v26 = vmul.f32 0.5, %v7452_v51  ;;  %vm2913_vm7 = vweird.f32 %v7480_v52  ;;  %v2919_v8 = vand.u32 2147483648, %v7480_v52 }
 0x27d   : > { %v3484_v47 = vmul.f32 0.6931472, %v4335_v21  ;;  %v2901_v22 = vsel %vm7518_vm6, %v4329_v46, %v2897_v24  ;;  %v1210_v28 = vmul.f32 %v7512_v14, %v7512_v14  ;;  %v2910_v32 = vsub.f32 1.0, %v2909_v63 }
 0x27e   : > { %vm2914_vm8 = vweird.f32 %v4333_v50  ;;  %v2906_v38 = vsel %vm7506_vm5, %v2905_v4, %v2901_v22  ;;  %vm7536_vm9 = vcmp.eq.f32.partialorder %v2917_v17, 8.507059e+37  ;;  %v7540_v62 = vmul.f32 %v700_v18, %v444_v13  ;;  %v575_v17 = vld [vmem:[%s4507_s20 + $0x360] sm:$0xff] }
 0x27f   : > { %v3639_v30 = vmul.f32 %v3484_v47, %v1079_v2  ;;  %v2907_v19 = vmul.f32 %v2906_v38, %v1209_v27  ;;  %v2911_v29 = vmul.f32 %v4333_v50, %v2910_v32  ;;  %v7542_v41 = vmul.f32 0.5, %v827_v15  ;;  %vm7548_vm10 = vmor %vm2913_vm7, %vm2914_vm8 }
 0x280   : > { %v445_v40 = vmax.f32 %v317_v25, 1e-12  ;;  %v4337_v33 = vpop.eup %4336  ;;  %v2920_v34 = vor.u32 1.1754944e-38, %v2919_v8  ;;  %v2932_v43 = vand.u32 2147483647, %v7510_v11  ;;  %4340 = vrcp.f32 %v7540_v62 }
 0x281   : > { %3768 = vst.msk [vmem:[%s4640_s23 + $0x320] sm:$0xff] %vm3667_vm14, %v3639_v30  ;;  %v701_v45 = vmax.f32 %v573_v31, 1e-12  ;;  %4342 = vlog2.f32 %v2907_v19  ;;  %v2912_v44 = vadd.f32 %v4333_v50, %v2911_v29  ;;  %v2924_v48 = vmul.f32 %v4337_v33, %v7510_v11 }
 0x282   : > { %v4339_v49 = vpop.eup %4338  ;;  %v828_v42 = vadd.f32 %v700_v18, %v444_v13  ;;  %v1081_v52 = vmul.f32 0.5, %v7482_v39  ;;  %vm2928_vm11 = vweird.f32 %v7510_v11  ;;  %v2934_v35 = vand.u32 2147483648, %v7510_v11  ;;  %v319_v13 = vld [vmem:[%s4501_s17 + $0x360] sm:$0xff] }
 0x283   : > { %v3486_v23 = vmul.f32 0.6931472, %v4339_v49  ;;  %v2916_v46 = vsel %vm7548_vm10, %v4333_v50, %v2912_v44  ;;  %v1211_v54 = vmul.f32 %v7542_v41, %v7542_v41  ;;  %v2925_v16 = vsub.f32 1.0, %v2924_v48 }
 0x284   : > { %vm2929_vm12 = vweird.f32 %v4337_v33  ;;  %v2921_v59 = vsel %vm7536_vm9, %v2920_v34, %v2916_v46  ;;  %vm7566_vm13 = vcmp.eq.f32.partialorder %v2932_v43, 8.507059e+37  ;;  %v7570_v60 = vmul.f32 %v701_v45, %v445_v40  ;;  %v576_v43 = vld [vmem:[%s4507_s20 + $0x368] sm:$0xff] }
 0x285   : > { %v3640_v57 = vmul.f32 %v3486_v23, %v1080_v26  ;;  %v2922_v0 = vmul.f32 %v2921_v59, %v1210_v28  ;;  %v2926_v36 = vmul.f32 %v4337_v33, %v2925_v16  ;;  %v7572_v61 = vmul.f32 0.5, %v828_v42  ;;  %vm7578_vm15 = vmor %vm2928_vm11, %vm2929_vm12 }
 0x286   : > { %v446_v2 = vmax.f32 %v318_v53, 1e-12  ;;  %v4341_v55 = vpop.eup %4340  ;;  %v2935_v37 = vor.u32 1.1754944e-38, %v2934_v35  ;;  %v2947_v27 = vand.u32 2147483647, %v7540_v62  ;;  %4344 = vrcp.f32 %v7570_v60 }
 0x287   : > { %3769 = vst.msk [vmem:[%s4640_s23 + $0x328] sm:$0xff] %vm3667_vm14, %v3640_v57  ;;  %v702_v7 = vmax.f32 %v574_v56, 1e-12  ;;  %v4343_v9 = vpop.eup %4342  ;;  %4346 = vlog2.f32 %v2922_v0  ;;  %v2927_v5 = vadd.f32 %v4337_v33, %v2926_v36  ;;  %v2939_v10 = vmul.f32 %v4341_v55, %v7540_v62 }
 0x288   : > { %v829_v3 = vadd.f32 %v701_v45, %v445_v40  ;;  %v3488_v12 = vmul.f32 0.6931472, %v4343_v9  ;;  %v1082_v11 = vmul.f32 0.5, %v7512_v14  ;;  %vm2943_vm0 = vweird.f32 %v7540_v62  ;;  %v320_v40 = vld [vmem:[%s4501_s17 + $0x368] sm:$0xff] }
 0x289   : > { %v2949_v6 = vand.u32 2147483648, %v7540_v62  ;;  %v2931_v50 = vsel %vm7578_vm15, %v4337_v33, %v2927_v5  ;;  %v1212_v1 = vmul.f32 %v7572_v61, %v7572_v61  ;;  %v2940_v4 = vsub.f32 1.0, %v2939_v10 }
 0x28a   : > { %vm2944_vm1 = vweird.f32 %v4341_v55  ;;  %v3641_v18 = vmul.f32 %v3488_v12, %v1081_v52  ;;  %v2936_v21 = vsel %vm7566_vm13, %v2935_v37, %v2931_v50  ;;  %vm7596_vm2 = vcmp.eq.f32.partialorder %v2947_v27, 8.507059e+37  ;;  %v577_v27 = vld [vmem:[%s4507_s20 + $0x370] sm:$0xff] }
 0x28b   : > { %v7600_v24 = vmul.f32 %v702_v7, %v446_v2  ;;  %v2937_v63 = vmul.f32 %v2936_v21, %v1211_v54  ;;  %v2941_v15 = vmul.f32 %v4341_v55, %v2940_v4  ;;  %v7602_v47 = vmul.f32 0.5, %v829_v3  ;;  %vm7608_vm3 = vmor %vm2943_vm0, %vm2944_vm1 }
 0x28c   : > { %v447_v26 = vmax.f32 %v319_v13, 1e-12  ;;  %v4345_v8 = vpop.eup %4344  ;;  %3770 = vst.msk [vmem:[%s4640_s23 + $0x330] sm:$0xff] %vm3667_vm14, %v3641_v18  ;;  %v2950_v22 = vor.u32 1.1754944e-38, %v2949_v6  ;;  %v2962_v28 = vand.u32 2147483647, %v7570_v60  ;;  %v830_v51 = vadd.f32 %v702_v7, %v446_v2 }
 0x28d   : > { %4348 = vrcp.f32 %v7600_v24  ;;  %v703_v32 = vmax.f32 %v575_v17, 1e-12  ;;  %v4347_v31 = vpop.eup %4346  ;;  %v2942_v30 = vadd.f32 %v4341_v55, %v2941_v15  ;;  %v2954_v38 = vmul.f32 %v4345_v8, %v7570_v60  ;;  %v321_v2 = vld [vmem:[%s4501_s17 + $0x370] sm:$0xff] }
 0x28e   : > { %4350 = vlog2.f32 %v2937_v63  ;;  %v3490_v19 = vmul.f32 0.6931472, %v4347_v31  ;;  %v1083_v62 = vmul.f32 0.5, %v7542_v41  ;;  %vm2958_vm4 = vweird.f32 %v7570_v60 }
 0x28f   : > { %v2964_v29 = vand.u32 2147483648, %v7570_v60  ;;  %v2946_v33 = vsel %vm7608_vm3, %v4341_v55, %v2942_v30  ;;  %v1213_v20 = vmul.f32 %v7602_v47, %v7602_v47  ;;  %v2955_v34 = vsub.f32 1.0, %v2954_v38 }
 0x290   : > { %vm2959_vm5 = vweird.f32 %v4345_v8  ;;  %v3642_v45 = vmul.f32 %v3490_v19, %v1082_v11  ;;  %v2951_v49 = vsel %vm7596_vm2, %v2950_v22, %v2946_v33  ;;  %vm7626_vm6 = vcmp.eq.f32.partialorder %v2962_v28, 8.507059e+37  ;;  %v578_v28 = vld [vmem:[%s4507_s20 + $0x378] sm:$0xff] }
 0x291   : > { %v7630_v44 = vmul.f32 %v703_v32, %v447_v26  ;;  %v2952_v48 = vmul.f32 %v2951_v49, %v1212_v1  ;;  %v2956_v42 = vmul.f32 %v4345_v8, %v2955_v34  ;;  %v7632_v23 = vmul.f32 0.5, %v830_v51  ;;  %vm7638_vm7 = vmor %vm2958_vm4, %vm2959_vm5 }
 0x292   : > { %v448_v52 = vmax.f32 %v320_v40, 1e-12  ;;  %3771 = vst.msk [vmem:[%s4640_s23 + $0x338] sm:$0xff] %vm3667_vm14, %v3642_v45  ;;  %v2965_v46 = vor.u32 1.1754944e-38, %v2964_v29  ;;  %v2977_v54 = vand.u32 2147483647, %v7600_v24  ;;  %v831_v39 = vadd.f32 %v703_v32, %v447_v26 }
 0x293   : > { %v4349_v35 = vpop.eup %4348  ;;  %4352 = vrcp.f32 %v7630_v44  ;;  %v704_v16 = vmax.f32 %v576_v43, 1e-12  ;;  %v2957_v57 = vadd.f32 %v4345_v8, %v2956_v42  ;;  %v1084_v60 = vmul.f32 0.5, %v7572_v61  ;;  %v322_v26 = vld [vmem:[%s4501_s17 + $0x378] sm:$0xff] }
 0x294   : > { %v4351_v56 = vpop.eup %4350  ;;  %4354 = vlog2.f32 %v2952_v48  ;;  %v2969_v59 = vmul.f32 %v4349_v35, %v7600_v24  ;;  %vm2973_vm8 = vweird.f32 %v7600_v24  ;;  %v2979_v36 = vand.u32 2147483648, %v7600_v24 }
 0x295   : > { %v3492_v0 = vmul.f32 0.6931472, %v4351_v56  ;;  %v2961_v55 = vsel %vm7638_vm7, %v4345_v8, %v2957_v57  ;;  %v1214_v58 = vmul.f32 %v7632_v23, %v7632_v23  ;;  %vm2974_vm9 = vweird.f32 %v4349_v35 }
 0x296   : > { %v2970_v37 = vsub.f32 1.0, %v2969_v59  ;;  %v2966_v9 = vsel %vm7626_vm6, %v2965_v46, %v2961_v55  ;;  %vm7656_vm10 = vcmp.eq.f32.partialorder %v2977_v54, 8.507059e+37  ;;  %v7660_v5 = vmul.f32 %v704_v16, %v448_v52  ;;  %vm7668_vm11 = vmor %vm2973_vm8, %vm2974_vm9  ;;  %v579_v54 = vld [vmem:[%s4507_s20 + $0x380] sm:$0xff] }
 0x297   : > { %v3643_v7 = vmul.f32 %v3492_v0, %v1083_v62  ;;  %v2967_v10 = vmul.f32 %v2966_v9, %v1213_v20  ;;  %v7662_v12 = vmul.f32 0.5, %v831_v39  ;;  %v449_v11 = vmax.f32 %v321_v2, 1e-12 }
 0x298   : > { %v2971_v3 = vmul.f32 %v4349_v35, %v2970_v37  ;;  %v2980_v50 = vor.u32 1.1754944e-38, %v2979_v36  ;;  %v2992_v1 = vand.u32 2147483647, %v7630_v44  ;;  %4356 = vrcp.f32 %v7660_v5 }
 0x299   : > { %v4353_v6 = vpop.eup %4352  ;;  %3772 = vst.msk [vmem:[%s4640_s23 + $0x340] sm:$0xff] %vm3667_vm14, %v3643_v7  ;;  %v705_v4 = vmax.f32 %v577_v27, 1e-12  ;;  %4358 = vlog2.f32 %v2967_v10  ;;  %v832_v14 = vadd.f32 %v704_v16, %v448_v52  ;;  %v1085_v24 = vmul.f32 0.5, %v7602_v47  ;;  %v323_v52 = vld [vmem:[%s4501_s17 + $0x380] sm:$0xff] }
 0x29a   : > { %v4355_v17 = vpop.eup %4354  ;;  %v2972_v18 = vadd.f32 %v4349_v35, %v2971_v3  ;;  %v2984_v21 = vmul.f32 %v4353_v6, %v7630_v44  ;;  %vm2988_vm12 = vweird.f32 %v7630_v44  ;;  %v2994_v15 = vand.u32 2147483648, %v7630_v44 }
 0x29b   : > { %v3494_v63 = vmul.f32 0.6931472, %v4355_v17  ;;  %v1215_v25 = vmul.f32 %v7662_v12, %v7662_v12  ;;  %vm2989_vm13 = vweird.f32 %v4353_v6  ;;  %vm7686_vm15 = vcmp.eq.f32.partialorder %v2992_v1, 8.507059e+37  ;;  %v580_v1 = vld [vmem:[%s4507_s20 + $0x388] sm:$0xff] }
 0x29c   : > { %v2976_v8 = vsel %vm7668_vm11, %v4349_v35, %v2972_v18  ;;  %v2985_v22 = vsub.f32 1.0, %v2984_v21  ;;  %v7690_v30 = vmul.f32 %v705_v4, %v449_v11  ;;  %v7692_v19 = vmul.f32 0.5, %v832_v14  ;;  %vm7698_vm0 = vmor %vm2988_vm12, %vm2989_vm13 }
 0x29d   : > { %v3644_v32 = vmul.f32 %v3494_v63, %v1084_v60  ;;  %v2981_v31 = vsel %vm7656_vm10, %v2980_v50, %v2976_v8  ;;  %v450_v62 = vmax.f32 %v322_v26, 1e-12  ;;  %v2995_v33 = vor.u32 1.1754944e-38, %v2994_v15 }
 0x29e   : > { %v2982_v38 = vmul.f32 %v2981_v31, %v1214_v58  ;;  %v2986_v51 = vmul.f32 %v4353_v6, %v2985_v22  ;;  %v4357_v29 = vpop.eup %4356  ;;  %v3007_v20 = vand.u32 2147483647, %v7660_v5  ;;  %4360 = vrcp.f32 %v7690_v30 }
 0x29f   : > { %3773 = vst.msk [vmem:[%s4640_s23 + $0x348] sm:$0xff] %vm3667_vm14, %v3644_v32  ;;  %v706_v34 = vmax.f32 %v578_v28, 1e-12  ;;  %v4359_v43 = vpop.eup %4358  ;;  %v2999_v49 = vmul.f32 %v4357_v29, %v7660_v5  ;;  %v833_v41 = vadd.f32 %v705_v4, %v449_v11  ;;  %v1086_v44 = vmul.f32 0.5, %v7632_v23  ;;  %v324_v11 = vld [vmem:[%s4501_s17 + $0x388] sm:$0xff] }
 0x2a0   : > { %4362 = vlog2.f32 %v2982_v38  ;;  %v2987_v45 = vadd.f32 %v4353_v6, %v2986_v51  ;;  %v3496_v48 = vmul.f32 0.6931472, %v4359_v43  ;;  %vm3003_vm1 = vweird.f32 %v7660_v5 }
 0x2a1   : > { %v3009_v42 = vand.u32 2147483648, %v7660_v5  ;;  %v1216_v53 = vmul.f32 %v7692_v19, %v7692_v19  ;;  %v3000_v46 = vsub.f32 1.0, %v2999_v49  ;;  %vm3004_vm2 = vweird.f32 %v4357_v29 }
 0x2a2   : > { %v2991_v35 = vsel %vm7698_vm0, %v4353_v6, %v2987_v45  ;;  %v3645_v16 = vmul.f32 %v3496_v48, %v1085_v24  ;;  %vm7716_vm3 = vcmp.eq.f32.partialorder %v3007_v20, 8.507059e+37  ;;  %v7720_v57 = vmul.f32 %v706_v34, %v450_v62  ;;  %vm7728_vm4 = vmor %vm3003_vm1, %vm3004_vm2  ;;  %v581_v20 = vld [vmem:[%s4507_s20 + $0x390] sm:$0xff] }
 0x2a3   : > { %v2996_v56 = vsel %vm7686_vm15, %v2995_v33, %v2991_v35  ;;  %v3001_v39 = vmul.f32 %v4357_v29, %v3000_v46  ;;  %v7722_v0 = vmul.f32 0.5, %v833_v41  ;;  %v451_v60 = vmax.f32 %v323_v52, 1e-12 }
 0x2a4   : > { %v2997_v59 = vmul.f32 %v2996_v56, %v1215_v25  ;;  %v4361_v36 = vpop.eup %4360  ;;  %3774 = vst.msk [vmem:[%s4640_s23 + $0x350] sm:$0xff] %vm3667_vm14, %v3645_v16  ;;  %v3010_v55 = vor.u32 1.1754944e-38, %v3009_v42  ;;  %v3022_v58 = vand.u32 2147483647, %v7690_v30  ;;  %4364 = vrcp.f32 %v7720_v57 }
 0x2a5   : > { %v707_v37 = vmax.f32 %v579_v54, 1e-12  ;;  %v3002_v7 = vadd.f32 %v4357_v29, %v3001_v39  ;;  %v3014_v9 = vmul.f32 %v4361_v36, %v7690_v30  ;;  %v834_v61 = vadd.f32 %v706_v34, %v450_v62  ;;  %v325_v62 = vld [vmem:[%s4501_s17 + $0x390] sm:$0xff] }
 0x2a6   : > { %v4363_v27 = vpop.eup %4362  ;;  %4366 = vlog2.f32 %v2997_v59  ;;  %v1087_v5 = vmul.f32 0.5, %v7662_v12  ;;  %vm3018_vm5 = vweird.f32 %v7690_v30  ;;  %v3024_v3 = vand.u32 2147483648, %v7690_v30 }
 0x2a7   : > { %v3498_v10 = vmul.f32 0.6931472, %v4363_v27  ;;  %v3006_v6 = vsel %vm7728_vm4, %v4357_v29, %v3002_v7  ;;  %v1217_v13 = vmul.f32 %v7722_v0, %v7722_v0  ;;  %v3015_v50 = vsub.f32 1.0, %v3014_v9 }
 0x2a8   : > { %vm3019_vm6 = vweird.f32 %v4361_v36  ;;  %v3011_v17 = vsel %vm7716_vm3, %v3010_v55, %v3006_v6  ;;  %vm7746_vm7 = vcmp.eq.f32.partialorder %v3022_v58, 8.507059e+37  ;;  %v7750_v18 = vmul.f32 %v707_v37, %v451_v60  ;;  %v582_v58 = vld [vmem:[%s4507_s20 + $0x398] sm:$0xff] }
 0x2a9   : > { %v3646_v4 = vmul.f32 %v3498_v10, %v1086_v44  ;;  %v3012_v21 = vmul.f32 %v3011_v17, %v1216_v53  ;;  %v3016_v14 = vmul.f32 %v4361_v36, %v3015_v50  ;;  %v7752_v63 = vmul.f32 0.5, %v834_v61  ;;  %vm7758_vm8 = vmor %vm3018_vm5, %vm3019_vm6 }
 0x2aa   : > { %v452_v24 = vmax.f32 %v324_v11, 1e-12  ;;  %v4365_v15 = vpop.eup %4364  ;;  %v3025_v8 = vor.u32 1.1754944e-38, %v3024_v3  ;;  %v3037_v25 = vand.u32 2147483647, %v7720_v57  ;;  %4368 = vrcp.f32 %v7750_v18 }
 0x2ab   : > { %3775 = vst.msk [vmem:[%s4640_s23 + $0x358] sm:$0xff] %vm3667_vm14, %v3646_v4  ;;  %v708_v22 = vmax.f32 %v580_v1, 1e-12  ;;  %4370 = vlog2.f32 %v3012_v21  ;;  %v3017_v32 = vadd.f32 %v4361_v36, %v3016_v14  ;;  %v3029_v31 = vmul.f32 %v4365_v15, %v7720_v57 }
 0x2ac   : > { %v4367_v28 = vpop.eup %4366  ;;  %v835_v47 = vadd.f32 %v707_v37, %v451_v60  ;;  %v1088_v30 = vmul.f32 0.5, %v7692_v19  ;;  %vm3033_vm9 = vweird.f32 %v7720_v57  ;;  %v3039_v51 = vand.u32 2147483648, %v7720_v57  ;;  %v326_v60 = vld [vmem:[%s4501_s17 + $0x398] sm:$0xff] }
 0x2ad   : > { %v3500_v38 = vmul.f32 0.6931472, %v4367_v28  ;;  %v3021_v29 = vsel %vm7758_vm8, %v4361_v36, %v3017_v32  ;;  %v1218_v40 = vmul.f32 %v7752_v63, %v7752_v63  ;;  %v3030_v33 = vsub.f32 1.0, %v3029_v31 }
 0x2ae   : > { %vm3034_vm10 = vweird.f32 %v4365_v15  ;;  %v3026_v43 = vsel %vm7746_vm7, %v3025_v8, %v3021_v29  ;;  %vm7776_vm11 = vcmp.eq.f32.partialorder %v3037_v25, 8.507059e+37  ;;  %v7780_v45 = vmul.f32 %v708_v22, %v452_v24  ;;  %v583_v25 = vld [vmem:[%s4507_s20 + $0x3a0] sm:$0xff] }
 0x2af   : > { %v3647_v34 = vmul.f32 %v3500_v38, %v1087_v5  ;;  %v3027_v49 = vmul.f32 %v3026_v43, %v1217_v13  ;;  %v3031_v41 = vmul.f32 %v4365_v15, %v3030_v33  ;;  %v7782_v48 = vmul.f32 0.5, %v835_v47  ;;  %vm7788_vm12 = vmor %vm3033_vm9, %vm3034_vm10 }
 0x2b0   : > { %v453_v44 = vmax.f32 %v325_v62, 1e-12  ;;  %v4369_v42 = vpop.eup %4368  ;;  %v3040_v35 = vor.u32 1.1754944e-38, %v3039_v51  ;;  %v3052_v53 = vand.u32 2147483647, %v7750_v18  ;;  %4372 = vrcp.f32 %v7780_v45 }
 0x2b1   : > { %3776 = vst.msk [vmem:[%s4640_s23 + $0x360] sm:$0xff] %vm3667_vm14, %v3647_v34  ;;  %v709_v46 = vmax.f32 %v581_v20, 1e-12  ;;  %v4371_v54 = vpop.eup %4370  ;;  %4374 = vlog2.f32 %v3027_v49  ;;  %v3032_v16 = vadd.f32 %v4365_v15, %v3031_v41  ;;  %v3044_v56 = vmul.f32 %v4369_v42, %v7750_v18 }
 0x2b2   : > { %v836_v23 = vadd.f32 %v708_v22, %v452_v24  ;;  %v3502_v59 = vmul.f32 0.6931472, %v4371_v54  ;;  %v1089_v57 = vmul.f32 0.5, %v7722_v0  ;;  %vm3048_vm13 = vweird.f32 %v7750_v18  ;;  %v327_v24 = vld [vmem:[%s4501_s17 + $0x3a0] sm:$0xff] }
 0x2b3   : > { %v3054_v39 = vand.u32 2147483648, %v7750_v18  ;;  %v3036_v36 = vsel %vm7788_vm12, %v4365_v15, %v3032_v16  ;;  %v1219_v2 = vmul.f32 %v7782_v48, %v7782_v48  ;;  %v3045_v55 = vsub.f32 1.0, %v3044_v56 }
 0x2b4   : > { %vm3049_vm15 = vweird.f32 %v4369_v42  ;;  %v3648_v37 = vmul.f32 %v3502_v59, %v1088_v30  ;;  %v3041_v27 = vsel %vm7776_vm11, %v3040_v35, %v3036_v36  ;;  %vm7806_vm0 = vcmp.eq.f32.partialorder %v3052_v53, 8.507059e+37  ;;  %v584_v53 = vld [vmem:[%s4507_s20 + $0x3a8] sm:$0xff] }
 0x2b5   : > { %v7810_v7 = vmul.f32 %v709_v46, %v453_v44  ;;  %v3042_v9 = vmul.f32 %v3041_v27, %v1218_v40  ;;  %v3046_v61 = vmul.f32 %v4369_v42, %v3045_v55  ;;  %v7812_v10 = vmul.f32 0.5, %v836_v23  ;;  %vm7818_vm1 = vmor %vm3048_vm13, %vm3049_vm15 }
 0x2b6   : > { %v454_v5 = vmax.f32 %v326_v60, 1e-12  ;;  %v4373_v3 = vpop.eup %4372  ;;  %3777 = vst.msk [vmem:[%s4640_s23 + $0x368] sm:$0xff] %vm3667_vm14, %v3648_v37  ;;  %v3055_v6 = vor.u32 1.1754944e-38, %v3054_v39  ;;  %v3067_v13 = vand.u32 2147483647, %v7780_v45  ;;  %v837_v12 = vadd.f32 %v709_v46, %v453_v44 }
 0x2b7   : > { %4376 = vrcp.f32 %v7810_v7  ;;  %v710_v50 = vmax.f32 %v582_v58, 1e-12  ;;  %v4375_v1 = vpop.eup %4374  ;;  %v3047_v4 = vadd.f32 %v4369_v42, %v3046_v61  ;;  %v3059_v17 = vmul.f32 %v4373_v3, %v7780_v45  ;;  %v328_v44 = vld [vmem:[%s4501_s17 + $0x3a8] sm:$0xff] }
 0x2b8   : > { %4378 = vlog2.f32 %v3042_v9  ;;  %v3504_v21 = vmul.f32 0.6931472, %v4375_v1  ;;  %v1090_v18 = vmul.f32 0.5, %v7752_v63  ;;  %vm3063_vm2 = vweird.f32 %v7780_v45 }
 0x2b9   : > { %v3069_v14 = vand.u32 2147483648, %v7780_v45  ;;  %v3051_v15 = vsel %vm7818_vm1, %v4369_v42, %v3047_v4  ;;  %v1220_v26 = vmul.f32 %v7812_v10, %v7812_v10  ;;  %v3060_v8 = vsub.f32 1.0, %v3059_v17 }
 0x2ba   : > { %vm3064_vm3 = vweird.f32 %v4373_v3  ;;  %v3649_v22 = vmul.f32 %v3504_v21, %v1089_v57  ;;  %v3056_v28 = vsel %vm7806_vm0, %v3055_v6, %v3051_v15  ;;  %vm7836_vm4 = vcmp.eq.f32.partialorder %v3067_v13, 8.507059e+37  ;;  %v585_v13 = vld [vmem:[%s4507_s20 + $0x3b0] sm:$0xff] }
 0x2bb   : > { %v7840_v32 = vmul.f32 %v710_v50, %v454_v5  ;;  %v3057_v31 = vmul.f32 %v3056_v28, %v1219_v2  ;;  %v3061_v47 = vmul.f32 %v4373_v3, %v3060_v8  ;;  %v7842_v38 = vmul.f32 0.5, %v837_v12  ;;  %vm7848_vm5 = vmor %vm3063_vm2, %vm3064_vm3 }
 0x2bc   : > { %v455_v30 = vmax.f32 %v327_v24, 1e-12  ;;  %3778 = vst.msk [vmem:[%s4640_s23 + $0x370] sm:$0xff] %vm3667_vm14, %v3649_v22  ;;  %v3070_v29 = vor.u32 1.1754944e-38, %v3069_v14  ;;  %v3082_v40 = vand.u32 2147483647, %v7810_v7  ;;  %v838_v19 = vadd.f32 %v710_v50, %v454_v5 }
 0x2bd   : > { %v4377_v51 = vpop.eup %4376  ;;  %4380 = vrcp.f32 %v7840_v32  ;;  %v711_v33 = vmax.f32 %v583_v25, 1e-12  ;;  %v3062_v34 = vadd.f32 %v4373_v3, %v3061_v47  ;;  %v1091_v45 = vmul.f32 0.5, %v7782_v48  ;;  %v329_v5 = vld [vmem:[%s4501_s17 + $0x3b0] sm:$0xff] }
 0x2be   : > { %v4379_v20 = vpop.eup %4378  ;;  %4382 = vlog2.f32 %v3057_v31  ;;  %v3074_v43 = vmul.f32 %v4377_v51, %v7810_v7  ;;  %vm3078_vm6 = vweird.f32 %v7810_v7  ;;  %v3084_v41 = vand.u32 2147483648, %v7810_v7 }
 0x2bf   : > { %v3506_v49 = vmul.f32 0.6931472, %v4379_v20  ;;  %v3066_v42 = vsel %vm7848_vm5, %v4373_v3, %v3062_v34  ;;  %v1221_v52 = vmul.f32 %v7842_v38, %v7842_v38  ;;  %vm3079_vm7 = vweird.f32 %v4377_v51 }
 0x2c0   : > { %v3075_v35 = vsub.f32 1.0, %v3074_v43  ;;  %v3071_v54 = vsel %vm7836_vm4, %v3070_v29, %v3066_v42  ;;  %vm7866_vm8 = vcmp.eq.f32.partialorder %v3082_v40, 8.507059e+37  ;;  %v7870_v16 = vmul.f32 %v711_v33, %v455_v30  ;;  %vm7878_vm9 = vmor %vm3078_vm6, %vm3079_vm7  ;;  %v586_v40 = vld [vmem:[%s4507_s20 + $0x3b8] sm:$0xff] }
 0x2c1   : > { %v3650_v46 = vmul.f32 %v3506_v49, %v1090_v18  ;;  %v3072_v56 = vmul.f32 %v3071_v54, %v1220_v26  ;;  %v7872_v59 = vmul.f32 0.5, %v838_v19  ;;  %v456_v57 = vmax.f32 %v328_v44, 1e-12 }
 0x2c2   : > { %v3076_v23 = vmul.f32 %v4377_v51, %v3075_v35  ;;  %v3085_v36 = vor.u32 1.1754944e-38, %v3084_v41  ;;  %v3097_v2 = vand.u32 2147483647, %v7840_v32  ;;  %4384 = vrcp.f32 %v7870_v16 }
 0x2c3   : > { %v4381_v39 = vpop.eup %4380  ;;  %3779 = vst.msk [vmem:[%s4640_s23 + $0x378] sm:$0xff] %vm3667_vm14, %v3650_v46  ;;  %v712_v55 = vmax.f32 %v584_v53, 1e-12  ;;  %4386 = vlog2.f32 %v3072_v56  ;;  %v839_v0 = vadd.f32 %v711_v33, %v455_v30  ;;  %v1092_v7 = vmul.f32 0.5, %v7812_v10  ;;  %v330_v30 = vld [vmem:[%s4501_s17 + $0x3b8] sm:$0xff] }
 0x2c4   : > { %v4383_v58 = vpop.eup %4382  ;;  %v3077_v37 = vadd.f32 %v4377_v51, %v3076_v23  ;;  %v3089_v27 = vmul.f32 %v4381_v39, %v7840_v32  ;;  %vm3093_vm10 = vweird.f32 %v7840_v32  ;;  %v3099_v61 = vand.u32 2147483648, %v7840_v32 }
 0x2c5   : > { %v3508_v9 = vmul.f32 0.6931472, %v4383_v58  ;;  %v1222_v11 = vmul.f32 %v7872_v59, %v7872_v59  ;;  %vm3094_vm11 = vweird.f32 %v4381_v39  ;;  %vm7896_vm12 = vcmp.eq.f32.partialorder %v3097_v2, 8.507059e+37  ;;  %v587_v2 = vld [vmem:[%s4507_s20 + $0x3c0] sm:$0xff] }
 0x2c6   : > { %v3081_v3 = vsel %vm7878_vm9, %v4377_v51, %v3077_v37  ;;  %v3090_v6 = vsub.f32 1.0, %v3089_v27  ;;  %v7900_v4 = vmul.f32 %v712_v55, %v456_v57  ;;  %v7902_v21 = vmul.f32 0.5, %v839_v0  ;;  %vm7908_vm13 = vmor %vm3093_vm10, %vm3094_vm11 }
 0x2c7   : > { %v3651_v50 = vmul.f32 %v3508_v9, %v1091_v45  ;;  %v3086_v1 = vsel %vm7866_vm8, %v3085_v36, %v3081_v3  ;;  %v457_v18 = vmax.f32 %v329_v5, 1e-12  ;;  %v3100_v15 = vor.u32 1.1754944e-38, %v3099_v61 }
 0x2c8   : > { %v3087_v17 = vmul.f32 %v3086_v1, %v1221_v52  ;;  %v3091_v12 = vmul.f32 %v4381_v39, %v3090_v6  ;;  %v4385_v14 = vpop.eup %4384  ;;  %v3112_v26 = vand.u32 2147483647, %v7870_v16  ;;  %4388 = vrcp.f32 %v7900_v4 }
 0x2c9   : > { %3780 = vst.msk [vmem:[%s4640_s23 + $0x380] sm:$0xff] %vm3667_vm14, %v3651_v50  ;;  %v713_v8 = vmax.f32 %v585_v13, 1e-12  ;;  %v4387_v25 = vpop.eup %4386  ;;  %v3104_v28 = vmul.f32 %v4385_v14, %v7870_v16  ;;  %v840_v63 = vadd.f32 %v712_v55, %v456_v57  ;;  %v1093_v32 = vmul.f32 0.5, %v7842_v38  ;;  %v331_v57 = vld [vmem:[%s4501_s17 + $0x3c0] sm:$0xff] }
 0x2ca   : > { %4390 = vlog2.f32 %v3087_v17  ;;  %v3092_v22 = vadd.f32 %v4381_v39, %v3091_v12  ;;  %v3510_v31 = vmul.f32 0.6931472, %v4387_v25  ;;  %vm3108_vm15 = vweird.f32 %v7870_v16 }
 0x2cb   : > { %v3114_v47 = vand.u32 2147483648, %v7870_v16  ;;  %v1223_v62 = vmul.f32 %v7902_v21, %v7902_v21  ;;  %v3105_v29 = vsub.f32 1.0, %v3104_v28  ;;  %vm3109_vm0 = vweird.f32 %v4385_v14 }
 0x2cc   : > { %v3096_v51 = vsel %vm7908_vm13, %v4381_v39, %v3092_v22  ;;  %v3652_v33 = vmul.f32 %v3510_v31, %v1092_v7  ;;  %vm7926_vm1 = vcmp.eq.f32.partialorder %v3112_v26, 8.507059e+37  ;;  %v7930_v34 = vmul.f32 %v713_v8, %v457_v18  ;;  %vm7938_vm2 = vmor %vm3108_vm15, %vm3109_vm0  ;;  %v588_v26 = vld [vmem:[%s4507_s20 + $0x3c8] sm:$0xff] }
 0x2cd   : > { %v3101_v20 = vsel %vm7896_vm12, %v3100_v15, %v3096_v51  ;;  %v3106_v19 = vmul.f32 %v4385_v14, %v3105_v29  ;;  %v7932_v49 = vmul.f32 0.5, %v840_v63  ;;  %v458_v45 = vmax.f32 %v330_v30, 1e-12 }
 0x2ce   : > { %v3102_v43 = vmul.f32 %v3101_v20, %v1222_v11  ;;  %v4389_v41 = vpop.eup %4388  ;;  %3781 = vst.msk [vmem:[%s4640_s23 + $0x388] sm:$0xff] %vm3667_vm14, %v3652_v33  ;;  %v3115_v42 = vor.u32 1.1754944e-38, %v3114_v47  ;;  %v3127_v52 = vand.u32 2147483647, %v7900_v4  ;;  %4392 = vrcp.f32 %v7930_v34 }
 0x2cf   : > { %v714_v35 = vmax.f32 %v586_v40, 1e-12  ;;  %v3107_v46 = vadd.f32 %v4385_v14, %v3106_v19  ;;  %v3119_v54 = vmul.f32 %v4389_v41, %v7900_v4  ;;  %v841_v48 = vadd.f32 %v713_v8, %v457_v18  ;;  %v332_v18 = vld [vmem:[%s4501_s17 + $0x3c8] sm:$0xff] }
 0x2d0   : > { %v4391_v53 = vpop.eup %4390  ;;  %4394 = vlog2.f32 %v3102_v43  ;;  %v1094_v16 = vmul.f32 0.5, %v7872_v59  ;;  %vm3123_vm3 = vweird.f32 %v7900_v4  ;;  %v3129_v23 = vand.u32 2147483648, %v7900_v4 }
 0x2d1   : > { %v3512_v56 = vmul.f32 0.6931472, %v4391_v53  ;;  %v3111_v39 = vsel %vm7938_vm2, %v4385_v14, %v3107_v46  ;;  %v1224_v60 = vmul.f32 %v7932_v49, %v7932_v49  ;;  %v3120_v36 = vsub.f32 1.0, %v3119_v54 }
 0x2d2   : > { %vm3124_vm4 = vweird.f32 %v4389_v41  ;;  %v3116_v58 = vsel %vm7926_vm1, %v3115_v42, %v3111_v39  ;;  %vm7956_vm5 = vcmp.eq.f32.partialorder %v3127_v52, 8.507059e+37  ;;  %v7960_v37 = vmul.f32 %v714_v35, %v458_v45  ;;  %v589_v52 = vld [vmem:[%s4507_s20 + $0x3d0] sm:$0xff] }
 0x2d3   : > { %v3653_v55 = vmul.f32 %v3512_v56, %v1093_v32  ;;  %v3117_v27 = vmul.f32 %v3116_v58, %v1223_v62  ;;  %v3121_v0 = vmul.f32 %v4389_v41, %v3120_v36  ;;  %v7962_v9 = vmul.f32 0.5, %v841_v48  ;;  %vm7968_vm6 = vmor %vm3123_vm3, %vm3124_vm4 }
 0x2d4   : > { %v459_v7 = vmax.f32 %v331_v57, 1e-12  ;;  %v4393_v61 = vpop.eup %4392  ;;  %v3130_v3 = vor.u32 1.1754944e-38, %v3129_v23  ;;  %v3142_v11 = vand.u32 2147483647, %v7930_v34  ;;  %4396 = vrcp.f32 %v7960_v37  ;;  %v8101_v57 = vld [vmem:[%s4501_s17 + $0x3e8] sm:$0xff] }
 0x2d5   : > { %3782 = vst.msk [vmem:[%s4640_s23 + $0x390] sm:$0xff] %vm3667_vm14, %v3653_v55  ;;  %v715_v6 = vmax.f32 %v587_v2, 1e-12  ;;  %4398 = vlog2.f32 %v3117_v27  ;;  %v3122_v50 = vadd.f32 %v4389_v41, %v3121_v0  ;;  %v3134_v1 = vmul.f32 %v4393_v61, %v7930_v34 }
 0x2d6   : > { %v4395_v13 = vpop.eup %4394  ;;  %v842_v10 = vadd.f32 %v714_v35, %v458_v45  ;;  %v1095_v4 = vmul.f32 0.5, %v7902_v21  ;;  %vm3138_vm7 = vweird.f32 %v7930_v34  ;;  %v3144_v12 = vand.u32 2147483648, %v7930_v34  ;;  %v333_v45 = vld [vmem:[%s4501_s17 + $0x3d0] sm:$0xff] }
 0x2d7   : > { %v3514_v17 = vmul.f32 0.6931472, %v4395_v13  ;;  %v3126_v14 = vsel %vm7968_vm6, %v4389_v41, %v3122_v50  ;;  %v1225_v24 = vmul.f32 %v7962_v9, %v7962_v9  ;;  %v3135_v15 = vsub.f32 1.0, %v3134_v1 }
 0x2d8   : > { %vm3139_vm8 = vweird.f32 %v4393_v61  ;;  %v3131_v25 = vsel %vm7956_vm5, %v3130_v3, %v3126_v14  ;;  %vm7986_vm9 = vcmp.eq.f32.partialorder %v3142_v11, 8.507059e+37  ;;  %v7990_v22 = vmul.f32 %v715_v6, %v459_v7  ;;  %v590_v11 = vld [vmem:[%s4507_s20 + $0x3d8] sm:$0xff] }
 0x2d9   : > { %v3654_v8 = vmul.f32 %v3514_v17, %v1094_v16  ;;  %v3132_v28 = vmul.f32 %v3131_v25, %v1224_v60  ;;  %v3136_v63 = vmul.f32 %v4393_v61, %v3135_v15  ;;  %v7992_v31 = vmul.f32 0.5, %v842_v10  ;;  %vm7998_vm10 = vmor %vm3138_vm7, %vm3139_vm8 }
 0x2da   : > { %v460_v32 = vmax.f32 %v332_v18, 1e-12  ;;  %v4397_v47 = vpop.eup %4396  ;;  %v3145_v51 = vor.u32 1.1754944e-38, %v3144_v12  ;;  %v3157_v62 = vand.u32 2147483647, %v7960_v37  ;;  %4400 = vrcp.f32 %v7990_v22  ;;  %v593_v18 = vld [vmem:[%s4507_s20 + $0x3f0] sm:$0xff] }
 0x2db   : > { %3783 = vst.msk [vmem:[%s4640_s23 + $0x398] sm:$0xff] %vm3667_vm14, %v3654_v8  ;;  %v716_v29 = vmax.f32 %v588_v26, 1e-12  ;;  %v4399_v40 = vpop.eup %4398  ;;  %4402 = vlog2.f32 %v3132_v28  ;;  %v3137_v33 = vadd.f32 %v4393_v61, %v3136_v63  ;;  %v3149_v20 = vmul.f32 %v4397_v47, %v7960_v37 }
 0x2dc   : > { %v843_v38 = vadd.f32 %v715_v6, %v459_v7  ;;  %v3516_v43 = vmul.f32 0.6931472, %v4399_v40  ;;  %v1096_v34 = vmul.f32 0.5, %v7932_v49  ;;  %vm3153_vm11 = vweird.f32 %v7960_v37  ;;  %v334_v7 = vld [vmem:[%s4501_s17 + $0x3d8] sm:$0xff] }
 0x2dd   : > { %v3159_v19 = vand.u32 2147483648, %v7960_v37  ;;  %v3141_v41 = vsel %vm7998_vm10, %v4393_v61, %v3137_v33  ;;  %v1226_v44 = vmul.f32 %v7992_v31, %v7992_v31  ;;  %v3150_v42 = vsub.f32 1.0, %v3149_v20 }
 0x2de   : > { %vm3154_vm12 = vweird.f32 %v4397_v47  ;;  %v3655_v35 = vmul.f32 %v3516_v43, %v1095_v4  ;;  %v3146_v53 = vsel %vm7986_vm9, %v3145_v51, %v3141_v41  ;;  %vm8016_vm13 = vcmp.eq.f32.partialorder %v3157_v62, 8.507059e+37  ;;  %v591_v62 = vld [vmem:[%s4507_s20 + $0x3e0] sm:$0xff] }
 0x2df   : > { %v8020_v46 = vmul.f32 %v716_v29, %v460_v32  ;;  %v3147_v54 = vmul.f32 %v3146_v53, %v1225_v24  ;;  %v3151_v48 = vmul.f32 %v4397_v47, %v3150_v42  ;;  %v8022_v56 = vmul.f32 0.5, %v843_v38  ;;  %vm8028_vm15 = vmor %vm3153_vm11, %vm3154_vm12 }
 0x2e0   : > { %v461_v16 = vmax.f32 %v333_v45, 1e-12  ;;  %v4401_v23 = vpop.eup %4400  ;;  %3784 = vst.msk [vmem:[%s4640_s23 + $0x3a0] sm:$0xff] %vm3667_vm14, %v3655_v35  ;;  %v3160_v39 = vor.u32 1.1754944e-38, %v3159_v19  ;;  %v3172_v60 = vand.u32 2147483647, %v7990_v22  ;;  %v844_v59 = vadd.f32 %v716_v29, %v460_v32 }
 0x2e1   : > { %4404 = vrcp.f32 %v8020_v46  ;;  %v717_v36 = vmax.f32 %v589_v52, 1e-12  ;;  %v4403_v2 = vpop.eup %4402  ;;  %v3152_v55 = vadd.f32 %v4397_v47, %v3151_v48  ;;  %v3164_v58 = vmul.f32 %v4401_v23, %v7990_v22  ;;  %v335_v32 = vld [vmem:[%s4501_s17 + $0x3e0] sm:$0xff] }
 0x2e2   : > { %4406 = vlog2.f32 %v3147_v54  ;;  %v3518_v27 = vmul.f32 0.6931472, %v4403_v2  ;;  %v1097_v37 = vmul.f32 0.5, %v7962_v9  ;;  %vm3168_vm0 = vweird.f32 %v7990_v22 }
 0x2e3   : > { %v3174_v0 = vand.u32 2147483648, %v7990_v22  ;;  %v3156_v61 = vsel %vm8028_vm15, %v4397_v47, %v3152_v55  ;;  %v1227_v5 = vmul.f32 %v8022_v56, %v8022_v56  ;;  %v3165_v3 = vsub.f32 1.0, %v3164_v58 }
 0x2e4   : > { %vm3169_vm1 = vweird.f32 %v4401_v23  ;;  %v3656_v6 = vmul.f32 %v3518_v27, %v1096_v34  ;;  %v3161_v13 = vsel %vm8016_vm13, %v3160_v39, %v3156_v61  ;;  %vm8046_vm2 = vcmp.eq.f32.partialorder %v3172_v60, 8.507059e+37  ;;  %v592_v39 = vld [vmem:[%s4507_s20 + $0x3e8] sm:$0xff] }
 0x2e5   : > { %v8050_v50 = vmul.f32 %v717_v36, %v461_v16  ;;  %v3162_v1 = vmul.f32 %v3161_v13, %v1226_v44  ;;  %v3166_v10 = vmul.f32 %v4401_v23, %v3165_v3  ;;  %v8052_v17 = vmul.f32 0.5, %v844_v59  ;;  %vm8058_vm3 = vmor %vm3168_vm0, %vm3169_vm1 }
 0x2e6   : > { %v462_v4 = vmax.f32 %v334_v7, 1e-12  ;;  %3785 = vst.msk [vmem:[%s4640_s23 + $0x3a8] sm:$0xff] %vm3667_vm14, %v3656_v6  ;;  %v3175_v14 = vor.u32 1.1754944e-38, %v3174_v0  ;;  %v3187_v24 = vand.u32 2147483647, %v8020_v46  ;;  %vm3183_vm4 = vweird.f32 %v8020_v46 }
 0x2e7   : > { %v4405_v12 = vpop.eup %4404  ;;  %4408 = vrcp.f32 %v8050_v50  ;;  %v718_v15 = vmax.f32 %v590_v11, 1e-12  ;;  %v3167_v8 = vadd.f32 %v4401_v23, %v3166_v10  ;;  %v3189_v21 = vand.u32 2147483648, %v8020_v46 }
 0x2e8   : > { %v4407_v26 = vpop.eup %4406  ;;  %4410 = vlog2.f32 %v3162_v1  ;;  %v3179_v25 = vmul.f32 %v4405_v12, %v8020_v46  ;;  %v1098_v22 = vmul.f32 0.5, %v7992_v31  ;;  %v845_v63 = vadd.f32 %v717_v36, %v461_v16 }
 0x2e9   : > { %v3520_v28 = vmul.f32 0.6931472, %v4407_v26  ;;  %v3171_v47 = vsel %vm8058_vm3, %v4401_v23, %v3167_v8  ;;  %v1228_v30 = vmul.f32 %v8052_v17, %v8052_v17  ;;  %vm3184_vm5 = vweird.f32 %v4405_v12 }
 0x2ea   : > { %v3180_v51 = vsub.f32 1.0, %v3179_v25  ;;  %v3176_v40 = vsel %vm8046_vm2, %v3175_v14, %v3171_v47  ;;  %vm8076_vm6 = vcmp.eq.f32.partialorder %v3187_v24, 8.507059e+37  ;;  %v8080_v33 = vmul.f32 %v718_v15, %v462_v4  ;;  %vm8086_vm7 = vmor %vm3183_vm4, %vm3184_vm5 }
 0x2eb   : > { %v3657_v29 = vmul.f32 %v3520_v28, %v1097_v37  ;;  %v3177_v20 = vmul.f32 %v3176_v40, %v1227_v5  ;;  %v3190_v43 = vor.u32 1.1754944e-38, %v3189_v21  ;;  %v463_v34 = vmax.f32 %v335_v32, 1e-12 }
 0x2ec   : > { %v3181_v38 = vmul.f32 %v4405_v12, %v3180_v51  ;;  %v8090_v41 = vmul.f32 0.5, %v845_v63  ;;  %v3202_v44 = vand.u32 2147483647, %v8050_v50  ;;  %4412 = vrcp.f32 %v8080_v33 }
 0x2ed   : > { %v4409_v19 = vpop.eup %4408  ;;  %3786 = vst.msk [vmem:[%s4640_s23 + $0x3b0] sm:$0xff] %vm3667_vm14, %v3657_v29  ;;  %v719_v42 = vmax.f32 %v591_v62, 1e-12  ;;  %4414 = vlog2.f32 %v3177_v20  ;;  %v3204_v49 = vand.u32 2147483648, %v8050_v50  ;;  %v1099_v54 = vmul.f32 0.5, %v8022_v56 }
 0x2ee   : > { %v4411_v52 = vpop.eup %4410  ;;  %v3182_v35 = vadd.f32 %v4405_v12, %v3181_v38  ;;  %v3194_v53 = vmul.f32 %v4409_v19, %v8050_v50  ;;  %v846_v48 = vadd.f32 %v718_v15, %v462_v4  ;;  %vm3198_vm8 = vweird.f32 %v8050_v50 }
 0x2ef   : > { %v3522_v46 = vmul.f32 0.6931472, %v4411_v52  ;;  %vm3199_vm9 = vweird.f32 %v4409_v19  ;;  %v1229_v2 = vmul.f32 %v8090_v41, %v8090_v41  ;;  %v8108_v56 = vmul.f32 %v719_v42, %v463_v34 }
 0x2f0   : > { %v3186_v16 = vsel %vm8086_vm7, %v4405_v12, %v3182_v35  ;;  %v3195_v23 = vsub.f32 1.0, %v3194_v53  ;;  %vm8110_vm10 = vcmp.eq.f32.partialorder %v3202_v44, 8.507059e+37  ;;  %v3205_v27 = vor.u32 1.1754944e-38, %v3204_v49  ;;  %vm8116_vm11 = vmor %vm3198_vm8, %vm3199_vm9  ;;  %v337_v12 = vld [vmem:[%s4501_s17 + $0x3f0] sm:$0xff] }
 0x2f1   : > { %v3658_v60 = vmul.f32 %v3522_v46, %v1098_v22  ;;  %v3191_v36 = vsel %vm8076_vm6, %v3190_v43, %v3186_v16  ;;  %v8120_v7 = vmul.f32 0.5, %v846_v48  ;;  %4416 = vrcp.f32 %v8108_v56  ;;  %v338_v43 = vld [vmem:[%s4501_s17 + $0x3f8] sm:$0xff] }
 0x2f2   : > { %v3192_v55 = vmul.f32 %v3191_v36, %v1228_v30  ;;  %v3196_v58 = vmul.f32 %v4409_v19, %v3195_v23  ;;  %v4413_v37 = vpop.eup %4412  ;;  %v464_v61 = vmax.f32 %v8101_v57, 1e-12  ;;  %v720_v5 = vmax.f32 %v592_v39, 1e-12 }
 0x2f3   : > { %3787 = vst.msk [vmem:[%s4640_s23 + $0x3b8] sm:$0xff] %vm3667_vm14, %v3658_v60  ;;  %v4415_v3 = vpop.eup %4414  ;;  %v3209_v6 = vmul.f32 %v4413_v37, %v8080_v33  ;;  %v3217_v13 = vand.u32 2147483647, %v8080_v33  ;;  %vm3213_vm12 = vweird.f32 %v8080_v33  ;;  %v3219_v50 = vand.u32 2147483648, %v8080_v33 }
 0x2f4   : > { %4418 = vlog2.f32 %v3192_v55  ;;  %v3197_v11 = vadd.f32 %v4409_v19, %v3196_v58  ;;  %v3524_v9 = vmul.f32 0.6931472, %v4415_v3  ;;  %vm3214_vm13 = vweird.f32 %v4413_v37 }
 0x2f5   : > { %v3210_v10 = vsub.f32 1.0, %v3209_v6  ;;  %v847_v4 = vadd.f32 %v719_v42, %v463_v34  ;;  %v1100_v24 = vmul.f32 0.5, %v8052_v17  ;;  %v8135_v26 = vmul.f32 %v720_v5, %v464_v61  ;;  %vm8147_vm0 = vmor %vm3213_vm12, %vm3214_vm13  ;;  %v594_v34 = vld [vmem:[%s4507_s20 + $0x3f8] sm:$0xff] }
 0x2f6   : > { %v3201_v1 = vsel %vm8116_vm11, %v4409_v19, %v3197_v11  ;;  %v3659_v14 = vmul.f32 %v3524_v9, %v1099_v54  ;;  %v1230_v25 = vmul.f32 %v8120_v7, %v8120_v7  ;;  %vm8139_vm15 = vcmp.eq.f32.partialorder %v3217_v13, 8.507059e+37 }
 0x2f7   : > { %v3206_v15 = vsel %vm8110_vm10, %v3205_v27, %v3201_v1  ;;  %v3211_v21 = vmul.f32 %v4413_v37, %v3210_v10  ;;  %v4417_v22 = vpop.eup %4416  ;;  %v3220_v63 = vor.u32 1.1754944e-38, %v3219_v50  ;;  %4420 = vrcp.f32 %v8135_v26 }
 0x2f8   : > { %v3207_v8 = vmul.f32 %v3206_v15, %v1229_v2  ;;  %3788 = vst.msk [vmem:[%s4640_s23 + $0x3c0] sm:$0xff] %vm3667_vm14, %v3659_v14  ;;  %v465_v32 = vmax.f32 %v337_v12, 1e-12  ;;  %v721_v47 = vmax.f32 %v593_v18, 1e-12  ;;  %v8152_v62 = vmul.f32 0.5, %v847_v4 }
 0x2f9   : > { %v3212_v51 = vadd.f32 %v4413_v37, %v3211_v21  ;;  %v3224_v29 = vmul.f32 %v4417_v22, %v8108_v56  ;;  %vm3228_vm1 = vweird.f32 %v8108_v56  ;;  %v3234_v31 = vand.u32 2147483648, %v8108_v56 }
 0x2fa   : > { %v4419_v30 = vpop.eup %4418  ;;  %4422 = vlog2.f32 %v3207_v8  ;;  %vm3229_vm2 = vweird.f32 %v4417_v22  ;;  %v3232_v38 = vand.u32 2147483647, %v8108_v56  ;;  %v848_v44 = vadd.f32 %v720_v5, %v464_v61 }
 0x2fb   : > { %v3526_v40 = vmul.f32 0.6931472, %v4419_v30  ;;  %v3216_v33 = vsel %vm8147_vm0, %v4413_v37, %v3212_v51  ;;  %v3225_v20 = vsub.f32 1.0, %v3224_v29  ;;  %v8164_v42 = vmul.f32 %v721_v47, %v465_v32  ;;  %vm8173_vm3 = vmor %vm3228_vm1, %vm3229_vm2 }
 0x2fc   : > { %v3221_v45 = vsel %vm8139_vm15, %v3220_v63, %v3216_v33  ;;  %v1101_v52 = vmul.f32 0.5, %v8090_v41  ;;  %v1231_v53 = vmul.f32 %v8152_v62, %v8152_v62  ;;  %v3235_v48 = vor.u32 1.1754944e-38, %v3234_v31 }
 0x2fd   : > { %v3660_v19 = vmul.f32 %v3526_v40, %v1100_v24  ;;  %v3222_v35 = vmul.f32 %v3221_v45, %v1230_v25  ;;  %v3226_v49 = vmul.f32 %v4417_v22, %v3225_v20  ;;  %v4421_v46 = vpop.eup %4420  ;;  %4424 = vrcp.f32 %v8164_v42 }
 0x2fe   : > { %v466_v16 = vmax.f32 %v338_v43, 1e-12  ;;  %v722_v23 = vmax.f32 %v594_v34, 1e-12  ;;  %vm3233_vm4 = vcmp.eq.f32.partialorder %v3232_v38, 8.507059e+37  ;;  %v3239_v39 = vmul.f32 %v4421_v46, %v8135_v26 }
 0x2ff   : > { %3789 = vst.msk [vmem:[%s4640_s23 + $0x3c8] sm:$0xff] %vm3667_vm14, %v3660_v19  ;;  %4426 = vlog2.f32 %v3222_v35  ;;  %v3227_v57 = vadd.f32 %v4417_v22, %v3226_v49  ;;  %v976_v36 = vmul.f32 0.5, %v848_v44  ;;  %vm3243_vm5 = vweird.f32 %v8135_v26 }
 0x300   : > { %v4423_v41 = vpop.eup %4422  ;;  %v3249_v2 = vand.u32 2147483648, %v8135_v26  ;;  %v3240_v55 = vsub.f32 1.0, %v3239_v39  ;;  %vm3244_vm6 = vweird.f32 %v4421_v46  ;;  %v3247_v58 = vand.u32 2147483647, %v8135_v26 }
 0x301   : > { %v3528_v60 = vmul.f32 0.6931472, %v4423_v41  ;;  %v3231_v56 = vsel %vm8173_vm3, %v4417_v22, %v3227_v57  ;;  %v849_v37 = vadd.f32 %v721_v47, %v465_v32  ;;  %v1362_v0 = vmul.f32 %v722_v23, %v466_v16  ;;  %vm8189_vm7 = vmor %vm3243_vm5, %vm3244_vm6 }
 0x302   : > { %v3236_v27 = vsel %vm3233_vm4, %v3235_v48, %v3231_v56  ;;  %v3241_v5 = vmul.f32 %v4421_v46, %v3240_v55  ;;  %v1102_v11 = vmul.f32 0.5, %v8120_v7  ;;  %v1232_v6 = vmul.f32 %v976_v36, %v976_v36 }
 0x303   : > { %v3661_v59 = vmul.f32 %v3528_v60, %v1101_v52  ;;  %v3237_v61 = vmul.f32 %v3236_v27, %v1231_v53  ;;  %v4425_v3 = vpop.eup %4424  ;;  %v3250_v9 = vor.u32 1.1754944e-38, %v3249_v2  ;;  %4428 = vrcp.f32 %v1362_v0 }
 0x304   : > { %v3242_v1 = vadd.f32 %v4421_v46, %v3241_v5  ;;  %vm3248_vm8 = vcmp.eq.f32.partialorder %v3247_v58, 8.507059e+37  ;;  %v3254_v10 = vmul.f32 %v4425_v3, %v8164_v42  ;;  %v977_v12 = vmul.f32 0.5, %v849_v37 }
 0x305   : > { %3790 = vst.msk [vmem:[%s4640_s23 + $0x3d0] sm:$0xff] %vm3667_vm14, %v3661_v59  ;;  %v4427_v50 = vpop.eup %4426  ;;  %4430 = vlog2.f32 %v3237_v61  ;;  %vm3258_vm9 = vweird.f32 %v8164_v42  ;;  %v3264_v7 = vand.u32 2147483648, %v8164_v42  ;;  %vm3259_vm10 = vweird.f32 %v4425_v3 }
 0x306   : > { %v3530_v4 = vmul.f32 0.6931472, %v4427_v50  ;;  %v3246_v18 = vsel %vm8189_vm7, %v4421_v46, %v3242_v1  ;;  %v3255_v14 = vsub.f32 1.0, %v3254_v10  ;;  %v3262_v24 = vand.u32 2147483647, %v8164_v42  ;;  %vm8204_vm11 = vmor %vm3258_vm9, %vm3259_vm10 }
 0x307   : > { %v3251_v26 = vsel %vm3248_vm8, %v3250_v9, %v3246_v18  ;;  %v850_v8 = vadd.f32 %v722_v23, %v466_v16  ;;  %v1103_v22 = vmul.f32 0.5, %v8152_v62  ;;  %v1233_v17 = vmul.f32 %v977_v12, %v977_v12 }
 0x308   : > { %v3662_v15 = vmul.f32 %v3530_v4, %v1102_v11  ;;  %v3252_v25 = vmul.f32 %v3251_v26, %v1232_v6  ;;  %v3256_v21 = vmul.f32 %v4425_v3, %v3255_v14  ;;  %v3265_v32 = vor.u32 1.1754944e-38, %v3264_v7 }
 0x309   : > { %v4429_v28 = vpop.eup %4428  ;;  %vm3263_vm12 = vcmp.eq.f32.partialorder %v3262_v24, 8.507059e+37  ;;  %v978_v40 = vmul.f32 0.5, %v850_v8  ;;  %vm3273_vm13 = vweird.f32 %v1362_v0  ;;  %v3279_v31 = vand.u32 2147483648, %v1362_v0 }
 0x30a   : > { %3791 = vst.msk [vmem:[%s4640_s23 + $0x3d8] sm:$0xff] %vm3667_vm14, %v3662_v15  ;;  %4432 = vlog2.f32 %v3252_v25  ;;  %v3257_v30 = vadd.f32 %v4425_v3, %v3256_v21  ;;  %v3269_v51 = vmul.f32 %v4429_v28, %v1362_v0  ;;  %vm3274_vm15 = vweird.f32 %v4429_v28 }
 0x30b   : > { %v4431_v47 = vpop.eup %4430  ;;  %v3277_v20 = vand.u32 2147483647, %v1362_v0  ;;  %v1104_v45 = vmul.f32 0.5, %v976_v36  ;;  %vm3275_vm0 = vmor %vm3273_vm13, %vm3274_vm15  ;;  %v3280_v44 = vor.u32 1.1754944e-38, %v3279_v31  ;;  %v1234_v52 = vmul.f32 %v978_v40, %v978_v40 }
 0x30c   : > { %v3532_v29 = vmul.f32 0.6931472, %v4431_v47  ;;  %v3261_v62 = vsel %vm8204_vm11, %v4425_v3, %v3257_v30  ;;  %v3270_v33 = vsub.f32 1.0, %v3269_v51  ;;  %v1105_v16 = vmul.f32 0.5, %v977_v12 }
 0x30d   : > { %v3266_v43 = vsel %vm3263_vm12, %v3265_v32, %v3261_v62  ;;  %vm3278_vm1 = vcmp.eq.f32.partialorder %v3277_v20, 8.507059e+37  ;;  %v1106_v39 = vmul.f32 0.5, %v978_v40 }
 0x30e   : > { %v3663_v38 = vmul.f32 %v3532_v29, %v1103_v22  ;;  %v3267_v34 = vmul.f32 %v3266_v43, %v1233_v17  ;;  %v3271_v19 = vmul.f32 %v4429_v28, %v3270_v33 }
 0x310   : > { %3792 = vst.msk [vmem:[%s4640_s23 + $0x3e0] sm:$0xff] %vm3667_vm14, %v3663_v38  ;;  %v4433_v42 = vpop.eup %4432  ;;  %4434 = vlog2.f32 %v3267_v34  ;;  %v3272_v35 = vadd.f32 %v4429_v28, %v3271_v19 }
 0x311   : > { %v3534_v53 = vmul.f32 0.6931472, %v4433_v42 }
 0x312   : > { %v3276_v49 = vsel %vm3275_vm0, %v4429_v28, %v3272_v35 }
 0x313   : > { %v3664_v46 = vmul.f32 %v3534_v53, %v1104_v45  ;;  %v3281_v54 = vsel %vm3278_vm1, %v3280_v44, %v3276_v49 }
 0x314   : > { %v3282_v48 = vmul.f32 %v3281_v54, %v1234_v52 }
 0x315   : > { %3793 = vst.msk [vmem:[%s4640_s23 + $0x3e8] sm:$0xff] %vm3667_vm14, %v3664_v46 }
 0x316   : > { %v4435_v23 = vpop.eup %4434  ;;  %4436 = vlog2.f32 %v3282_v48 }
 0x317   : > { %v3536_v41 = vmul.f32 0.6931472, %v4435_v23 }
 0x319   : > { %v3665_v57 = vmul.f32 %v3536_v41, %v1105_v16 }
 0x31b   : > { %3794 = vst.msk [vmem:[%s4640_s23 + $0x3f0] sm:$0xff] %vm3667_vm14, %v3665_v57 }
 0x31c   : > { %v4437_v60 = vpop.eup %4436 }
 0x31d   : > { %v3538_v36 = vmul.f32 0.6931472, %v4437_v60 }
 0x31f   : > { %v3666_v2 = vmul.f32 %v3538_v36, %v1106_v39 }
 0x321   : > { %3795 = vst.msk [vmem:[%s4640_s23 + $0x3f8] sm:$0xff] %vm3667_vm14, %v3666_v2 }
 0x322 PF: > { %s12_s11 = sadd.s32 1, %s4460_s11   ;;  %s8720_s9 = smov %s4456_s10 }
 0x323   : > { %p9_p5 = scmp.ge.s32.totalorder %s12_s11, 4   ;;  %s8721_s10 = smov %s8723_s12 }
 0x325   :  { %11 = sbr.rel (!%p9_p5) target bundleno = 2 (0x2), region = 61 }

</bundles_post_ra>
